<compile_context>
chip_gen: v6e
topology: v6e:2x2x1
jax: 0.10.0
libtpu: 0.0.40
codegen_flags: <defaults>
</compile_context>

<pallas_src>
import numpy as np

import jax
import jax.numpy as jnp
from jax.experimental import pallas as pl
from jax.experimental.pallas import tpu as pltpu


IMG = 32
# (Cin, Cout, H_in) per conv layer; kernel 4x4, stride 2, pad 1 -> H_out = H_in // 2.
CONV_GEOM = [(1, 32, 32), (32, 32, 16), (32, 64, 8), (64, 64, 4)]


# ---------------------------------------------------------------------------
# The single fused Pallas kernel
# ---------------------------------------------------------------------------
def _encoder_kernel(
    x2_ref,
    s1_ref, v1_ref, c1_ref,
    s2_ref, v2_ref, c2_ref,
    s3_ref, v3_ref, c3_ref,
    s4_ref, v4_ref, c4_ref,
    e0_ref, e1_ref,
    w1a_ref, w1b_ref, b1_ref,
    w2_ref, b2_ref,
    wa_ref, ba_ref,
    wb_ref, bb_ref,
    eps_ref,
    z_ref, mu_ref, lv_ref, g_ref,
):
    """Whole CNN2DShapesLieEncoder forward, VMEM-resident end to end."""
    f32 = jnp.float32

    def conv_relu(x2, s_ref, v_ref, c_ref):
        # x2: (B*H, W*Cin)  ->  (B*Ho, Wo*Cout), which is the next layer's layout.
        out = None
        for i in range(4):                       # static unroll over kernel rows
            rows = jnp.dot(s_ref[i], x2, preferred_element_type=f32)
            term = jnp.dot(rows, v_ref[i], preferred_element_type=f32)
            out = term if out is None else out + term
        return jnp.maximum(out + c_ref[...], 0.0)

    act = conv_relu(x2_ref[...], s1_ref, v1_ref, c1_ref)      # (B*16, 16*32)
    act = conv_relu(act, s2_ref, v2_ref, c2_ref)               # (B*8,  8*32)
    act = conv_relu(act, s3_ref, v3_ref, c3_ref)               # (B*4,  4*64)
    act = conv_relu(act, s4_ref, v4_ref, c4_ref)               # (B*2,  2*64)

    # Fold the h-axis of the final (B*2, 128) map straight into dense1:
    # E0/E1 pick the h=0 / h=1 rows per batch; dense1's weight rows were
    # pre-permuted (torch (c,h,w) flatten order -> our (h,w,c)) and split by h.
    h0 = jnp.dot(e0_ref[...], act, preferred_element_type=f32)     # (B, 128)
    h1 = jnp.dot(e1_ref[...], act, preferred_element_type=f32)     # (B, 128)
    pre1 = (jnp.dot(h0, w1a_ref[...], preferred_element_type=f32)
            + jnp.dot(h1, w1b_ref[...], preferred_element_type=f32)
            + b1_ref[...])
    g1 = jnp.maximum(pre1, 0.0)                                     # dense1 + ReLU
    g = jax.nn.sigmoid(
        jnp.dot(g1, w2_ref[...], preferred_element_type=f32) + b2_ref[...])   # (B, 32)

    # Both subgroup MLPs of both branches as two block-diagonal matmuls.
    hid = jnp.maximum(
        jnp.dot(g, wa_ref[...], preferred_element_type=f32) + ba_ref[...], 0.0)   # (B, 2*128)
    out = jnp.dot(hid, wb_ref[...], preferred_element_type=f32) + bb_ref[...]     # (B, 2*lat)

    d = mu_ref.shape[-1]
    mu = out[:, :d]
    lv = out[:, d:2 * d]
    z = mu + jnp.exp(0.5 * lv) * eps_ref[...]    # fused reparameterization

    z_ref[...] = z
    mu_ref[...] = mu
    lv_ref[...] = lv
    g_ref[...] = g


def _full_spec(shape):
    nd = len(shape)
    return pl.BlockSpec(tuple(shape), lambda: (0,) * nd)


def lie_encoder_forward(kparams, x, eps):
    """== CNN2DShapesLieEncoder.forward (num_sampling == 1), one pallas_call."""
    batch = x.shape[0]
    # NCHW with C==1: row-major (B,1,32,32) == (B*32, 32) "rows x (cols*chans)".
    x2 = x.reshape(batch * IMG, IMG)

    ins = ([x2] + list(kparams["conv"]) +
           [kparams["e0"], kparams["e1"],
            kparams["w1a"], kparams["w1b"], kparams["b1"],
            kparams["w2"], kparams["b2"],
            kparams["wa"], kparams["ba"],
            kparams["wb"], kparams["bb"],
            eps])

    latent = eps.shape[1]
    n_groups = kparams["w2"].shape[1]
    out_shape = (
        jax.ShapeDtypeStruct((batch, latent), jnp.float32),     # z
        jax.ShapeDtypeStruct((batch, latent), jnp.float32),     # mu
        jax.ShapeDtypeStruct((batch, latent), jnp.float32),     # logvar
        jax.ShapeDtypeStruct((batch, n_groups), jnp.float32),   # group_feats
    )
    return pl.pallas_call(
        _encoder_kernel,
        out_shape=out_shape,
        in_specs=[_full_spec(a.shape) for a in ins],
        out_specs=tuple(_full_spec(s.shape) for s in out_shape),
        compiler_params=pltpu.CompilerParams(vmem_limit_bytes=32 * 1024 * 1024),
    )(*ins)


# ---------------------------------------------------------------------------
# Parameter init (deterministic, synthetic; torch-style conv layout,
# linear weights stored as (in, out) so forward is x @ w + b)
# ---------------------------------------------------------------------------
def init_linear(key, din, dout, scale=0.05):
    kw, kb = jax.random.split(key)
    w = scale * jax.random.normal(kw, (din, dout), jnp.float32)
    b = scale * jax.random.normal(kb, (dout,), jnp.float32)
    return w, b


def init_conv(key, cin, cout, k=4, scale=0.05):
    kw, kb = jax.random.split(key)
    w = scale * jax.random.normal(kw, (cout, cin, k, k), jnp.float32)  # torch OIHW
    b = scale * jax.random.normal(kb, (cout,), jnp.float32)
    return w, b


def init_params(key, subgroup_sizes_ls, subspace_sizes_ls):
    keys = jax.random.split(key, 8 + 4 * len(subgroup_sizes_ls))
    it = iter(keys)
    params = {}
    params["convs"] = [init_conv(next(it), ci, co) for ci, co, _ in CONV_GEOM]
    params["dense1"] = init_linear(next(it), 256, 256)
    params["dense2"] = init_linear(next(it), 256, sum(subgroup_sizes_ls))
    params["to_means"] = []
    params["to_logvar"] = []
    for sg, ss in zip(subgroup_sizes_ls, subspace_sizes_ls):
        w1, b1 = init_linear(next(it), sg, sg * 4)
        w2, b2 = init_linear(next(it), sg * 4, ss)
        params["to_means"].append((w1, b1, w2, b2))
        w1, b1 = init_linear(next(it), sg, sg * 4)
        w2, b2 = init_linear(next(it), sg * 4, ss)
        params["to_logvar"].append((w1, b1, w2, b2))
    return params


# ---------------------------------------------------------------------------
# One-time host-side repack into the fused-kernel layout
# ---------------------------------------------------------------------------
def _conv_matmul_operands(w, b, cin, cout, h_in, batch):
    """Torch conv weight (Cout,Cin,4,4), stride 2, pad 1 -> S (4, B*Ho, B*H) and
    V (4, W*Cin, Wo*Cout) such that relu(sum_i (S_i @ X) @ V_i + b) on the
    (B*H, W*Cin) activation matrix equals conv+ReLU (padding == zero S/V rows)."""
    ho = h_in // 2
    s = np.zeros((4, batch * ho, batch * h_in), np.float32)
    v = np.zeros((4, h_in * cin, ho * cout), np.float32)
    for i in range(4):
        for n in range(batch):
            for h in range(ho):
                p = 2 * h + i - 1                  # padded row 2h+i -> unpadded p
                if 0 <= p < h_in:
                    s[i, n * ho + h, n * h_in + p] = 1.0
        for wo in range(ho):
            for j in range(4):
                q = 2 * wo + j - 1                 # padded col 2w+j -> unpadded q
                if 0 <= q < h_in:
                    v[i, q * cin:(q + 1) * cin,
                      wo * cout:(wo + 1) * cout] = w[:, :, i, j].T
    c = np.tile(b, ho).reshape(1, ho * cout).astype(np.float32)
    return s, v, c


def prepare_kernel_params(params, subgroup_sizes_ls, subspace_sizes_ls, batch):
    kp = {}
    conv = []
    for (cin, cout, h_in), (w, b) in zip(CONV_GEOM, params["convs"]):
        s, v, c = _conv_matmul_operands(np.asarray(w), np.asarray(b),
                                        cin, cout, h_in, batch)
        conv += [jnp.asarray(s), jnp.asarray(v), jnp.asarray(c)]
    kp["conv"] = conv

    # E0/E1 pick the h=0 / h=1 rows of the final (B*2, 2*64) feature map per batch.
    e0 = np.zeros((batch, 2 * batch), np.float32)
    e1 = np.zeros((batch, 2 * batch), np.float32)
    for n in range(batch):
        e0[n, 2 * n] = 1.0
        e1[n, 2 * n + 1] = 1.0
    kp["e0"], kp["e1"] = jnp.asarray(e0), jnp.asarray(e1)

    # dense1: torch flattens conv4 NCHW (B,64,2,2) in (c,h,w) order; our features
    # arrive in (h,w,c) order, so permute the weight rows once and split by h.
    w1 = np.asarray(params["dense1"][0])            # (256, 256), rows = torch in-idx
    perm = np.zeros(256, np.int32)
    for h in range(2):
        for w_ in range(2):
            for o in range(64):
                perm[h * 128 + w_ * 64 + o] = o * 4 + h * 2 + w_
    w1k = w1[perm, :]
    kp["w1a"] = jnp.asarray(w1k[:128, :])
    kp["w1b"] = jnp.asarray(w1k[128:, :])
    kp["b1"] = jnp.asarray(np.asarray(params["dense1"][1]).reshape(1, -1))

    kp["w2"] = params["dense2"][0]
    kp["b2"] = params["dense2"][1].reshape(1, -1)

    # Pack both subgroup MLPs of BOTH branches into two block-diagonal layers.
    n_g = sum(subgroup_sizes_ls)
    hid_br = sum(4 * s_ for s_ in subgroup_sizes_ls)
    lat = sum(subspace_sizes_ls)
    wa = np.zeros((n_g, 2 * hid_br), np.float32)
    ba = np.zeros((1, 2 * hid_br), np.float32)
    wb = np.zeros((2 * hid_br, 2 * lat), np.float32)
    bb = np.zeros((1, 2 * lat), np.float32)
    for br, branch in enumerate([params["to_means"], params["to_logvar"]]):
        rg = rh = ro = 0
        for (bw1, bb1, bw2, bb2), sgi, ssi in zip(branch, subgroup_sizes_ls,
                                                  subspace_sizes_ls):
            hi = 4 * sgi
            ca = br * hid_br + rh
            cb = br * lat + ro
            wa[rg:rg + sgi, ca:ca + hi] = np.asarray(bw1)
            ba[0, ca:ca + hi] = np.asarray(bb1)
            wb[ca:ca + hi, cb:cb + ssi] = np.asarray(bw2)
            bb[0, cb:cb + ssi] = np.asarray(bb2)
            rg += sgi
            rh += hi
            ro += ssi
    kp["wa"], kp["ba"] = jnp.asarray(wa), jnp.asarray(ba)
    kp["wb"], kp["bb"] = jnp.asarray(wb), jnp.asarray(bb)
    return kp


# ---------------------------------------------------------------------------
# Plain-JAX reference (mirrors the PyTorch module) for correctness checking
# ---------------------------------------------------------------------------
def reference_forward(params, x, eps, subgroup_sizes_ls, subspace_sizes_ls):
    hi = jax.lax.Precision.HIGHEST

    def mm(a, b):
        return jnp.dot(a, b, precision=hi)

    out = x
    for (w, b) in params["convs"]:
        out = jax.lax.conv_general_dilated(
            out, w, window_strides=(2, 2), padding=((1, 1), (1, 1)),
            dimension_numbers=("NCHW", "OIHW", "NCHW"), precision=hi)
        out = jnp.maximum(out + b.reshape(1, -1, 1, 1), 0.0)
    feat = out.reshape(out.shape[0], -1)          # torch .view(B, -1) order (c,h,w)

    w1, b1 = params["dense1"]
    g1 = jnp.maximum(mm(feat, w1) + b1, 0.0)
    w2, b2 = params["dense2"]
    g = jax.nn.sigmoid(mm(g1, w2) + b2)

    means, logvars = [], []
    b_idx = 0
    for (mw1, mb1, mw2, mb2), (lw1, lb1, lw2, lb2), sg in zip(
            params["to_means"], params["to_logvar"], subgroup_sizes_ls):
        e_idx = b_idx + sg
        gi = g[:, b_idx:e_idx]
        means.append(mm(jnp.maximum(mm(gi, mw1) + mb1, 0.0), mw2) + mb2)
        logvars.append(mm(jnp.maximum(mm(gi, lw1) + lb1, 0.0), lw2) + lb2)
        b_idx = e_idx
    mu = jnp.concatenate(means, axis=-1)
    lv = jnp.concatenate(logvars, axis=-1)
    z = mu + jnp.exp(0.5 * lv) * eps
    return z, mu, lv, g


# ---------------------------------------------------------------------------
# Main
# ---------------------------------------------------------------------------
if __name__ == "__main__":
    # config: subgroup_sizes_ls=[16,16], subspace_sizes_ls=[4,4], latent_dim=8,
    #         num_sampling=1, dense head over the 256-dim conv features.
    subgroup_sizes_ls = [16, 16]
    subspace_sizes_ls = [4, 4]
    latent_dim = sum(subspace_sizes_ls)
    batch = 2

    root = jax.random.PRNGKey(0)
    k_params, k_input, k_eps = jax.random.split(root, 3)

    params = init_params(k_params, subgroup_sizes_ls, subspace_sizes_ls)
    kparams = prepare_kernel_params(params, subgroup_sizes_ls, subspace_sizes_ls, batch)

    x = jax.random.normal(k_input, (batch, 1, IMG, IMG), jnp.float32)   # NCHW
    eps = jax.random.normal(k_eps, (batch, latent_dim), jnp.float32)    # torch.randn_like

    fwd = jax.jit(lie_encoder_forward)
    z, mu, logvar, group_feats = fwd(kparams, x, eps)
    jax.block_until_ready((z, mu, logvar, group_feats))

    assert z.shape == (batch, latent_dim)
    assert mu.shape == (batch, latent_dim)
    assert logvar.shape == (batch, latent_dim)
    assert group_feats.shape == (batch, sum(subgroup_sizes_ls))

    # Verify fused kernel against the plain-JAX reference.
    zr, mur, lvr, gr = reference_forward(params, x, eps,
                                         subgroup_sizes_ls, subspace_sizes_ls)
    np.testing.assert_allclose(np.asarray(group_feats), np.asarray(gr),
                               rtol=2e-2, atol=2e-3)
    np.testing.assert_allclose(np.asarray(mu), np.asarray(mur), rtol=2e-2, atol=2e-3)
    np.testing.assert_allclose(np.asarray(logvar), np.asarray(lvr), rtol=2e-2, atol=2e-3)
    np.testing.assert_allclose(np.asarray(z), np.asarray(zr), rtol=2e-2, atol=2e-3)

    print("KERNEL_OK")
</pallas_src>

<mosaic_0001>
module attributes {stable_mosaic.version = 11 : i64} {
  func.func @_encoder_kernel(%arg0: memref<64x32xf32, #tpu.memory_space<vmem>>, %arg1: memref<4x32x64xf32, #tpu.memory_space<vmem>>, %arg2: memref<4x32x512xf32, #tpu.memory_space<vmem>>, %arg3: memref<1x512xf32, #tpu.memory_space<vmem>>, %arg4: memref<4x16x32xf32, #tpu.memory_space<vmem>>, %arg5: memref<4x512x256xf32, #tpu.memory_space<vmem>>, %arg6: memref<1x256xf32, #tpu.memory_space<vmem>>, %arg7: memref<4x8x16xf32, #tpu.memory_space<vmem>>, %arg8: memref<4x256x256xf32, #tpu.memory_space<vmem>>, %arg9: memref<1x256xf32, #tpu.memory_space<vmem>>, %arg10: memref<4x4x8xf32, #tpu.memory_space<vmem>>, %arg11: memref<4x256x128xf32, #tpu.memory_space<vmem>>, %arg12: memref<1x128xf32, #tpu.memory_space<vmem>>, %arg13: memref<2x4xf32, #tpu.memory_space<vmem>>, %arg14: memref<2x4xf32, #tpu.memory_space<vmem>>, %arg15: memref<128x256xf32, #tpu.memory_space<vmem>>, %arg16: memref<128x256xf32, #tpu.memory_space<vmem>>, %arg17: memref<1x256xf32, #tpu.memory_space<vmem>>, %arg18: memref<256x32xf32, #tpu.memory_space<vmem>>, %arg19: memref<1x32xf32, #tpu.memory_space<vmem>>, %arg20: memref<32x256xf32, #tpu.memory_space<vmem>>, %arg21: memref<1x256xf32, #tpu.memory_space<vmem>>, %arg22: memref<256x16xf32, #tpu.memory_space<vmem>>, %arg23: memref<1x16xf32, #tpu.memory_space<vmem>>, %arg24: memref<2x8xf32, #tpu.memory_space<vmem>>, %arg25: memref<2x8xf32, #tpu.memory_space<vmem>>, %arg26: memref<2x8xf32, #tpu.memory_space<vmem>>, %arg27: memref<2x8xf32, #tpu.memory_space<vmem>>, %arg28: memref<2x32xf32, #tpu.memory_space<vmem>>) attributes {dimension_semantics = [], scalar_prefetch = 0 : i64, scratch_operands = 0 : i64, tpu.core_type = #tpu.core_type<tc>} {
    %c0 = arith.constant 0 : index
    %c0_0 = arith.constant 0 : index
    %0 = vector.load %arg0[%c0, %c0_0] : memref<64x32xf32, #tpu.memory_space<vmem>>, vector<64x32xf32>
    %c0_1 = arith.constant 0 : index
    %c0_2 = arith.constant 0 : index
    %c0_3 = arith.constant 0 : index
    %1 = vector.load %arg1[%c0_1, %c0_2, %c0_3] : memref<4x32x64xf32, #tpu.memory_space<vmem>>, vector<1x32x64xf32>
    %2 = vector.shape_cast %1 : vector<1x32x64xf32> to vector<32x64xf32>
    %cst = arith.constant dense<0.000000e+00> : vector<32x32xf32>
    %3 = tpu.matmul %2, %0, %cst {dimension_numbers = #tpu.dot_dimension_numbers<[1], [0], [0], [1], [0, 0, 1, 1], [], []>} : vector<32x64xf32>, vector<64x32xf32>, vector<32x32xf32> -> vector<32x32xf32>
    %c0_4 = arith.constant 0 : index
    %c0_5 = arith.constant 0 : index
    %c0_6 = arith.constant 0 : index
    %4 = vector.load %arg2[%c0_4, %c0_5, %c0_6] : memref<4x32x512xf32, #tpu.memory_space<vmem>>, vector<1x32x512xf32>
    %5 = vector.shape_cast %4 : vector<1x32x512xf32> to vector<32x512xf32>
    %cst_7 = arith.constant dense<0.000000e+00> : vector<32x512xf32>
    %6 = tpu.matmul %3, %5, %cst_7 {dimension_numbers = #tpu.dot_dimension_numbers<[1], [0], [0], [1], [0, 0, 1, 1], [], []>} : vector<32x32xf32>, vector<32x512xf32>, vector<32x512xf32> -> vector<32x512xf32>
    %c1 = arith.constant 1 : index
    %c0_8 = arith.constant 0 : index
    %c0_9 = arith.constant 0 : index
    %7 = vector.load %arg1[%c1, %c0_8, %c0_9] : memref<4x32x64xf32, #tpu.memory_space<vmem>>, vector<1x32x64xf32>
    %8 = vector.shape_cast %7 : vector<1x32x64xf32> to vector<32x64xf32>
    %cst_10 = arith.constant dense<0.000000e+00> : vector<32x32xf32>
    %9 = tpu.matmul %8, %0, %cst_10 {dimension_numbers = #tpu.dot_dimension_numbers<[1], [0], [0], [1], [0, 0, 1, 1], [], []>} : vector<32x64xf32>, vector<64x32xf32>, vector<32x32xf32> -> vector<32x32xf32>
    %c1_11 = arith.constant 1 : index
    %c0_12 = arith.constant 0 : index
    %c0_13 = arith.constant 0 : index
    %10 = vector.load %arg2[%c1_11, %c0_12, %c0_13] : memref<4x32x512xf32, #tpu.memory_space<vmem>>, vector<1x32x512xf32>
    %11 = vector.shape_cast %10 : vector<1x32x512xf32> to vector<32x512xf32>
    %cst_14 = arith.constant dense<0.000000e+00> : vector<32x512xf32>
    %12 = tpu.matmul %9, %11, %cst_14 {dimension_numbers = #tpu.dot_dimension_numbers<[1], [0], [0], [1], [0, 0, 1, 1], [], []>} : vector<32x32xf32>, vector<32x512xf32>, vector<32x512xf32> -> vector<32x512xf32>
    %13 = arith.addf %6, %12 : vector<32x512xf32>
    %c2 = arith.constant 2 : index
    %c0_15 = arith.constant 0 : index
    %c0_16 = arith.constant 0 : index
    %14 = vector.load %arg1[%c2, %c0_15, %c0_16] : memref<4x32x64xf32, #tpu.memory_space<vmem>>, vector<1x32x64xf32>
    %15 = vector.shape_cast %14 : vector<1x32x64xf32> to vector<32x64xf32>
    %cst_17 = arith.constant dense<0.000000e+00> : vector<32x32xf32>
    %16 = tpu.matmul %15, %0, %cst_17 {dimension_numbers = #tpu.dot_dimension_numbers<[1], [0], [0], [1], [0, 0, 1, 1], [], []>} : vector<32x64xf32>, vector<64x32xf32>, vector<32x32xf32> -> vector<32x32xf32>
    %c2_18 = arith.constant 2 : index
    %c0_19 = arith.constant 0 : index
    %c0_20 = arith.constant 0 : index
    %17 = vector.load %arg2[%c2_18, %c0_19, %c0_20] : memref<4x32x512xf32, #tpu.memory_space<vmem>>, vector<1x32x512xf32>
    %18 = vector.shape_cast %17 : vector<1x32x512xf32> to vector<32x512xf32>
    %cst_21 = arith.constant dense<0.000000e+00> : vector<32x512xf32>
    %19 = tpu.matmul %16, %18, %cst_21 {dimension_numbers = #tpu.dot_dimension_numbers<[1], [0], [0], [1], [0, 0, 1, 1], [], []>} : vector<32x32xf32>, vector<32x512xf32>, vector<32x512xf32> -> vector<32x512xf32>
    %20 = arith.addf %13, %19 : vector<32x512xf32>
    %c3 = arith.constant 3 : index
    %c0_22 = arith.constant 0 : index
    %c0_23 = arith.constant 0 : index
    %21 = vector.load %arg1[%c3, %c0_22, %c0_23] : memref<4x32x64xf32, #tpu.memory_space<vmem>>, vector<1x32x64xf32>
    %22 = vector.shape_cast %21 : vector<1x32x64xf32> to vector<32x64xf32>
    %cst_24 = arith.constant dense<0.000000e+00> : vector<32x32xf32>
    %23 = tpu.matmul %22, %0, %cst_24 {dimension_numbers = #tpu.dot_dimension_numbers<[1], [0], [0], [1], [0, 0, 1, 1], [], []>} : vector<32x64xf32>, vector<64x32xf32>, vector<32x32xf32> -> vector<32x32xf32>
    %c3_25 = arith.constant 3 : index
    %c0_26 = arith.constant 0 : index
    %c0_27 = arith.constant 0 : index
    %24 = vector.load %arg2[%c3_25, %c0_26, %c0_27] : memref<4x32x512xf32, #tpu.memory_space<vmem>>, vector<1x32x512xf32>
    %25 = vector.shape_cast %24 : vector<1x32x512xf32> to vector<32x512xf32>
    %cst_28 = arith.constant dense<0.000000e+00> : vector<32x512xf32>
    %26 = tpu.matmul %23, %25, %cst_28 {dimension_numbers = #tpu.dot_dimension_numbers<[1], [0], [0], [1], [0, 0, 1, 1], [], []>} : vector<32x32xf32>, vector<32x512xf32>, vector<32x512xf32> -> vector<32x512xf32>
    %27 = arith.addf %20, %26 : vector<32x512xf32>
    %c0_29 = arith.constant 0 : index
    %c0_30 = arith.constant 0 : index
    %28 = vector.load %arg3[%c0_29, %c0_30] : memref<1x512xf32, #tpu.memory_space<vmem>>, vector<1x512xf32>
    %29 = vector.broadcast %28 : vector<1x512xf32> to vector<32x512xf32>
    %30 = arith.addf %27, %29 : vector<32x512xf32>
    %cst_31 = arith.constant 0.000000e+00 : f32
    %31 = vector.broadcast %cst_31 : f32 to vector<32x512xf32>
    %32 = arith.maximumf %30, %31 : vector<32x512xf32>
    %c0_32 = arith.constant 0 : index
    %c0_33 = arith.constant 0 : index
    %c0_34 = arith.constant 0 : index
    %33 = vector.load %arg4[%c0_32, %c0_33, %c0_34] : memref<4x16x32xf32, #tpu.memory_space<vmem>>, vector<1x16x32xf32>
    %34 = vector.shape_cast %33 : vector<1x16x32xf32> to vector<16x32xf32>
    %cst_35 = arith.constant dense<0.000000e+00> : vector<16x512xf32>
    %35 = tpu.matmul %34, %32, %cst_35 {dimension_numbers = #tpu.dot_dimension_numbers<[1], [0], [0], [1], [0, 0, 1, 1], [], []>} : vector<16x32xf32>, vector<32x512xf32>, vector<16x512xf32> -> vector<16x512xf32>
    %c0_36 = arith.constant 0 : index
    %c0_37 = arith.constant 0 : index
    %c0_38 = arith.constant 0 : index
    %36 = vector.load %arg5[%c0_36, %c0_37, %c0_38] : memref<4x512x256xf32, #tpu.memory_space<vmem>>, vector<1x512x256xf32>
    %37 = vector.shape_cast %36 : vector<1x512x256xf32> to vector<512x256xf32>
    %cst_39 = arith.constant dense<0.000000e+00> : vector<16x256xf32>
    %38 = tpu.matmul %35, %37, %cst_39 {dimension_numbers = #tpu.dot_dimension_numbers<[1], [0], [0], [1], [0, 0, 1, 1], [], []>} : vector<16x512xf32>, vector<512x256xf32>, vector<16x256xf32> -> vector<16x256xf32>
    %c1_40 = arith.constant 1 : index
    %c0_41 = arith.constant 0 : index
    %c0_42 = arith.constant 0 : index
    %39 = vector.load %arg4[%c1_40, %c0_41, %c0_42] : memref<4x16x32xf32, #tpu.memory_space<vmem>>, vector<1x16x32xf32>
    %40 = vector.shape_cast %39 : vector<1x16x32xf32> to vector<16x32xf32>
    %cst_43 = arith.constant dense<0.000000e+00> : vector<16x512xf32>
    %41 = tpu.matmul %40, %32, %cst_43 {dimension_numbers = #tpu.dot_dimension_numbers<[1], [0], [0], [1], [0, 0, 1, 1], [], []>} : vector<16x32xf32>, vector<32x512xf32>, vector<16x512xf32> -> vector<16x512xf32>
    %c1_44 = arith.constant 1 : index
    %c0_45 = arith.constant 0 : index
    %c0_46 = arith.constant 0 : index
    %42 = vector.load %arg5[%c1_44, %c0_45, %c0_46] : memref<4x512x256xf32, #tpu.memory_space<vmem>>, vector<1x512x256xf32>
    %43 = vector.shape_cast %42 : vector<1x512x256xf32> to vector<512x256xf32>
    %cst_47 = arith.constant dense<0.000000e+00> : vector<16x256xf32>
    %44 = tpu.matmul %41, %43, %cst_47 {dimension_numbers = #tpu.dot_dimension_numbers<[1], [0], [0], [1], [0, 0, 1, 1], [], []>} : vector<16x512xf32>, vector<512x256xf32>, vector<16x256xf32> -> vector<16x256xf32>
    %45 = arith.addf %38, %44 : vector<16x256xf32>
    %c2_48 = arith.constant 2 : index
    %c0_49 = arith.constant 0 : index
    %c0_50 = arith.constant 0 : index
    %46 = vector.load %arg4[%c2_48, %c0_49, %c0_50] : memref<4x16x32xf32, #tpu.memory_space<vmem>>, vector<1x16x32xf32>
    %47 = vector.shape_cast %46 : vector<1x16x32xf32> to vector<16x32xf32>
    %cst_51 = arith.constant dense<0.000000e+00> : vector<16x512xf32>
    %48 = tpu.matmul %47, %32, %cst_51 {dimension_numbers = #tpu.dot_dimension_numbers<[1], [0], [0], [1], [0, 0, 1, 1], [], []>} : vector<16x32xf32>, vector<32x512xf32>, vector<16x512xf32> -> vector<16x512xf32>
    %c2_52 = arith.constant 2 : index
    %c0_53 = arith.constant 0 : index
    %c0_54 = arith.constant 0 : index
    %49 = vector.load %arg5[%c2_52, %c0_53, %c0_54] : memref<4x512x256xf32, #tpu.memory_space<vmem>>, vector<1x512x256xf32>
    %50 = vector.shape_cast %49 : vector<1x512x256xf32> to vector<512x256xf32>
    %cst_55 = arith.constant dense<0.000000e+00> : vector<16x256xf32>
    %51 = tpu.matmul %48, %50, %cst_55 {dimension_numbers = #tpu.dot_dimension_numbers<[1], [0], [0], [1], [0, 0, 1, 1], [], []>} : vector<16x512xf32>, vector<512x256xf32>, vector<16x256xf32> -> vector<16x256xf32>
    %52 = arith.addf %45, %51 : vector<16x256xf32>
    %c3_56 = arith.constant 3 : index
    %c0_57 = arith.constant 0 : index
    %c0_58 = arith.constant 0 : index
    %53 = vector.load %arg4[%c3_56, %c0_57, %c0_58] : memref<4x16x32xf32, #tpu.memory_space<vmem>>, vector<1x16x32xf32>
    %54 = vector.shape_cast %53 : vector<1x16x32xf32> to vector<16x32xf32>
    %cst_59 = arith.constant dense<0.000000e+00> : vector<16x512xf32>
    %55 = tpu.matmul %54, %32, %cst_59 {dimension_numbers = #tpu.dot_dimension_numbers<[1], [0], [0], [1], [0, 0, 1, 1], [], []>} : vector<16x32xf32>, vector<32x512xf32>, vector<16x512xf32> -> vector<16x512xf32>
    %c3_60 = arith.constant 3 : index
    %c0_61 = arith.constant 0 : index
    %c0_62 = arith.constant 0 : index
    %56 = vector.load %arg5[%c3_60, %c0_61, %c0_62] : memref<4x512x256xf32, #tpu.memory_space<vmem>>, vector<1x512x256xf32>
    %57 = vector.shape_cast %56 : vector<1x512x256xf32> to vector<512x256xf32>
    %cst_63 = arith.constant dense<0.000000e+00> : vector<16x256xf32>
    %58 = tpu.matmul %55, %57, %cst_63 {dimension_numbers = #tpu.dot_dimension_numbers<[1], [0], [0], [1], [0, 0, 1, 1], [], []>} : vector<16x512xf32>, vector<512x256xf32>, vector<16x256xf32> -> vector<16x256xf32>
    %59 = arith.addf %52, %58 : vector<16x256xf32>
    %c0_64 = arith.constant 0 : index
    %c0_65 = arith.constant 0 : index
    %60 = vector.load %arg6[%c0_64, %c0_65] : memref<1x256xf32, #tpu.memory_space<vmem>>, vector<1x256xf32>
    %61 = vector.broadcast %60 : vector<1x256xf32> to vector<16x256xf32>
    %62 = arith.addf %59, %61 : vector<16x256xf32>
    %cst_66 = arith.constant 0.000000e+00 : f32
    %63 = vector.broadcast %cst_66 : f32 to vector<16x256xf32>
    %64 = arith.maximumf %62, %63 : vector<16x256xf32>
    %c0_67 = arith.constant 0 : index
    %c0_68 = arith.constant 0 : index
    %c0_69 = arith.constant 0 : index
    %65 = vector.load %arg7[%c0_67, %c0_68, %c0_69] : memref<4x8x16xf32, #tpu.memory_space<vmem>>, vector<1x8x16xf32>
    %66 = vector.shape_cast %65 : vector<1x8x16xf32> to vector<8x16xf32>
    %cst_70 = arith.constant dense<0.000000e+00> : vector<8x256xf32>
    %67 = tpu.matmul %66, %64, %cst_70 {dimension_numbers = #tpu.dot_dimension_numbers<[1], [0], [0], [1], [0, 0, 1, 1], [], []>} : vector<8x16xf32>, vector<16x256xf32>, vector<8x256xf32> -> vector<8x256xf32>
    %c0_71 = arith.constant 0 : index
    %c0_72 = arith.constant 0 : index
    %c0_73 = arith.constant 0 : index
    %68 = vector.load %arg8[%c0_71, %c0_72, %c0_73] : memref<4x256x256xf32, #tpu.memory_space<vmem>>, vector<1x256x256xf32>
    %69 = vector.shape_cast %68 : vector<1x256x256xf32> to vector<256x256xf32>
    %cst_74 = arith.constant dense<0.000000e+00> : vector<8x256xf32>
    %70 = tpu.matmul %67, %69, %cst_74 {dimension_numbers = #tpu.dot_dimension_numbers<[1], [0], [0], [1], [0, 0, 1, 1], [], []>} : vector<8x256xf32>, vector<256x256xf32>, vector<8x256xf32> -> vector<8x256xf32>
    %c1_75 = arith.constant 1 : index
    %c0_76 = arith.constant 0 : index
    %c0_77 = arith.constant 0 : index
    %71 = vector.load %arg7[%c1_75, %c0_76, %c0_77] : memref<4x8x16xf32, #tpu.memory_space<vmem>>, vector<1x8x16xf32>
    %72 = vector.shape_cast %71 : vector<1x8x16xf32> to vector<8x16xf32>
    %cst_78 = arith.constant dense<0.000000e+00> : vector<8x256xf32>
    %73 = tpu.matmul %72, %64, %cst_78 {dimension_numbers = #tpu.dot_dimension_numbers<[1], [0], [0], [1], [0, 0, 1, 1], [], []>} : vector<8x16xf32>, vector<16x256xf32>, vector<8x256xf32> -> vector<8x256xf32>
    %c1_79 = arith.constant 1 : index
    %c0_80 = arith.constant 0 : index
    %c0_81 = arith.constant 0 : index
    %74 = vector.load %arg8[%c1_79, %c0_80, %c0_81] : memref<4x256x256xf32, #tpu.memory_space<vmem>>, vector<1x256x256xf32>
    %75 = vector.shape_cast %74 : vector<1x256x256xf32> to vector<256x256xf32>
    %cst_82 = arith.constant dense<0.000000e+00> : vector<8x256xf32>
    %76 = tpu.matmul %73, %75, %cst_82 {dimension_numbers = #tpu.dot_dimension_numbers<[1], [0], [0], [1], [0, 0, 1, 1], [], []>} : vector<8x256xf32>, vector<256x256xf32>, vector<8x256xf32> -> vector<8x256xf32>
    %77 = arith.addf %70, %76 : vector<8x256xf32>
    %c2_83 = arith.constant 2 : index
    %c0_84 = arith.constant 0 : index
    %c0_85 = arith.constant 0 : index
    %78 = vector.load %arg7[%c2_83, %c0_84, %c0_85] : memref<4x8x16xf32, #tpu.memory_space<vmem>>, vector<1x8x16xf32>
    %79 = vector.shape_cast %78 : vector<1x8x16xf32> to vector<8x16xf32>
    %cst_86 = arith.constant dense<0.000000e+00> : vector<8x256xf32>
    %80 = tpu.matmul %79, %64, %cst_86 {dimension_numbers = #tpu.dot_dimension_numbers<[1], [0], [0], [1], [0, 0, 1, 1], [], []>} : vector<8x16xf32>, vector<16x256xf32>, vector<8x256xf32> -> vector<8x256xf32>
    %c2_87 = arith.constant 2 : index
    %c0_88 = arith.constant 0 : index
    %c0_89 = arith.constant 0 : index
    %81 = vector.load %arg8[%c2_87, %c0_88, %c0_89] : memref<4x256x256xf32, #tpu.memory_space<vmem>>, vector<1x256x256xf32>
    %82 = vector.shape_cast %81 : vector<1x256x256xf32> to vector<256x256xf32>
    %cst_90 = arith.constant dense<0.000000e+00> : vector<8x256xf32>
    %83 = tpu.matmul %80, %82, %cst_90 {dimension_numbers = #tpu.dot_dimension_numbers<[1], [0], [0], [1], [0, 0, 1, 1], [], []>} : vector<8x256xf32>, vector<256x256xf32>, vector<8x256xf32> -> vector<8x256xf32>
    %84 = arith.addf %77, %83 : vector<8x256xf32>
    %c3_91 = arith.constant 3 : index
    %c0_92 = arith.constant 0 : index
    %c0_93 = arith.constant 0 : index
    %85 = vector.load %arg7[%c3_91, %c0_92, %c0_93] : memref<4x8x16xf32, #tpu.memory_space<vmem>>, vector<1x8x16xf32>
    %86 = vector.shape_cast %85 : vector<1x8x16xf32> to vector<8x16xf32>
    %cst_94 = arith.constant dense<0.000000e+00> : vector<8x256xf32>
    %87 = tpu.matmul %86, %64, %cst_94 {dimension_numbers = #tpu.dot_dimension_numbers<[1], [0], [0], [1], [0, 0, 1, 1], [], []>} : vector<8x16xf32>, vector<16x256xf32>, vector<8x256xf32> -> vector<8x256xf32>
    %c3_95 = arith.constant 3 : index
    %c0_96 = arith.constant 0 : index
    %c0_97 = arith.constant 0 : index
    %88 = vector.load %arg8[%c3_95, %c0_96, %c0_97] : memref<4x256x256xf32, #tpu.memory_space<vmem>>, vector<1x256x256xf32>
    %89 = vector.shape_cast %88 : vector<1x256x256xf32> to vector<256x256xf32>
    %cst_98 = arith.constant dense<0.000000e+00> : vector<8x256xf32>
    %90 = tpu.matmul %87, %89, %cst_98 {dimension_numbers = #tpu.dot_dimension_numbers<[1], [0], [0], [1], [0, 0, 1, 1], [], []>} : vector<8x256xf32>, vector<256x256xf32>, vector<8x256xf32> -> vector<8x256xf32>
    %91 = arith.addf %84, %90 : vector<8x256xf32>
    %c0_99 = arith.constant 0 : index
    %c0_100 = arith.constant 0 : index
    %92 = vector.load %arg9[%c0_99, %c0_100] : memref<1x256xf32, #tpu.memory_space<vmem>>, vector<1x256xf32>
    %93 = vector.broadcast %92 : vector<1x256xf32> to vector<8x256xf32>
    %94 = arith.addf %91, %93 : vector<8x256xf32>
    %cst_101 = arith.constant 0.000000e+00 : f32
    %95 = vector.broadcast %cst_101 : f32 to vector<8x256xf32>
    %96 = arith.maximumf %94, %95 : vector<8x256xf32>
    %c0_102 = arith.constant 0 : index
    %c0_103 = arith.constant 0 : index
    %c0_104 = arith.constant 0 : index
    %97 = vector.load %arg10[%c0_102, %c0_103, %c0_104] : memref<4x4x8xf32, #tpu.memory_space<vmem>>, vector<1x4x8xf32>
    %98 = vector.shape_cast %97 : vector<1x4x8xf32> to vector<4x8xf32>
    %cst_105 = arith.constant dense<0.000000e+00> : vector<4x256xf32>
    %99 = tpu.matmul %98, %96, %cst_105 {dimension_numbers = #tpu.dot_dimension_numbers<[1], [0], [0], [1], [0, 0, 1, 1], [], []>} : vector<4x8xf32>, vector<8x256xf32>, vector<4x256xf32> -> vector<4x256xf32>
    %c0_106 = arith.constant 0 : index
    %c0_107 = arith.constant 0 : index
    %c0_108 = arith.constant 0 : index
    %100 = vector.load %arg11[%c0_106, %c0_107, %c0_108] : memref<4x256x128xf32, #tpu.memory_space<vmem>>, vector<1x256x128xf32>
    %101 = vector.shape_cast %100 : vector<1x256x128xf32> to vector<256x128xf32>
    %cst_109 = arith.constant dense<0.000000e+00> : vector<4x128xf32>
    %102 = tpu.matmul %99, %101, %cst_109 {dimension_numbers = #tpu.dot_dimension_numbers<[1], [0], [0], [1], [0, 0, 1, 1], [], []>} : vector<4x256xf32>, vector<256x128xf32>, vector<4x128xf32> -> vector<4x128xf32>
    %c1_110 = arith.constant 1 : index
    %c0_111 = arith.constant 0 : index
    %c0_112 = arith.constant 0 : index
    %103 = vector.load %arg10[%c1_110, %c0_111, %c0_112] : memref<4x4x8xf32, #tpu.memory_space<vmem>>, vector<1x4x8xf32>
    %104 = vector.shape_cast %103 : vector<1x4x8xf32> to vector<4x8xf32>
    %cst_113 = arith.constant dense<0.000000e+00> : vector<4x256xf32>
    %105 = tpu.matmul %104, %96, %cst_113 {dimension_numbers = #tpu.dot_dimension_numbers<[1], [0], [0], [1], [0, 0, 1, 1], [], []>} : vector<4x8xf32>, vector<8x256xf32>, vector<4x256xf32> -> vector<4x256xf32>
    %c1_114 = arith.constant 1 : index
    %c0_115 = arith.constant 0 : index
    %c0_116 = arith.constant 0 : index
    %106 = vector.load %arg11[%c1_114, %c0_115, %c0_116] : memref<4x256x128xf32, #tpu.memory_space<vmem>>, vector<1x256x128xf32>
    %107 = vector.shape_cast %106 : vector<1x256x128xf32> to vector<256x128xf32>
    %cst_117 = arith.constant dense<0.000000e+00> : vector<4x128xf32>
    %108 = tpu.matmul %105, %107, %cst_117 {dimension_numbers = #tpu.dot_dimension_numbers<[1], [0], [0], [1], [0, 0, 1, 1], [], []>} : vector<4x256xf32>, vector<256x128xf32>, vector<4x128xf32> -> vector<4x128xf32>
    %109 = arith.addf %102, %108 : vector<4x128xf32>
    %c2_118 = arith.constant 2 : index
    %c0_119 = arith.constant 0 : index
    %c0_120 = arith.constant 0 : index
    %110 = vector.load %arg10[%c2_118, %c0_119, %c0_120] : memref<4x4x8xf32, #tpu.memory_space<vmem>>, vector<1x4x8xf32>
    %111 = vector.shape_cast %110 : vector<1x4x8xf32> to vector<4x8xf32>
    %cst_121 = arith.constant dense<0.000000e+00> : vector<4x256xf32>
    %112 = tpu.matmul %111, %96, %cst_121 {dimension_numbers = #tpu.dot_dimension_numbers<[1], [0], [0], [1], [0, 0, 1, 1], [], []>} : vector<4x8xf32>, vector<8x256xf32>, vector<4x256xf32> -> vector<4x256xf32>
    %c2_122 = arith.constant 2 : index
    %c0_123 = arith.constant 0 : index
    %c0_124 = arith.constant 0 : index
    %113 = vector.load %arg11[%c2_122, %c0_123, %c0_124] : memref<4x256x128xf32, #tpu.memory_space<vmem>>, vector<1x256x128xf32>
    %114 = vector.shape_cast %113 : vector<1x256x128xf32> to vector<256x128xf32>
    %cst_125 = arith.constant dense<0.000000e+00> : vector<4x128xf32>
    %115 = tpu.matmul %112, %114, %cst_125 {dimension_numbers = #tpu.dot_dimension_numbers<[1], [0], [0], [1], [0, 0, 1, 1], [], []>} : vector<4x256xf32>, vector<256x128xf32>, vector<4x128xf32> -> vector<4x128xf32>
    %116 = arith.addf %109, %115 : vector<4x128xf32>
    %c3_126 = arith.constant 3 : index
    %c0_127 = arith.constant 0 : index
    %c0_128 = arith.constant 0 : index
    %117 = vector.load %arg10[%c3_126, %c0_127, %c0_128] : memref<4x4x8xf32, #tpu.memory_space<vmem>>, vector<1x4x8xf32>
    %118 = vector.shape_cast %117 : vector<1x4x8xf32> to vector<4x8xf32>
    %cst_129 = arith.constant dense<0.000000e+00> : vector<4x256xf32>
    %119 = tpu.matmul %118, %96, %cst_129 {dimension_numbers = #tpu.dot_dimension_numbers<[1], [0], [0], [1], [0, 0, 1, 1], [], []>} : vector<4x8xf32>, vector<8x256xf32>, vector<4x256xf32> -> vector<4x256xf32>
    %c3_130 = arith.constant 3 : index
    %c0_131 = arith.constant 0 : index
    %c0_132 = arith.constant 0 : index
    %120 = vector.load %arg11[%c3_130, %c0_131, %c0_132] : memref<4x256x128xf32, #tpu.memory_space<vmem>>, vector<1x256x128xf32>
    %121 = vector.shape_cast %120 : vector<1x256x128xf32> to vector<256x128xf32>
    %cst_133 = arith.constant dense<0.000000e+00> : vector<4x128xf32>
    %122 = tpu.matmul %119, %121, %cst_133 {dimension_numbers = #tpu.dot_dimension_numbers<[1], [0], [0], [1], [0, 0, 1, 1], [], []>} : vector<4x256xf32>, vector<256x128xf32>, vector<4x128xf32> -> vector<4x128xf32>
    %123 = arith.addf %116, %122 : vector<4x128xf32>
    %c0_134 = arith.constant 0 : index
    %c0_135 = arith.constant 0 : index
    %124 = vector.load %arg12[%c0_134, %c0_135] : memref<1x128xf32, #tpu.memory_space<vmem>>, vector<1x128xf32>
    %125 = vector.broadcast %124 : vector<1x128xf32> to vector<4x128xf32>
    %126 = arith.addf %123, %125 : vector<4x128xf32>
    %cst_136 = arith.constant 0.000000e+00 : f32
    %127 = vector.broadcast %cst_136 : f32 to vector<4x128xf32>
    %128 = arith.maximumf %126, %127 : vector<4x128xf32>
    %c0_137 = arith.constant 0 : index
    %c0_138 = arith.constant 0 : index
    %129 = vector.load %arg13[%c0_137, %c0_138] : memref<2x4xf32, #tpu.memory_space<vmem>>, vector<2x4xf32>
    %cst_139 = arith.constant dense<0.000000e+00> : vector<2x128xf32>
    %130 = tpu.matmul %129, %128, %cst_139 {dimension_numbers = #tpu.dot_dimension_numbers<[1], [0], [0], [1], [0, 0, 1, 1], [], []>} : vector<2x4xf32>, vector<4x128xf32>, vector<2x128xf32> -> vector<2x128xf32>
    %c0_140 = arith.constant 0 : index
    %c0_141 = arith.constant 0 : index
    %131 = vector.load %arg14[%c0_140, %c0_141] : memref<2x4xf32, #tpu.memory_space<vmem>>, vector<2x4xf32>
    %cst_142 = arith.constant dense<0.000000e+00> : vector<2x128xf32>
    %132 = tpu.matmul %131, %128, %cst_142 {dimension_numbers = #tpu.dot_dimension_numbers<[1], [0], [0], [1], [0, 0, 1, 1], [], []>} : vector<2x4xf32>, vector<4x128xf32>, vector<2x128xf32> -> vector<2x128xf32>
    %c0_143 = arith.constant 0 : index
    %c0_144 = arith.constant 0 : index
    %133 = vector.load %arg15[%c0_143, %c0_144] : memref<128x256xf32, #tpu.memory_space<vmem>>, vector<128x256xf32>
    %cst_145 = arith.constant dense<0.000000e+00> : vector<2x256xf32>
    %134 = tpu.matmul %130, %133, %cst_145 {dimension_numbers = #tpu.dot_dimension_numbers<[1], [0], [0], [1], [0, 0, 1, 1], [], []>} : vector<2x128xf32>, vector<128x256xf32>, vector<2x256xf32> -> vector<2x256xf32>
    %c0_146 = arith.constant 0 : index
    %c0_147 = arith.constant 0 : index
    %135 = vector.load %arg16[%c0_146, %c0_147] : memref<128x256xf32, #tpu.memory_space<vmem>>, vector<128x256xf32>
    %cst_148 = arith.constant dense<0.000000e+00> : vector<2x256xf32>
    %136 = tpu.matmul %132, %135, %cst_148 {dimension_numbers = #tpu.dot_dimension_numbers<[1], [0], [0], [1], [0, 0, 1, 1], [], []>} : vector<2x128xf32>, vector<128x256xf32>, vector<2x256xf32> -> vector<2x256xf32>
    %137 = arith.addf %134, %136 : vector<2x256xf32>
    %c0_149 = arith.constant 0 : index
    %c0_150 = arith.constant 0 : index
    %138 = vector.load %arg17[%c0_149, %c0_150] : memref<1x256xf32, #tpu.memory_space<vmem>>, vector<1x256xf32>
    %139 = vector.broadcast %138 : vector<1x256xf32> to vector<2x256xf32>
    %140 = arith.addf %137, %139 : vector<2x256xf32>
    %cst_151 = arith.constant 0.000000e+00 : f32
    %141 = vector.broadcast %cst_151 : f32 to vector<2x256xf32>
    %142 = arith.maximumf %140, %141 : vector<2x256xf32>
    %c0_152 = arith.constant 0 : index
    %c0_153 = arith.constant 0 : index
    %143 = vector.load %arg18[%c0_152, %c0_153] : memref<256x32xf32, #tpu.memory_space<vmem>>, vector<256x32xf32>
    %cst_154 = arith.constant dense<0.000000e+00> : vector<2x32xf32>
    %144 = tpu.matmul %142, %143, %cst_154 {dimension_numbers = #tpu.dot_dimension_numbers<[1], [0], [0], [1], [0, 0, 1, 1], [], []>} : vector<2x256xf32>, vector<256x32xf32>, vector<2x32xf32> -> vector<2x32xf32>
    %c0_155 = arith.constant 0 : index
    %c0_156 = arith.constant 0 : index
    %145 = vector.load %arg19[%c0_155, %c0_156] : memref<1x32xf32, #tpu.memory_space<vmem>>, vector<1x32xf32>
    %146 = vector.broadcast %145 : vector<1x32xf32> to vector<2x32xf32>
    %147 = arith.addf %144, %146 : vector<2x32xf32>
    %148 = arith.negf %147 : vector<2x32xf32>
    %149 = math.exp %148 : vector<2x32xf32>
    %cst_157 = arith.constant 1.000000e+00 : f32
    %150 = vector.broadcast %cst_157 : f32 to vector<2x32xf32>
    %151 = arith.addf %150, %149 : vector<2x32xf32>
    %152 = arith.divf %150, %151 : vector<2x32xf32>
    %c0_158 = arith.constant 0 : index
    %c0_159 = arith.constant 0 : index
    %153 = vector.load %arg20[%c0_158, %c0_159] : memref<32x256xf32, #tpu.memory_space<vmem>>, vector<32x256xf32>
    %cst_160 = arith.constant dense<0.000000e+00> : vector<2x256xf32>
    %154 = tpu.matmul %152, %153, %cst_160 {dimension_numbers = #tpu.dot_dimension_numbers<[1], [0], [0], [1], [0, 0, 1, 1], [], []>} : vector<2x32xf32>, vector<32x256xf32>, vector<2x256xf32> -> vector<2x256xf32>
    %c0_161 = arith.constant 0 : index
    %c0_162 = arith.constant 0 : index
    %155 = vector.load %arg21[%c0_161, %c0_162] : memref<1x256xf32, #tpu.memory_space<vmem>>, vector<1x256xf32>
    %156 = vector.broadcast %155 : vector<1x256xf32> to vector<2x256xf32>
    %157 = arith.addf %154, %156 : vector<2x256xf32>
    %cst_163 = arith.constant 0.000000e+00 : f32
    %158 = vector.broadcast %cst_163 : f32 to vector<2x256xf32>
    %159 = arith.maximumf %157, %158 : vector<2x256xf32>
    %c0_164 = arith.constant 0 : index
    %c0_165 = arith.constant 0 : index
    %160 = vector.load %arg22[%c0_164, %c0_165] : memref<256x16xf32, #tpu.memory_space<vmem>>, vector<256x16xf32>
    %cst_166 = arith.constant dense<0.000000e+00> : vector<2x16xf32>
    %161 = tpu.matmul %159, %160, %cst_166 {dimension_numbers = #tpu.dot_dimension_numbers<[1], [0], [0], [1], [0, 0, 1, 1], [], []>} : vector<2x256xf32>, vector<256x16xf32>, vector<2x16xf32> -> vector<2x16xf32>
    %c0_167 = arith.constant 0 : index
    %c0_168 = arith.constant 0 : index
    %162 = vector.load %arg23[%c0_167, %c0_168] : memref<1x16xf32, #tpu.memory_space<vmem>>, vector<1x16xf32>
    %163 = vector.broadcast %162 : vector<1x16xf32> to vector<2x16xf32>
    %164 = arith.addf %161, %163 : vector<2x16xf32>
    %165 = vector.extract_strided_slice %164 {offsets = [0, 0], sizes = [2, 8], strides = [1, 1]} : vector<2x16xf32> to vector<2x8xf32>
    %166 = vector.extract_strided_slice %164 {offsets = [0, 8], sizes = [2, 8], strides = [1, 1]} : vector<2x16xf32> to vector<2x8xf32>
    %cst_169 = arith.constant 5.000000e-01 : f32
    %167 = vector.broadcast %cst_169 : f32 to vector<2x8xf32>
    %168 = arith.mulf %167, %166 : vector<2x8xf32>
    %169 = math.exp %168 : vector<2x8xf32>
    %c0_170 = arith.constant 0 : index
    %c0_171 = arith.constant 0 : index
    %170 = vector.load %arg24[%c0_170, %c0_171] : memref<2x8xf32, #tpu.memory_space<vmem>>, vector<2x8xf32>
    %171 = arith.mulf %169, %170 : vector<2x8xf32>
    %172 = arith.addf %165, %171 : vector<2x8xf32>
    %c0_172 = arith.constant 0 : index
    %c0_173 = arith.constant 0 : index
    %173 = vector.load %arg25[%c0_172, %c0_173] : memref<2x8xf32, #tpu.memory_space<vmem>>, vector<2x8xf32>
    tpu.vector_store %arg25[%c0_172, %c0_173], %172 {strides = array<i32>} : memref<2x8xf32, #tpu.memory_space<vmem>>, vector<2x8xf32>,
    %c0_174 = arith.constant 0 : index
    %c0_175 = arith.constant 0 : index
    %174 = vector.load %arg26[%c0_174, %c0_175] : memref<2x8xf32, #tpu.memory_space<vmem>>, vector<2x8xf32>
    tpu.vector_store %arg26[%c0_174, %c0_175], %165 {strides = array<i32>} : memref<2x8xf32, #tpu.memory_space<vmem>>, vector<2x8xf32>,
    %c0_176 = arith.constant 0 : index
    %c0_177 = arith.constant 0 : index
    %175 = vector.load %arg27[%c0_176, %c0_177] : memref<2x8xf32, #tpu.memory_space<vmem>>, vector<2x8xf32>
    tpu.vector_store %arg27[%c0_176, %c0_177], %166 {strides = array<i32>} : memref<2x8xf32, #tpu.memory_space<vmem>>, vector<2x8xf32>,
    %c0_178 = arith.constant 0 : index
    %c0_179 = arith.constant 0 : index
    %176 = vector.load %arg28[%c0_178, %c0_179] : memref<2x32xf32, #tpu.memory_space<vmem>>, vector<2x32xf32>
    tpu.vector_store %arg28[%c0_178, %c0_179], %152 {strides = array<i32>} : memref<2x32xf32, #tpu.memory_space<vmem>>, vector<2x32xf32>,
    return
  }
}

</mosaic_0001>

<bundles_post_ra>
// kernel: lie_encoder_forward.1
= control target key start
LH: loop header
LB: loop body
LE: loop exit
PB: predicated region body
PF: predicated region fallthrough
CT: control target
= control target key end

     0   :  { %s7927_s0 = inlined_call_operand.hbm [shape: f32[64,32], index: 0, kind: input, shape index: {}]   ;;  %s7928_s1 = inlined_call_operand.hbm [shape: f32[4,32,64], index: 1, kind: input, shape index: {}]   ;;  %s7929_s2 = inlined_call_operand.hbm [shape: f32[4,32,512], index: 2, kind: input, shape index: {}]   ;;  %s7930_s3 = inlined_call_operand.hbm [shape: f32[1,512], index: 3, kind: input, shape index: {}]   ;;  %s7931_s4 = inlined_call_operand.hbm [shape: f32[4,16,32], index: 4, kind: input, shape index: {}]   ;;  %s7932_s5 = inlined_call_operand.hbm [shape: f32[4,512,256], index: 5, kind: input, shape index: {}]   ;;  %s7933_s6 = inlined_call_operand.hbm [shape: f32[1,256], index: 6, kind: input, shape index: {}]   ;;  %s7934_s7 = inlined_call_operand.hbm [shape: f32[4,8,16], index: 7, kind: input, shape index: {}]   ;;  %s7935_s8 = inlined_call_operand.hbm [shape: f32[4,256,256], index: 8, kind: input, shape index: {}]   ;;  %s7936_s9 = inlined_call_operand.hbm [shape: f32[1,256], index: 9, kind: input, shape index: {}]   ;;  %s7937_s10 = inlined_call_operand.hbm [shape: f32[4,4,8], index: 10, kind: input, shape index: {}]   ;;  %s7938_s11 = inlined_call_operand.hbm [shape: f32[4,256,128], index: 11, kind: input, shape index: {}]   ;;  %s7939_s12 = inlined_call_operand.hbm [shape: f32[1,128], index: 12, kind: input, shape index: {}]   ;;  %s7940_s13 = inlined_call_operand.hbm [shape: f32[2,4], index: 13, kind: input, shape index: {}]   ;;  %s7941_s14 = inlined_call_operand.hbm [shape: f32[2,4], index: 14, kind: input, shape index: {}]   ;;  %s7942_s15 = inlined_call_operand.hbm [shape: f32[128,256], index: 15, kind: input, shape index: {}]   ;;  %s7943_s16 = inlined_call_operand.hbm [shape: f32[128,256], index: 16, kind: input, shape index: {}]   ;;  %s7944_s17 = inlined_call_operand.hbm [shape: f32[1,256], index: 17, kind: input, shape index: {}]   ;;  %s7945_s18 = inlined_call_operand.vmem [shape: f32[256,32], index: 18, kind: input, shape index: {}]   ;;  %s7946_s19 = inlined_call_operand.hbm [shape: f32[1,32], index: 19, kind: input, shape index: {}]   ;;  %s7947_s20 = inlined_call_operand.hbm [shape: f32[32,256], index: 20, kind: input, shape index: {}]   ;;  %s7948_s21 = inlined_call_operand.hbm [shape: f32[1,256], index: 21, kind: input, shape index: {}]   ;;  %s7949_s22 = inlined_call_operand.vmem [shape: f32[256,16], index: 22, kind: input, shape index: {}]   ;;  %s7950_s23 = inlined_call_operand.hbm [shape: f32[1,16], index: 23, kind: input, shape index: {}]   ;;  %s7951_s24 = inlined_call_operand.hbm [shape: f32[2,8], index: 24, kind: input, shape index: {}]   ;;  %s7952_s25 = inlined_call_operand.hbm [shape: f32[2,8], index: 25, kind: output, shape index: {0}]   ;;  %s7953_s26 = inlined_call_operand.hbm [shape: f32[2,8], index: 26, kind: output, shape index: {1}]   ;;  %s7954_s27 = inlined_call_operand.hbm [shape: f32[2,8], index: 27, kind: output, shape index: {2}]   ;;  %s7955_s28 = inlined_call_operand.hbm [shape: f32[2,32], index: 28, kind: output, shape index: {3}]  }
   0x1   :  { %7960 = sst [smem:[#allocation59_spill]] %s7927_s0 }
   0x2   :  { %7961 = sst [smem:[#allocation60_spill]] %s7928_s1 }
   0x3   :  { %7962 = sst [smem:[#allocation61_spill]] %s7929_s2 }
   0x4   :  { %7963 = sst [smem:[#allocation62_spill]] %s7930_s3 }
   0x5   :  { %7964 = sst [smem:[#allocation63_spill]] %s7931_s4 }
   0x6   :  { %7965 = sst [smem:[#allocation64_spill]] %s7932_s5 }
   0x7   :  { %7966 = sst [smem:[#allocation65_spill]] %s7933_s6 }
   0x8   :  { %7967 = sst [smem:[#allocation66_spill]] %s7934_s7 }
   0x9   :  { %7968 = sst [smem:[#allocation67_spill]] %s7935_s8 }
   0xa   :  { %7969 = sst [smem:[#allocation68_spill]] %s7936_s9 }
   0xb   :  { %7970 = sst [smem:[#allocation69_spill]] %s7937_s10 }
   0xc   :  { %7971 = sst [smem:[#allocation70_spill]] %s7938_s11 }
   0xd   :  { %7972 = sst [smem:[#allocation71_spill]] %s7939_s12 }
   0xe   :  { %7973 = sst [smem:[#allocation72_spill]] %s7952_s25 }
   0xf   :  { %34 = vsyncpa [#allocation3], 0 }
  0x10   :  { %35 = vsyncpa [#allocation6], 0 }
  0x11   :  { %36 = vsyncpa [#allocation9], 0 }
  0x12   :  { %37 = vsyncpa [#allocation12], 0 }
  0x13   :  { %38 = vsyncpa [#allocation15], 0 }
  0x14   :  { %39 = vsyncpa [#allocation18], 0 }
  0x15   :  { %40 = vsyncpa [#allocation21], 0 }
  0x16   :  { %41 = vsyncpa [#allocation24], 0 }
  0x17   :  { %42 = vsyncpa [#allocation27], 0 }
  0x18   :  { %43 = vsyncpa [#allocation30], 0 }
  0x19   :  { %44 = vsyncpa [#allocation33], 0 }
  0x1a   :  { %45 = vsyncpa [#allocation36], 0 }
  0x1b   :  { %46 = vsyncpa [#allocation4], 0 }
  0x1c   :  { %47 = vsyncpa [#allocation40], 0 }
  0x1d   :  { %48 = vsyncpa [#allocation43], 0  ;;  %s6950_s8 = smov [#allocation5]   ;;  %s6951_s9 = smov [#allocation8]  }
  0x1e   :  { %s66_s5 = sshll.u32 %s6950_s8, 4  ;;  %s91_s30 = sshll.u32 %s6951_s9, 4  ;;  %s67_s5 = int_to_ptr.vmem [resolvable:$true] %s66_s5  ;;  %s92_s30 = int_to_ptr.vmem [resolvable:$true] %s91_s30 }
  0x1f   :  { %s6388_s3 = scalar_lea.vmem %s67_s5, 2048  ;;  %p6393_p1 = scmp.lt.s32.totalorder %s67_s5, %s67_s5 }
  0x20   :  { %p6389_p0 = scmp.ne.s32.totalorder %s67_s5, %s6388_s3  ;;  %p6394_p2 = scmp.lt.s32.totalorder %s6388_s3, %s6388_s3 }
  0x22   :  { %p6395_p3 = por %p6394_p2, %p6393_p1 }
  0x24   :  { %p6396_p4 = pnand %p6395_p3, %p6389_p0 }
  0x26   :  { %6399 = shalt.err (!%p6396_p4)
}
  0x27   :  { %s6952_s6 = smov 128   ;;  %s6953_s10 = smov 8  }
  0x28   :  { %s7974_s29 = sld [smem:[#allocation60_spill]]  ;;  %s6408_s2 = scalar_lea.vmem %s92_s30, 64 }
  0x29   :  { %p6409_p5 = scmp.ne.s32.totalorder %s92_s30, %s6408_s2  ;;  %p6413_p6 = scmp.lt.s32.totalorder %s92_s30, %s92_s30 }
  0x2a   :  { %p6414_p7 = scmp.lt.s32.totalorder %s6408_s2, %s6408_s2 }
  0x2c   :  { %p6415_p8 = por %p6414_p7, %p6413_p6 }
  0x2e   :  { %72 = dma.hbm_to_vmem [thread:$0]  %s7974_s29, 2048, %s67_s5, [#allocation6], %s6952_s6, %s6952_s6, %s6953_s10  }
  0x2f   :  { %p6416_p9 = pnand %p6415_p8, %p6409_p5 }
  0x31   :  { %6419 = shalt.err (!%p6416_p9)
}
  0x32   :  { %s7975_s1 = sld [smem:[#allocation62_spill]]  ;;  %s6954_s4 = smov [#allocation11]  }
  0x33   :  { %s112_s8 = sshll.u32 %s6954_s4, 4  ;;  %s113_s8 = int_to_ptr.vmem [resolvable:$true] %s112_s8 }
  0x34   :  { %s6428_s9 = scalar_lea.vmem %s113_s8, 65536  ;;  %p6433_p11 = scmp.lt.s32.totalorder %s113_s8, %s113_s8 }
  0x35   :  { %p6429_p10 = scmp.ne.s32.totalorder %s113_s8, %s6428_s9  ;;  %p6434_p12 = scmp.lt.s32.totalorder %s6428_s9, %s6428_s9 }
  0x37   :  { %p6435_p13 = por %p6434_p12, %p6433_p11 }
  0x38   :  { %94 = dma.hbm_to_vmem [thread:$0]  %s7975_s1, 64, %s92_s30, [#allocation9]  }
  0x39   :  { %p6436_p0 = pnand %p6435_p13, %p6429_p10 }
  0x3b   :  { %6439 = shalt.err (!%p6436_p0)
}
  0x3c   :  { %s7956_s5 = smov 256   ;;  %s7958_s3 = smov 16  }
  0x3d   :  { %s7976_s29 = sld [smem:[#allocation64_spill]]  ;;  %s6957_s30 = smov [#allocation14]  }
  0x3e   :  { %s134_s2 = sshll.u32 %s6957_s30, 4  ;;  %s6958_s7 = smov [#allocation17]   ;;  %s135_s2 = int_to_ptr.vmem [resolvable:$true] %s134_s2 }
  0x3f   :  { %s159_s12 = sshll.u32 %s6958_s7, 4  ;;  %s6448_s1 = scalar_lea.vmem %s135_s2, 512  ;;  %s160_s12 = int_to_ptr.vmem [resolvable:$true] %s159_s12 }
  0x40   :  { %p6449_p1 = scmp.ne.s32.totalorder %s135_s2, %s6448_s1  ;;  %p6453_p2 = scmp.lt.s32.totalorder %s135_s2, %s135_s2 }
  0x41   :  { %p6454_p3 = scmp.lt.s32.totalorder %s6448_s1, %s6448_s1 }
  0x43   :  { %118 = dma.hbm_to_vmem [thread:$0]  %s7976_s29, 65536, %s113_s8, [#allocation12], %s7956_s5, %s7956_s5, %s7958_s3  }
  0x44   :  { %p6455_p4 = por %p6454_p3, %p6453_p2 }
  0x46   :  { %p6456_p5 = pnand %p6455_p4, %p6449_p1 }
  0x48   :  { %6459 = shalt.err (!%p6456_p5)
}
  0x49   :  { %s7977_s25 = sld [smem:[#allocation66_spill]]  ;;  %s6468_s8 = scalar_lea.vmem %s160_s12, 32 }
  0x4a   :  { %p6469_p6 = scmp.ne.s32.totalorder %s160_s12, %s6468_s8  ;;  %p6473_p7 = scmp.lt.s32.totalorder %s160_s12, %s160_s12 }
  0x4b   :  { %p6474_p8 = scmp.lt.s32.totalorder %s6468_s8, %s6468_s8 }
  0x4d   :  { %p6475_p9 = por %p6474_p8, %p6473_p7 }
  0x4f   :  { %140 = dma.hbm_to_vmem [thread:$0]  %s7977_s25, 512, %s135_s2, [#allocation15], %s6952_s6, %s6952_s6, %s6953_s10  }
  0x50   :  { %p6476_p10 = pnand %p6475_p9, %p6469_p6 }
  0x52   :  { %6479 = shalt.err (!%p6476_p10)
}
  0x53   :  { %s7978_s29 = sld [smem:[#allocation68_spill]]  ;;  %s6959_s30 = smov [#allocation20]  }
  0x54   :  { %s180_s7 = sshll.u32 %s6959_s30, 4  ;;  %s6960_s1 = smov [#allocation23]   ;;  %s181_s7 = int_to_ptr.vmem [resolvable:$true] %s180_s7 }
  0x55   :  { %s203_s5 = sshll.u32 %s6960_s1, 4  ;;  %s6488_s3 = scalar_lea.vmem %s181_s7, 16384  ;;  %s204_s5 = int_to_ptr.vmem [resolvable:$true] %s203_s5 }
  0x56   :  { %p6489_p11 = scmp.ne.s32.totalorder %s181_s7, %s6488_s3  ;;  %p6493_p12 = scmp.lt.s32.totalorder %s181_s7, %s181_s7 }
  0x57   :  { %p6494_p13 = scmp.lt.s32.totalorder %s6488_s3, %s6488_s3 }
  0x59   :  { %162 = dma.hbm_to_vmem [thread:$0]  %s7978_s29, 32, %s160_s12, [#allocation18]  }
  0x5a   :  { %p6495_p0 = por %p6494_p13, %p6493_p12 }
  0x5c   :  { %p6496_p1 = pnand %p6495_p0, %p6489_p11 }
  0x5e   :  { %6499 = shalt.err (!%p6496_p1)
}
  0x5f   :  { %s7979_s4 = sld [smem:[#allocation70_spill]]  ;;  %s6508_s12 = scalar_lea.vmem %s204_s5, 32 }
  0x60   :  { %p6509_p2 = scmp.ne.s32.totalorder %s204_s5, %s6508_s12  ;;  %p6513_p3 = scmp.lt.s32.totalorder %s204_s5, %s204_s5 }
  0x61   :  { %p6514_p4 = scmp.lt.s32.totalorder %s6508_s12, %s6508_s12 }
  0x63   :  { %p6515_p5 = por %p6514_p4, %p6513_p3 }
  0x65   :  { %186 = dma.hbm_to_vmem [thread:$0]  %s7979_s4, 16384, %s181_s7, [#allocation21], %s6952_s6, %s6952_s6, %s6953_s10  }
  0x66   :  { %p6516_p6 = pnand %p6515_p5, %p6509_p2 }
  0x68   :  { %6519 = shalt.err (!%p6516_p6)
}
  0x69   :  { %206 = dma.hbm_to_vmem [thread:$0]  %s7940_s13, 32, %s204_s5, [#allocation24]  }
  0x6a   :  { %s6961_s8 = smov [#allocation26]   ;;  %s6962_s11 = smov [#allocation29]  }
  0x6b   :  { %s222_s0 = sshll.u32 %s6961_s8, 4  ;;  %s247_s29 = sshll.u32 %s6962_s11, 4  ;;  %s223_s0 = int_to_ptr.vmem [resolvable:$true] %s222_s0  ;;  %s248_s29 = int_to_ptr.vmem [resolvable:$true] %s247_s29 }
  0x6c   :  { %s6528_s30 = scalar_lea.vmem %s223_s0, 4096  ;;  %p6533_p8 = scmp.lt.s32.totalorder %s223_s0, %s223_s0 }
  0x6d   :  { %p6529_p7 = scmp.ne.s32.totalorder %s223_s0, %s6528_s30  ;;  %p6534_p9 = scmp.lt.s32.totalorder %s6528_s30, %s6528_s30 }
  0x6f   :  { %p6535_p10 = por %p6534_p9, %p6533_p8 }
  0x71   :  { %p6536_p11 = pnand %p6535_p10, %p6529_p7 }
  0x73   :  { %6539 = shalt.err (!%p6536_p11)
}
  0x74   :  { %s7980_s7 = smov 16   ;;  %s7981_s1 = smov 256  }
  0x75   :  { %228 = dma.hbm_to_vmem [thread:$0]  %s7942_s15, 4096, %s223_s0, [#allocation27], %s7981_s1, %s7981_s1, %s7980_s7  }
  0x76   :  { %s6548_s13 = scalar_lea.vmem %s248_s29, 32  ;;  %p6553_p13 = scmp.lt.s32.totalorder %s248_s29, %s248_s29 }
  0x77   :  { %p6549_p12 = scmp.ne.s32.totalorder %s248_s29, %s6548_s13  ;;  %p6554_p0 = scmp.lt.s32.totalorder %s6548_s13, %s6548_s13 }
  0x79   :  { %p6555_p1 = por %p6554_p0, %p6553_p13 }
  0x7b   :  { %p6556_p2 = pnand %p6555_p1, %p6549_p12 }
  0x7d   :  { %6559 = shalt.err (!%p6556_p2)
}
  0x7e   :  { %250 = dma.hbm_to_vmem [thread:$0]  %s7944_s17, 32, %s248_s29, [#allocation30]  }
  0x7f   :  { %s6963_s12 = smov [#allocation32]   ;;  %s6964_s3 = smov [#allocation35]  }
  0x80   :  { %s268_s9 = sshll.u32 %s6963_s12, 4  ;;  %s293_s8 = sshll.u32 %s6964_s3, 4  ;;  %s269_s9 = int_to_ptr.vmem [resolvable:$true] %s268_s9  ;;  %s294_s8 = int_to_ptr.vmem [resolvable:$true] %s293_s8 }
  0x81   :  { %s6568_s11 = scalar_lea.vmem %s269_s9, 1024  ;;  %p6573_p4 = scmp.lt.s32.totalorder %s269_s9, %s269_s9 }
  0x82   :  { %p6569_p3 = scmp.ne.s32.totalorder %s269_s9, %s6568_s11  ;;  %p6574_p5 = scmp.lt.s32.totalorder %s6568_s11, %s6568_s11 }
  0x84   :  { %p6575_p6 = por %p6574_p5, %p6573_p4 }
  0x86   :  { %p6576_p7 = pnand %p6575_p6, %p6569_p3 }
  0x88   :  { %6579 = shalt.err (!%p6576_p7)
}
  0x89   :  { %274 = dma.hbm_to_vmem [thread:$0]  %s7947_s20, 1024, %s269_s9, [#allocation33], %s7981_s1, %s7981_s1, %s7980_s7  }
  0x8a   :  { %s6588_s17 = scalar_lea.vmem %s294_s8, 16  ;;  %s6592_s29 = scalar_lea.vmem %s294_s8, 32 }
  0x8b   :  { %p6589_p8 = scmp.ne.s32.totalorder %s294_s8, %s6588_s17  ;;  %p6593_p9 = scmp.lt.s32.totalorder %s294_s8, %s294_s8 }
  0x8c   :  { %p6594_p10 = scmp.lt.s32.totalorder %s6592_s29, %s6588_s17 }
  0x8e   :  { %p6595_p11 = por %p6594_p10, %p6593_p9 }
  0x90   :  { %p6596_p12 = pnand %p6595_p11, %p6589_p8 }
  0x92   :  { %6599 = shalt.err (!%p6596_p12)
}
  0x93   :  { %296 = dma.hbm_to_vmem [thread:$0]  %s7950_s23, 16, %s294_s8, [#allocation36]  }
  0x94   :  { %s6965_s2 = smov [#allocation2]   ;;  %s6966_s5 = smov [#allocation7]  }
  0x95   :  { %s54_s13 = sshll.u32 %s6965_s2, 4  ;;  %s78_s4 = sshll.u32 %s6966_s5, 4  ;;  %s55_s13 = int_to_ptr.vmem [resolvable:$true] %s54_s13  ;;  %s79_s4 = int_to_ptr.vmem [resolvable:$true] %s78_s4 }
  0x96   :  { %s6608_s12 = scalar_lea.vmem %s55_s13, 1024  ;;  %p6613_p0 = scmp.lt.s32.totalorder %s55_s13, %s55_s13 }
  0x97   :  { %p6609_p13 = scmp.ne.s32.totalorder %s55_s13, %s6608_s12  ;;  %p6614_p1 = scmp.lt.s32.totalorder %s6608_s12, %s6608_s12 }
  0x99   :  { %p6615_p2 = por %p6614_p1, %p6613_p0 }
  0x9b   :  { %p6616_p3 = pnand %p6615_p2, %p6609_p13 }
  0x9d   :  { %6619 = shalt.err (!%p6616_p3)
}
  0x9e   :  { %s7982_s3 = sld [smem:[#allocation59_spill]]  ;;  %s6628_s23 = scalar_lea.vmem %s79_s4, 8192 }
  0x9f   :  { %p6629_p4 = scmp.ne.s32.totalorder %s79_s4, %s6628_s23  ;;  %p6633_p5 = scmp.lt.s32.totalorder %s79_s4, %s79_s4 }
  0xa0   :  { %p6634_p6 = scmp.lt.s32.totalorder %s6628_s23, %s6628_s23 }
  0xa2   :  { %p6635_p7 = por %p6634_p6, %p6633_p5 }
  0xa4   :  { %60 = dma.hbm_to_vmem [thread:$0]  %s7982_s3, 1024, %s55_s13, [#allocation3], %s6952_s6, %s6952_s6, %s6953_s10  }
  0xa5   :  { %p6636_p8 = pnand %p6635_p7, %p6629_p4 }
  0xa7   :  { %6639 = shalt.err (!%p6636_p8)
}
  0xa8   :  { %s6967_s8 = smov 512   ;;  %s6968_s11 = smov 32  }
  0xa9   :  { %s7983_s17 = sld [smem:[#allocation61_spill]]  ;;  %s6969_s29 = smov [#allocation10]  }
  0xaa   :  { %s100_s30 = sshll.u32 %s6969_s29, 4  ;;  %s6970_s25 = smov [#allocation13]   ;;  %s101_s30 = int_to_ptr.vmem [resolvable:$true] %s100_s30 }
  0xab   :  { %s125_s2 = sshll.u32 %s6970_s25, 4  ;;  %s6648_s13 = scalar_lea.vmem %s101_s30, 1024  ;;  %s126_s2 = int_to_ptr.vmem [resolvable:$true] %s125_s2 }
  0xac   :  { %p6649_p9 = scmp.ne.s32.totalorder %s101_s30, %s6648_s13  ;;  %p6653_p10 = scmp.lt.s32.totalorder %s101_s30, %s101_s30 }
  0xad   :  { %p6654_p11 = scmp.lt.s32.totalorder %s6648_s13, %s6648_s13 }
  0xaf   :  { %84 = dma.hbm_to_vmem [thread:$0]  %s7983_s17, 8192, %s79_s4, [#allocation6], %s6967_s8, %s6967_s8, %s6968_s11  }
  0xb0   :  { %p6655_p12 = por %p6654_p11, %p6653_p10 }
  0xb2   :  { %p6656_p13 = pnand %p6655_p12, %p6649_p9 }
  0xb4   :  { %6659 = shalt.err (!%p6656_p13)
}
  0xb5   :  { %s7984_s20 = sld [smem:[#allocation63_spill]]  ;;  %s6668_s4 = scalar_lea.vmem %s126_s2, 32 }
  0xb6   :  { %p6669_p0 = scmp.ne.s32.totalorder %s126_s2, %s6668_s4  ;;  %p6673_p1 = scmp.lt.s32.totalorder %s126_s2, %s126_s2 }
  0xb7   :  { %p6674_p2 = scmp.lt.s32.totalorder %s6668_s4, %s6668_s4 }
  0xb9   :  { %p6675_p3 = por %p6674_p2, %p6673_p1 }
  0xbb   :  { %106 = dma.hbm_to_vmem [thread:$0]  %s7984_s20, 1024, %s101_s30, [#allocation9], %s6952_s6, %s6952_s6, %s6953_s10  }
  0xbc   :  { %p6676_p4 = pnand %p6675_p3, %p6669_p0 }
  0xbe   :  { %6679 = shalt.err (!%p6676_p4)
}
  0xbf   :  { %s7985_s23 = sld [smem:[#allocation65_spill]]  ;;  %s6971_s8 = smov [#allocation16]  }
  0xc0   :  { %s146_s11 = sshll.u32 %s6971_s8, 4  ;;  %s6972_s15 = smov [#allocation19]   ;;  %s147_s11 = int_to_ptr.vmem [resolvable:$true] %s146_s11 }
  0xc1   :  { %s168_s0 = sshll.u32 %s6972_s15, 4  ;;  %s6688_s17 = scalar_lea.vmem %s147_s11, 32768  ;;  %s169_s0 = int_to_ptr.vmem [resolvable:$true] %s168_s0 }
  0xc2   :  { %p6689_p5 = scmp.ne.s32.totalorder %s147_s11, %s6688_s17  ;;  %p6693_p6 = scmp.lt.s32.totalorder %s147_s11, %s147_s11 }
  0xc3   :  { %p6694_p7 = scmp.lt.s32.totalorder %s6688_s17, %s6688_s17 }
  0xc5   :  { %128 = dma.hbm_to_vmem [thread:$0]  %s7985_s23, 32, %s126_s2, [#allocation12]  }
  0xc6   :  { %p6695_p8 = por %p6694_p7, %p6693_p6 }
  0xc8   :  { %p6696_p9 = pnand %p6695_p8, %p6689_p5 }
  0xca   :  { %6699 = shalt.err (!%p6696_p9)
}
  0xcb   :  { %s7986_s30 = sld [smem:[#allocation67_spill]]  ;;  %s6708_s25 = scalar_lea.vmem %s169_s0, 256 }
  0xcc   :  { %p6709_p10 = scmp.ne.s32.totalorder %s169_s0, %s6708_s25  ;;  %p6713_p11 = scmp.lt.s32.totalorder %s169_s0, %s169_s0 }
  0xcd   :  { %p6714_p12 = scmp.lt.s32.totalorder %s6708_s25, %s6708_s25 }
  0xcf   :  { %p6715_p13 = por %p6714_p12, %p6713_p11 }
  0xd1   :  { %152 = dma.hbm_to_vmem [thread:$0]  %s7986_s30, 32768, %s147_s11, [#allocation15], %s7981_s1, %s7981_s1, %s7980_s7  }
  0xd2   :  { %p6716_p0 = pnand %p6715_p13, %p6709_p10 }
  0xd4   :  { %6719 = shalt.err (!%p6716_p0)
}
  0xd5   :  { %s6973_s2 = smov 64   ;;  %s6974_s13 = smov 4  }
  0xd6   :  { %s7987_s20 = sld [smem:[#allocation69_spill]]  ;;  %s6975_s4 = smov [#allocation22]  }
  0xd7   :  { %s193_s9 = sshll.u32 %s6975_s4, 4  ;;  %s6976_s3 = smov [#allocation25]   ;;  %s194_s9 = int_to_ptr.vmem [resolvable:$true] %s193_s9 }
  0xd8   :  { %s213_s23 = sshll.u32 %s6976_s3, 4  ;;  %s6728_s8 = scalar_lea.vmem %s194_s9, 16  ;;  %s214_s23 = int_to_ptr.vmem [resolvable:$true] %s213_s23 }
  0xd9   :  { %p6729_p1 = scmp.ne.s32.totalorder %s194_s9, %s6728_s8  ;;  %s6732_s11 = scalar_lea.vmem %s194_s9, 32 }
  0xda   :  { %p6733_p2 = scmp.lt.s32.totalorder %s194_s9, %s194_s9  ;;  %p6734_p3 = scmp.lt.s32.totalorder %s6732_s11, %s6728_s8 }
  0xdc   :  { %174 = dma.hbm_to_vmem [thread:$0]  %s7987_s20, 256, %s169_s0, [#allocation18], %s6973_s2, %s6973_s2, %s6974_s13  }
  0xdd   :  { %p6735_p4 = por %p6734_p3, %p6733_p2 }
  0xdf   :  { %p6736_p5 = pnand %p6735_p4, %p6729_p1 }
  0xe1   :  { %6739 = shalt.err (!%p6736_p5)
}
  0xe2   :  { %s7988_s6 = sld [smem:[#allocation71_spill]]  ;;  %s6748_s29 = scalar_lea.vmem %s214_s23, 32 }
  0xe3   :  { %p6749_p6 = scmp.ne.s32.totalorder %s214_s23, %s6748_s29  ;;  %p6753_p7 = scmp.lt.s32.totalorder %s214_s23, %s214_s23 }
  0xe4   :  { %p6754_p8 = scmp.lt.s32.totalorder %s6748_s29, %s6748_s29 }
  0xe6   :  { %p6755_p9 = por %p6754_p8, %p6753_p7 }
  0xe8   :  { %196 = dma.hbm_to_vmem [thread:$0]  %s7988_s6, 16, %s194_s9, [#allocation21]  }
  0xe9   :  { %p6756_p10 = pnand %p6755_p9, %p6749_p6 }
  0xeb   :  { %6759 = shalt.err (!%p6756_p10)
}
  0xec   :  { %216 = dma.hbm_to_vmem [thread:$0]  %s7941_s14, 32, %s214_s23, [#allocation24]  }
  0xed   :  { %s6977_s25 = smov [#allocation28]   ;;  %s6978_s13 = smov [#allocation31]  }
  0xee   :  { %s234_s2 = sshll.u32 %s6977_s25, 4  ;;  %s259_s5 = sshll.u32 %s6978_s13, 4  ;;  %s235_s2 = int_to_ptr.vmem [resolvable:$true] %s234_s2  ;;  %s260_s5 = int_to_ptr.vmem [resolvable:$true] %s259_s5 }
  0xef   :  { %s6768_s12 = scalar_lea.vmem %s235_s2, 4096  ;;  %p6773_p12 = scmp.lt.s32.totalorder %s235_s2, %s235_s2 }
  0xf0   :  { %p6769_p11 = scmp.ne.s32.totalorder %s235_s2, %s6768_s12  ;;  %p6774_p13 = scmp.lt.s32.totalorder %s6768_s12, %s6768_s12 }
  0xf2   :  { %p6775_p0 = por %p6774_p13, %p6773_p12 }
  0xf4   :  { %p6776_p1 = pnand %p6775_p0, %p6769_p11 }
  0xf6   :  { %6779 = shalt.err (!%p6776_p1)
}
  0xf7   :  { %240 = dma.hbm_to_vmem [thread:$0]  %s7943_s16, 4096, %s235_s2, [#allocation27], %s7981_s1, %s7981_s1, %s7980_s7  }
  0xf8   :  { %s6788_s14 = scalar_lea.vmem %s260_s5, 16  ;;  %s6792_s9 = scalar_lea.vmem %s260_s5, 32 }
  0xf9   :  { %p6789_p2 = scmp.ne.s32.totalorder %s260_s5, %s6788_s14  ;;  %p6793_p3 = scmp.lt.s32.totalorder %s260_s5, %s260_s5 }
  0xfa   :  { %p6794_p4 = scmp.lt.s32.totalorder %s6792_s9, %s6788_s14 }
  0xfc   :  { %p6795_p5 = por %p6794_p4, %p6793_p3 }
  0xfe   :  { %p6796_p6 = pnand %p6795_p5, %p6789_p2 }
 0x100   :  { %6799 = shalt.err (!%p6796_p6)
}
 0x101   :  { %262 = dma.hbm_to_vmem [thread:$0]  %s7946_s19, 16, %s260_s5, [#allocation30]  }
 0x102   :  { %s6979_s8 = smov [#allocation34]   ;;  %s6980_s15 = smov [#allocation37]  }
 0x103   :  { %s281_s11 = sshll.u32 %s6979_s8, 4  ;;  %s303_s17 = sshll.u32 %s6980_s15, 4  ;;  %s282_s11 = int_to_ptr.vmem [resolvable:$true] %s281_s11  ;;  %s304_s17 = int_to_ptr.vmem [resolvable:$true] %s303_s17 }
 0x104   :  { %s6808_s6 = scalar_lea.vmem %s282_s11, 32  ;;  %p6813_p8 = scmp.lt.s32.totalorder %s282_s11, %s282_s11 }
 0x105   :  { %p6809_p7 = scmp.ne.s32.totalorder %s282_s11, %s6808_s6  ;;  %p6814_p9 = scmp.lt.s32.totalorder %s6808_s6, %s6808_s6 }
 0x107   :  { %p6815_p10 = por %p6814_p9, %p6813_p8 }
 0x109   :  { %p6816_p11 = pnand %p6815_p10, %p6809_p7 }
 0x10b   :  { %6819 = shalt.err (!%p6816_p11)
}
 0x10c   :  { %284 = dma.hbm_to_vmem [thread:$0]  %s7948_s21, 32, %s282_s11, [#allocation33]  }
 0x10d   :  { %s6828_s1 = scalar_lea.vmem %s304_s17, 32  ;;  %p6833_p13 = scmp.lt.s32.totalorder %s304_s17, %s304_s17 }
 0x10e   :  { %p6829_p12 = scmp.ne.s32.totalorder %s304_s17, %s6828_s1  ;;  %p6834_p0 = scmp.lt.s32.totalorder %s6828_s1, %s6828_s1 }
 0x110   :  { %p6835_p1 = por %p6834_p0, %p6833_p13 }
 0x112   :  { %p6836_p2 = pnand %p6835_p1, %p6829_p12 }
 0x114   :  { %6839 = shalt.err (!%p6836_p2)
}
 0x115   :  { %306 = dma.hbm_to_vmem [thread:$0]  %s7951_s24, 32, %s304_s17, [#allocation36]  }
 0x116   :  { %6920 = dma.done.wait [#allocation3], 1024  }
 0x117   :  { %6921 = vsyncadd [#allocation3], 4294966272 }
 0x118   :  { %6922 = dma.done.wait [#allocation6], 10240  }
 0x119   :  { %6923 = vsyncadd [#allocation6], 4294957056 }
 0x11a   :  { %6924 = dma.done.wait [#allocation9], 1088  }
 0x11b   :  { %6925 = vsyncadd [#allocation9], 4294966208 }
 0x11c   :  { %6926 = dma.done.wait [#allocation12], 65568  }
 0x11d   :  { %6927 = vsyncadd [#allocation12], 4294901728 }
 0x11e   :  { %6928 = dma.done.wait [#allocation15], 33280  }
 0x11f   :  { %6929 = vsyncadd [#allocation15], 4294934016 }
 0x120   :  { %6930 = dma.done.wait [#allocation18], 288  }
 0x121   :  { %6931 = vsyncadd [#allocation18], 4294967008 }
 0x122   :  { %6932 = dma.done.wait [#allocation21], 16400  }
 0x123   :  { %6933 = vsyncadd [#allocation21], 4294950896 }
 0x124   :  { %6934 = dma.done.wait [#allocation24], 64  }
 0x125   :  { %6935 = vsyncadd [#allocation24], 4294967232 }
 0x126   :  { %6936 = dma.done.wait [#allocation27], 8192  }
 0x127   :  { %6937 = vsyncadd [#allocation27], 4294959104 }
 0x128   :  { %6938 = dma.done.wait [#allocation30], 48  }
 0x129   :  { %6939 = vsyncadd [#allocation30], 4294967248 }
 0x12a   :  { %6940 = dma.done.wait [#allocation33], 1056  }
 0x12b   :  { %6941 = vsyncadd [#allocation33], 4294966240 }
 0x12c   :  { %6942 = dma.done.wait [#allocation36], 48  }
 0x12d   :  { %6943 = vsyncadd [#allocation36], 4294967248  ;;  %v7232_v0 = vld [vmem:[#allocation2 + $0x38] sm:$0xff]  ;;  %v7234_v1 = vld [vmem:[#allocation2 + $0x30] sm:$0xff]  ;;  %vm388_vm0 = vcmask 523264   ;;  %v6981_v32 = vmov 0.0  }
 0x12e   :  { %6260 = vmatprep.subr.mxu1 %v7232_v0  ;;  %6238 = vmatprep.subr.mxu0 %v7232_v0  ;;  %v7239_v2 = vld [vmem:[#allocation2 + $0x28] sm:$0xff]  ;;  %v503_v3 = vld [vmem:[#allocation5 + $0x20] sm:$0xff]  ;;  %v7251_v5 = vld [vmem:[#allocation2 + $0x18] sm:$0xff]  ;;  %vm621_vm1 = vcmask 261120   ;;  %vm3517_vm2 = vcmask 130048   ;;  %vm4384_vm3 = vcmask 64512  }
 0x12f   :  { %6261 = vmatpush3.msra.mxu1 %v7232_v0  ;;  %6239 = vmatpush3.msra.mxu0 %v7232_v0  ;;  %v7245_v4 = vld [vmem:[#allocation2 + $0x20] sm:$0xff]  ;;  %v7257_v6 = vld [vmem:[#allocation2 + $0x10] sm:$0xff]  ;;  %v7263_v7 = vld [vmem:[#allocation2 + $0x8] sm:$0xff]  ;;  %vm6982_vm4 = vmmov 0   ;;  %vm5114_vm5 = vcmask 1043456   ;;  %vm5110_vm6 = vcmask 31744  }
 0x130   :  { %6262 = vmatprep.subr.mxu1 %v7234_v1  ;;  %6276 = vmatprep.mubr.msk.f32.mxu1 %vm388_vm0, %v503_v3  ;;  %v7269_v8 = vld [vmem:[#allocation2] sm:$0xff]  ;;  %v504_v9 = vld [vmem:[#allocation5 + $0x28] sm:$0xff]  ;;  %v505_v10 = vld [vmem:[#allocation5 + $0x30] sm:$0xff]  ;;  %vm5826_vm7 = vcmask 254976   ;;  %vm5818_vm8 = vcmask 58368  }
 0x131   :  { %6263 = vmatpush3.msra.mxu1 %v7234_v1  ;;  %6240 = vmatprep.subr.mxu0 %v7234_v1  ;;  %v384_v11 = vld [vmem:[#allocation5] sm:$0xff]  ;;  %v385_v12 = vld [vmem:[#allocation5 + $0x8] sm:$0xff]  ;;  %v386_v14 = vld [vmem:[#allocation5 + $0x10] sm:$0xff] }
 0x132   :  { %6264 = vmatprep.subr.mxu1 %v7239_v2  ;;  %6241 = vmatpush3.msra.mxu0 %v7234_v1  ;;  %v618_v13 = vld [vmem:[#allocation7 + $0xe8] sm:$0xff]  ;;  %v620_v15 = vld [vmem:[#allocation7 + $0xf8] sm:$0xff]  ;;  %v617_v17 = vld [vmem:[#allocation7 + $0xe0] sm:$0xff] }
 0x133   :  { %6265 = vmatpush3.msra.mxu1 %v7239_v2  ;;  %6242 = vmatprep.subr.mxu0 %v7239_v2  ;;  %v506_v16 = vld [vmem:[#allocation5 + $0x38] sm:$0xff]  ;;  %v619_v18 = vld [vmem:[#allocation7 + $0xf0] sm:$0xff]  ;;  %v614_v19 = vld [vmem:[#allocation7 + $0xc8] sm:$0xff] }
 0x134   :  { %6266 = vmatprep.subr.mxu1 %v7245_v4  ;;  %6243 = vmatpush3.msra.mxu0 %v7239_v2  ;;  %v387_v20 = vld [vmem:[#allocation5 + $0x18] sm:$0xff]  ;;  %v613_v22 = vld [vmem:[#allocation7 + $0xc0] sm:$0xff]  ;;  %v615_v23 = vld [vmem:[#allocation7 + $0xd0] sm:$0xff] }
 0x135   :  { %6267 = vmatpush3.msra.mxu1 %v7245_v4  ;;  %6244 = vmatprep.subr.mxu0 %v7245_v4  ;;  %v616_v21 = vld [vmem:[#allocation7 + $0xd8] sm:$0xff]  ;;  %v610_v24 = vld [vmem:[#allocation7 + $0xa8] sm:$0xff]  ;;  %v609_v26 = vld [vmem:[#allocation7 + $0xa0] sm:$0xff] }
 0x136   :  { %6268 = vmatprep.subr.mxu1 %v7251_v5  ;;  %6245 = vmatpush3.msra.mxu0 %v7245_v4  ;;  %v612_v25 = vld [vmem:[#allocation7 + $0xb8] sm:$0xff]  ;;  %v611_v27 = vld [vmem:[#allocation7 + $0xb0] sm:$0xff]  ;;  %v606_v28 = vld [vmem:[#allocation7 + $0x88] sm:$0xff] }
 0x137   :  { %6269 = vmatpush3.msra.mxu1 %v7251_v5  ;;  %6246 = vmatprep.subr.mxu0 %v7251_v5  ;;  %v608_v29 = vld [vmem:[#allocation7 + $0x98] sm:$0xff]  ;;  %v605_v30 = vld [vmem:[#allocation7 + $0x80] sm:$0xff]  ;;  %v607_v31 = vld [vmem:[#allocation7 + $0x90] sm:$0xff] }
 0x138   :  { %6270 = vmatprep.subr.mxu1 %v7257_v6  ;;  %6247 = vmatpush3.msra.mxu0 %v7251_v5  ;;  %v499_v33 = vld [vmem:[#allocation7 + $0x68] sm:$0xff]  ;;  %v501_v34 = vld [vmem:[#allocation7 + $0x78] sm:$0xff]  ;;  %v498_v37 = vld [vmem:[#allocation7 + $0x60] sm:$0xff] }
 0x139   :  { %6271 = vmatpush3.msra.mxu1 %v7257_v6  ;;  %6248 = vmatprep.subr.mxu0 %v7257_v6  ;;  %v500_v38 = vld [vmem:[#allocation7 + $0x70] sm:$0xff]  ;;  %v495_v39 = vld [vmem:[#allocation7 + $0x48] sm:$0xff]  ;;  %v497_v40 = vld [vmem:[#allocation7 + $0x58] sm:$0xff] }
 0x13a   :  { %6272 = vmatprep.subr.mxu1 %v7263_v7  ;;  %6249 = vmatpush3.msra.mxu0 %v7257_v6  ;;  %v494_v42 = vld [vmem:[#allocation7 + $0x40] sm:$0xff]  ;;  %v496_v43 = vld [vmem:[#allocation7 + $0x50] sm:$0xff]  ;;  %v491_v44 = vld [vmem:[#allocation7 + $0x28] sm:$0xff] }
 0x13b   :  { %6273 = vmatpush3.msra.mxu1 %v7263_v7  ;;  %6250 = vmatprep.subr.mxu0 %v7263_v7  ;;  %v493_v45 = vld [vmem:[#allocation7 + $0x38] sm:$0xff]  ;;  %v490_v47 = vld [vmem:[#allocation7 + $0x20] sm:$0xff]  ;;  %v492_v48 = vld [vmem:[#allocation7 + $0x30] sm:$0xff] }
 0x13c   :  { %6274 = vmatprep.subr.mxu1 %v7269_v8  ;;  %6251 = vmatpush3.msra.mxu0 %v7263_v7  ;;  %v487_v49 = vld [vmem:[#allocation7 + $0x8] sm:$0xff]  ;;  %v489_v50 = vld [vmem:[#allocation7 + $0x18] sm:$0xff]  ;;  %v486_v51 = vld [vmem:[#allocation7] sm:$0xff] }
 0x13d   :  { %6275 = vmatpush3.msra.mxu1 %v7269_v8  ;;  %6252 = vmatprep.subr.mxu0 %v7269_v8  ;;  %v488_v53 = vld [vmem:[#allocation7 + $0x10] sm:$0xff]  ;;  %v1003_v57 = vld [vmem:[#allocation5 + $0x40] sm:$0xff]  ;;  %v1004_v58 = vld [vmem:[#allocation5 + $0x48] sm:$0xff] }
 0x13e   :  { %6277 = vmatmul.mubr.msk.f32.vlgmr.msra.gmra.mxu1 %vm388_vm0, %v504_v9  ;;  %6253 = vmatpush3.msra.mxu0 %v7269_v8  ;;  %v1005_v59 = vld [vmem:[#allocation5 + $0x50] sm:$0xff]  ;;  %v1006_v60 = vld [vmem:[#allocation5 + $0x58] sm:$0xff]  ;;  %v1118_v61 = vld [vmem:[#allocation7 + $0x168] sm:$0xff] }
 0x13f   :  { %6279 = vmatprep.mubr.msk.f32.mxu1 %vm388_vm0, %v505_v10  ;;  %6254 = vmatprep.mubr.msk.f32.mxu0 %vm388_vm0, %v384_v11  ;;  %v1120_v62 = vld [vmem:[#allocation7 + $0x178] sm:$0xff]  ;;  %v1117_v63 = vld [vmem:[#allocation7 + $0x160] sm:$0xff]  ;;  %v1119_v3 = vld [vmem:[#allocation7 + $0x170] sm:$0xff] }
 0x140   :  { %6255 = vmatmul.mubr.msk.f32.vlgmr.msra.gmra.mxu0 %vm388_vm0, %v385_v12  ;;  %658 = vmatprep.subr.mxu0 %v618_v13  ;;  %v1114_v9 = vld [vmem:[#allocation7 + $0x148] sm:$0xff]  ;;  %v1116_v10 = vld [vmem:[#allocation7 + $0x158] sm:$0xff]  ;;  %v1113_v11 = vld [vmem:[#allocation7 + $0x140] sm:$0xff] }
 0x141   :  { %6257 = vmatprep.mubr.msk.f32.mxu0 %vm388_vm0, %v386_v14  ;;  %747 = vmatprep.subr.mxu1 %v620_v15  ;;  %v1115_v12 = vld [vmem:[#allocation7 + $0x150] sm:$0xff]  ;;  %v1110_v13 = vld [vmem:[#allocation7 + $0x128] sm:$0xff]  ;;  %v1112_v14 = vld [vmem:[#allocation7 + $0x138] sm:$0xff] }
 0x142   :  { %6280 = vmatmul.mubr.msk.f32.gmra.mxu1 %vm388_vm0, %v506_v16  ;;  %659 = vmatpush1.msra.mxu0 %v617_v17  ;;  %v1109_v15 = vld [vmem:[#allocation7 + $0x120] sm:$0xff]  ;;  %v1111_v16 = vld [vmem:[#allocation7 + $0x130] sm:$0xff]  ;;  %v1106_v17 = vld [vmem:[#allocation7 + $0x108] sm:$0xff] }
 0x143   :  { %748 = vmatpush1.msra.mxu1 %v619_v18  ;;  %660 = vmatprep.subr.mxu0 %v614_v19  ;;  %v1108_v18 = vld [vmem:[#allocation7 + $0x118] sm:$0xff]  ;;  %v1105_v19 = vld [vmem:[#allocation7 + $0x100] sm:$0xff] }
 0x144   :  { %6258 = vmatmul.mubr.msk.f32.gmra.mxu0 %vm388_vm0, %v387_v20  ;;  %749 = vmatprep.subr.mxu1 %v616_v21  ;;  %v1107_v20 = vld [vmem:[#allocation7 + $0x110] sm:$0xff] }
 0x145   :  { %661 = vmatpush1.msra.mxu0 %v613_v22  ;;  %750 = vmatpush1.msra.mxu1 %v615_v23 }
 0x146   :  { %662 = vmatprep.subr.mxu0 %v610_v24  ;;  %751 = vmatprep.subr.mxu1 %v612_v25 }
 0x147   :  { %663 = vmatpush1.msra.mxu0 %v609_v26  ;;  %752 = vmatpush1.msra.mxu1 %v611_v27 }
 0x148   :  { %664 = vmatprep.subr.mxu0 %v606_v28  ;;  %753 = vmatprep.subr.mxu1 %v608_v29 }
 0x149   :  { %665 = vmatpush1.msra.mxu0 %v605_v30  ;;  %698 = vmatprep.mubr.f32.mxu0 %v6981_v32 }
 0x14a   :  { %754 = vmatpush1.msra.mxu1 %v607_v31  ;;  %787 = vmatprep.mubr.f32.mxu1 %v6981_v32 }
 0x14b   :  { %848 = vmatprep.subr.mxu0 %v499_v33  ;;  %937 = vmatprep.subr.mxu1 %v501_v34 }
 0x1fe   :  { %v6278_v35 = vpop.f32.mrf.mxu1 }
 0x200   :  { %v585_v36 = vpop.f32.mrf.mxu1  ;;  %v6256_v52 = vpop.f32.mrf.mxu0 }
 0x201   :  { %5903 = vmatmul.mubr.msk.f32.vlgmr.msra.gmra.mxu0 %vm621_vm1, %v585_v36  ;;  %5907 = vmatmul.mubr.msk.f32.vlgmr.msra.gmra.mxu1 %vm621_vm1, %v585_v36 }
 0x202   :  { %704 = vmatprep.mubr.f32.mxu0 %v6981_v32  ;;  %793 = vmatprep.mubr.f32.mxu1 %v6981_v32  ;;  %v6281_v41 = vpop.f32.mrf.mxu1  ;;  %v467_v54 = vpop.f32.mrf.mxu0 }
 0x203   :  { %849 = vmatpush1.msra.mxu0 %v498_v37  ;;  %938 = vmatpush1.msra.mxu1 %v500_v38 }
 0x204   :  { %850 = vmatprep.subr.mxu0 %v495_v39  ;;  %939 = vmatprep.subr.mxu1 %v497_v40  ;;  %v595_v46 = vpop.f32.mrf.mxu1  ;;  %v6259_v55 = vpop.f32.mrf.mxu0 }
 0x205   :  { %5904 = vmatmul.mubr.msk.f32.gmra.mxu0 %vm621_vm1, %v6278_v35  ;;  %5908 = vmatmul.mubr.msk.f32.gmra.mxu1 %vm621_vm1, %v6278_v35 }
 0x206   :  { %710 = vmatprep.mubr.f32.mxu0 %v6981_v32  ;;  %799 = vmatprep.mubr.f32.mxu1 %v6981_v32  ;;  %v477_v56 = vpop.f32.mrf.mxu0 }
 0x207   :  { %851 = vmatpush1.msra.mxu0 %v494_v42  ;;  %940 = vmatpush1.msra.mxu1 %v496_v43 }
 0x208   :  { %852 = vmatprep.subr.mxu0 %v491_v44  ;;  %941 = vmatprep.subr.mxu1 %v493_v45 }
 0x209   :  { %5905 = vmatmul.mubr.msk.f32.gmra.mxu0 %vm621_vm1, %v595_v46  ;;  %5909 = vmatmul.mubr.msk.f32.gmra.mxu1 %vm621_vm1, %v595_v46 }
 0x20a   :  { %716 = vmatprep.mubr.f32.mxu0 %v6981_v32  ;;  %805 = vmatprep.mubr.f32.mxu1 %v6981_v32 }
 0x20b   :  { %853 = vmatpush1.msra.mxu0 %v490_v47  ;;  %942 = vmatpush1.msra.mxu1 %v492_v48 }
 0x20c   :  { %854 = vmatprep.subr.mxu0 %v487_v49  ;;  %943 = vmatprep.subr.mxu1 %v489_v50 }
 0x20d   :  { %5906 = vmatmul.mubr.msk.f32.gmra.mxu0 %vm621_vm1, %v6281_v41  ;;  %5910 = vmatmul.mubr.msk.f32.gmra.mxu1 %vm621_vm1, %v6281_v41 }
 0x20e   :  { %855 = vmatpush1.msra.mxu0 %v486_v51  ;;  %888 = vmatprep.mubr.f32.mxu0 %v6981_v32 }
 0x20f   :  { %944 = vmatpush1.msra.mxu1 %v488_v53  ;;  %977 = vmatprep.mubr.f32.mxu1 %v6981_v32 }
 0x210   :  { %6282 = vmatprep.subr.mxu0 %v7232_v0  ;;  %1157 = vmatprep.subr.mxu1 %v1118_v61 }
 0x211   :  { %5911 = vmatmul.mubr.msk.f32.vlgmr.msra.gmra.mxu0 %vm621_vm1, %v467_v54  ;;  %5915 = vmatmul.mubr.msk.f32.vlgmr.msra.gmra.mxu1 %vm621_vm1, %v467_v54 }
 0x212   :  { %6283 = vmatpush3.msra.mxu0 %v7232_v0  ;;  %894 = vmatprep.mubr.f32.mxu0 %v6981_v32 }
 0x213   :  { %6284 = vmatprep.subr.mxu0 %v7234_v1  ;;  %983 = vmatprep.mubr.f32.mxu1 %v6981_v32 }
 0x214   :  { %6285 = vmatpush3.msra.mxu0 %v7234_v1  ;;  %1158 = vmatpush1.msra.mxu1 %v1117_v63 }
 0x215   :  { %5912 = vmatmul.mubr.msk.f32.gmra.mxu0 %vm621_vm1, %v6256_v52  ;;  %5916 = vmatmul.mubr.msk.f32.gmra.mxu1 %vm621_vm1, %v6256_v52 }
 0x216   :  { %6286 = vmatprep.subr.mxu0 %v7239_v2  ;;  %900 = vmatprep.mubr.f32.mxu0 %v6981_v32 }
 0x217   :  { %6287 = vmatpush3.msra.mxu0 %v7239_v2  ;;  %989 = vmatprep.mubr.f32.mxu1 %v6981_v32 }
 0x218   :  { %6288 = vmatprep.subr.mxu0 %v7245_v4  ;;  %1159 = vmatprep.subr.mxu1 %v1114_v9 }
 0x219   :  { %6289 = vmatpush3.msra.mxu0 %v7245_v4  ;;  %5917 = vmatmul.mubr.msk.f32.gmra.mxu1 %vm621_vm1, %v477_v56 }
 0x21a   :  { %5913 = vmatmul.mubr.msk.f32.gmra.mxu0 %vm621_vm1, %v477_v56  ;;  %6290 = vmatprep.subr.mxu0 %v7251_v5 }
 0x21b   :  { %6291 = vmatpush3.msra.mxu0 %v7251_v5  ;;  %906 = vmatprep.mubr.f32.mxu0 %v6981_v32 }
 0x21c   :  { %6292 = vmatprep.subr.mxu0 %v7257_v6  ;;  %995 = vmatprep.mubr.f32.mxu1 %v6981_v32 }
 0x21d   :  { %6293 = vmatpush3.msra.mxu0 %v7257_v6  ;;  %5918 = vmatmul.mubr.msk.f32.gmra.mxu1 %vm621_vm1, %v6259_v55 }
 0x21e   :  { %5914 = vmatmul.mubr.msk.f32.gmra.mxu0 %vm621_vm1, %v6259_v55  ;;  %6294 = vmatprep.subr.mxu0 %v7263_v7 }
 0x21f   :  { %6295 = vmatpush3.msra.mxu0 %v7263_v7  ;;  %6298 = vmatprep.mubr.msk.f32.mxu0 %vm388_vm0, %v1003_v57 }
 0x220   :  { %6296 = vmatprep.subr.mxu0 %v7269_v8  ;;  %1197 = vmatprep.mubr.f32.mxu1 %v6981_v32 }
 0x221   :  { %6297 = vmatpush3.msra.mxu0 %v7269_v8  ;;  %1160 = vmatpush1.msra.mxu1 %v1113_v11 }
 0x222   :  { %6299 = vmatmul.mubr.msk.f32.vlgmr.msra.gmra.mxu0 %vm388_vm0, %v1004_v58  ;;  %1246 = vmatprep.subr.mxu0 %v1120_v62 }
 0x223   :  { %6301 = vmatprep.mubr.msk.f32.mxu0 %vm388_vm0, %v1005_v59  ;;  %1247 = vmatpush1.msra.mxu0 %v1119_v3 }
 0x224   :  { %1248 = vmatprep.subr.mxu0 %v1116_v10  ;;  %1161 = vmatprep.subr.mxu1 %v1110_v13 }
 0x225   :  { %1249 = vmatpush1.msra.mxu0 %v1115_v12  ;;  %1162 = vmatpush1.msra.mxu1 %v1109_v15  ;;  %v1442_v15 = vld [vmem:[#allocation7 + $0x1e0] sm:$0xff] }
 0x226   :  { %6302 = vmatmul.mubr.msk.f32.gmra.mxu0 %vm388_vm0, %v1006_v60  ;;  %1250 = vmatprep.subr.mxu0 %v1112_v14 }
 0x227   :  { %1286 = vmatprep.mubr.f32.mxu0 %v6981_v32  ;;  %1251 = vmatpush1.msra.mxu0 %v1111_v16  ;;  %v1444_v16 = vld [vmem:[#allocation7 + $0x1f0] sm:$0xff] }
 0x228   :  { %1163 = vmatprep.subr.mxu1 %v1106_v17  ;;  %1252 = vmatprep.subr.mxu0 %v1108_v18  ;;  %v1439_v17 = vld [vmem:[#allocation7 + $0x1c8] sm:$0xff]  ;;  %v1441_v18 = vld [vmem:[#allocation7 + $0x1d8] sm:$0xff] }
 0x229   :  { %1164 = vmatpush1.msra.mxu1 %v1105_v19  ;;  %1253 = vmatpush1.msra.mxu0 %v1107_v20  ;;  %v1440_v19 = vld [vmem:[#allocation7 + $0x1d0] sm:$0xff]  ;;  %v1435_v20 = vld [vmem:[#allocation7 + $0x1a8] sm:$0xff] }
 0x22a   :  { %6304 = vmatprep.subr.mxu1 %v7232_v0 }
 0x2c1   :  { %v700_v21 = vpop.f32.mrf.mxu0  ;;  %v789_v22 = vpop.f32.mrf.mxu1 }
 0x2c3   :  { %v702_v23 = vpop.f32.mrf.mxu0  ;;  %v791_v24 = vpop.f32.mrf.mxu1 }
 0x2c5   :  { %v706_v25 = vpop.f32.mrf.mxu0  ;;  %v795_v26 = vpop.f32.mrf.mxu1 }
 0x2c7   :  { %v708_v27 = vpop.f32.mrf.mxu0  ;;  %v797_v28 = vpop.f32.mrf.mxu1 }
 0x2c9   :  { %v712_v29 = vpop.f32.mrf.mxu0  ;;  %v801_v30 = vpop.f32.mrf.mxu1 }
 0x2cb   :  { %v714_v31 = vpop.f32.mrf.mxu0  ;;  %v803_v33 = vpop.f32.mrf.mxu1 }
 0x2cd   :  { %v718_v34 = vpop.f32.mrf.mxu0  ;;  %v807_v35 = vpop.f32.mrf.mxu1 }
 0x2cf   :  { %v720_v36 = vpop.f32.mrf.mxu0  ;;  %v7343_v37 = vpop.f32.mrf.mxu1 }
 0x2d1   :  { %v890_v38 = vpop.f32.mrf.mxu0  ;;  %v979_v39 = vpop.f32.mrf.mxu1 }
 0x2d2   :  { %v7345_v40 = vadd.f32 %v890_v38, %v700_v21  ;;  %v7347_v41 = vadd.f32 %v979_v39, %v789_v22  ;;  %v1437_v21 = vld [vmem:[#allocation7 + $0x1b8] sm:$0xff]  ;;  %v1434_v22 = vld [vmem:[#allocation7 + $0x1a0] sm:$0xff] }
 0x2d3   :  { %v892_v42 = vpop.f32.mrf.mxu0  ;;  %v981_v43 = vpop.f32.mrf.mxu1 }
 0x2d4   :  { %v7349_v44 = vadd.f32 %v892_v42, %v702_v23  ;;  %v7351_v45 = vadd.f32 %v981_v43, %v791_v24  ;;  %v1436_v23 = vld [vmem:[#allocation7 + $0x1b0] sm:$0xff]  ;;  %v1431_v24 = vld [vmem:[#allocation7 + $0x188] sm:$0xff] }
 0x2d5   :  { %v896_v46 = vpop.f32.mrf.mxu0  ;;  %v985_v47 = vpop.f32.mrf.mxu1 }
 0x2d6   :  { %v7353_v48 = vadd.f32 %v896_v46, %v706_v25  ;;  %v7355_v49 = vadd.f32 %v985_v47, %v795_v26  ;;  %v1433_v25 = vld [vmem:[#allocation7 + $0x198] sm:$0xff]  ;;  %v1430_v26 = vld [vmem:[#allocation7 + $0x180] sm:$0xff] }
 0x2d7   :  { %v898_v50 = vpop.f32.mrf.mxu0  ;;  %v987_v51 = vpop.f32.mrf.mxu1 }
 0x2d8   :  { %v7357_v52 = vadd.f32 %v898_v50, %v708_v27  ;;  %v7359_v53 = vadd.f32 %v987_v51, %v797_v28  ;;  %v1432_v27 = vld [vmem:[#allocation7 + $0x190] sm:$0xff] }
 0x2d9   :  { %v991_v54 = vpop.f32.mrf.mxu1 }
 0x2da   :  { %v902_v55 = vpop.f32.mrf.mxu0  ;;  %v7361_v56 = vadd.f32 %v991_v54, %v801_v30 }
 0x2db   :  { %v7363_v57 = vadd.f32 %v902_v55, %v712_v29  ;;  %v993_v58 = vpop.f32.mrf.mxu1 }
 0x2dc   :  { %v904_v59 = vpop.f32.mrf.mxu0  ;;  %v7365_v60 = vadd.f32 %v993_v58, %v803_v33 }
 0x2dd   :  { %v7367_v61 = vadd.f32 %v904_v59, %v714_v31  ;;  %v997_v62 = vpop.f32.mrf.mxu1 }
 0x2de   :  { %v908_v63 = vpop.f32.mrf.mxu0  ;;  %v7369_v3 = vadd.f32 %v997_v62, %v807_v35 }
 0x2df   :  { %v7371_v9 = vadd.f32 %v908_v63, %v718_v34  ;;  %v999_v28 = vpop.f32.mrf.mxu1 }
 0x2e0   :  { %v910_v10 = vpop.f32.mrf.mxu0 }
 0x2e1   :  { %v7373_v11 = vadd.f32 %v910_v10, %v720_v36 }
 0x2e2   :  { %v6300_v12 = vpop.f32.mrf.mxu0 }
 0x2e4   :  { %v1085_v13 = vpop.f32.mrf.mxu0 }
 0x2e5   :  { %5923 = vmatmul.mubr.msk.f32.vlgmr.msra.gmra.mxu1 %vm621_vm1, %v1085_v13  ;;  %5927 = vmatmul.mubr.msk.f32.vlgmr.msra.gmra.mxu0 %vm621_vm1, %v1085_v13 }
 0x2e6   :  { %6305 = vmatpush3.msra.mxu1 %v7232_v0  ;;  %1203 = vmatprep.mubr.f32.mxu1 %v6981_v32  ;;  %v6303_v14 = vpop.f32.mrf.mxu0 }
 0x2e7   :  { %6306 = vmatprep.subr.mxu1 %v7234_v1  ;;  %1292 = vmatprep.mubr.f32.mxu0 %v6981_v32 }
 0x2e8   :  { %6307 = vmatpush3.msra.mxu1 %v7234_v1  ;;  %v1095_v0 = vpop.f32.mrf.mxu0  ;;  %v1328_v1 = vld [vmem:[#allocation5 + $0x60] sm:$0xff] }
 0x2e9   :  { %5924 = vmatmul.mubr.msk.f32.gmra.mxu1 %vm621_vm1, %v6300_v12  ;;  %5928 = vmatmul.mubr.msk.f32.gmra.mxu0 %vm621_vm1, %v6300_v12 }
 0x2ea   :  { %6308 = vmatprep.subr.mxu1 %v7239_v2  ;;  %1209 = vmatprep.mubr.f32.mxu1 %v6981_v32 }
 0x2eb   :  { %6309 = vmatpush3.msra.mxu1 %v7239_v2  ;;  %1298 = vmatprep.mubr.f32.mxu0 %v6981_v32  ;;  %v1329_v2 = vld [vmem:[#allocation5 + $0x68] sm:$0xff] }
 0x2ec   :  { %6310 = vmatprep.subr.mxu1 %v7245_v4 }
 0x2ed   :  { %6311 = vmatpush3.msra.mxu1 %v7245_v4  ;;  %5929 = vmatmul.mubr.msk.f32.gmra.mxu0 %vm621_vm1, %v1095_v0  ;;  %v1330_v4 = vld [vmem:[#allocation5 + $0x70] sm:$0xff] }
 0x2ee   :  { %5925 = vmatmul.mubr.msk.f32.gmra.mxu1 %vm621_vm1, %v1095_v0  ;;  %6312 = vmatprep.subr.mxu1 %v7251_v5 }
 0x2ef   :  { %6313 = vmatpush3.msra.mxu1 %v7251_v5  ;;  %1215 = vmatprep.mubr.f32.mxu1 %v6981_v32  ;;  %v1331_v5 = vld [vmem:[#allocation5 + $0x78] sm:$0xff] }
 0x2f0   :  { %6314 = vmatprep.subr.mxu1 %v7257_v6  ;;  %1304 = vmatprep.mubr.f32.mxu0 %v6981_v32 }
 0x2f1   :  { %6315 = vmatpush3.msra.mxu1 %v7257_v6  ;;  %5930 = vmatmul.mubr.msk.f32.gmra.mxu0 %vm621_vm1, %v6303_v14  ;;  %v1443_v6 = vld [vmem:[#allocation7 + $0x1e8] sm:$0xff] }
 0x2f2   :  { %5926 = vmatmul.mubr.msk.f32.gmra.mxu1 %vm621_vm1, %v6303_v14  ;;  %6316 = vmatprep.subr.mxu1 %v7263_v7 }
 0x2f3   :  { %6317 = vmatpush3.msra.mxu1 %v7263_v7  ;;  %6320 = vmatprep.mubr.msk.f32.mxu1 %vm388_vm0, %v1328_v1  ;;  %v1445_v7 = vld [vmem:[#allocation7 + $0x1f8] sm:$0xff] }
 0x2f4   :  { %6318 = vmatprep.subr.mxu1 %v7269_v8  ;;  %1522 = vmatprep.mubr.f32.mxu0 %v6981_v32 }
 0x2f5   :  { %6319 = vmatpush3.msra.mxu1 %v7269_v8  ;;  %1482 = vmatprep.subr.mxu0 %v1443_v6  ;;  %v1438_v8 = vld [vmem:[#allocation7 + $0x1c0] sm:$0xff] }
 0x2f6   :  { %6321 = vmatmul.mubr.msk.f32.vlgmr.msra.gmra.mxu1 %vm388_vm0, %v1329_v2  ;;  %1571 = vmatprep.subr.mxu1 %v1445_v7 }
 0x2f7   :  { %6323 = vmatprep.mubr.msk.f32.mxu1 %vm388_vm0, %v1330_v4  ;;  %1483 = vmatpush1.msra.mxu0 %v1442_v15 }
 0x2f8   :  { %1572 = vmatpush1.msra.mxu1 %v1444_v16  ;;  %1484 = vmatprep.subr.mxu0 %v1439_v17 }
 0x2f9   :  { %1573 = vmatprep.subr.mxu1 %v1441_v18  ;;  %1485 = vmatpush1.msra.mxu0 %v1438_v8  ;;  %v1000_v8 = vadd.f32 %v999_v28, %v7343_v37 }
 0x2fa   :  { %6324 = vmatmul.mubr.msk.f32.gmra.mxu1 %vm388_vm0, %v1331_v5  ;;  %1486 = vmatprep.subr.mxu0 %v1435_v20 }
 0x2fb   :  { %1611 = vmatprep.mubr.f32.mxu1 %v6981_v32  ;;  %1574 = vmatpush1.msra.mxu1 %v1440_v19  ;;  %v1652_v19 = vld [vmem:[#allocation8] sm:$0xf] }
 0x2fc   :  { %1575 = vmatprep.subr.mxu1 %v1437_v21  ;;  %1487 = vmatpush1.msra.mxu0 %v1434_v22 }
 0x2fd   :  { %1576 = vmatpush1.msra.mxu1 %v1436_v23  ;;  %1488 = vmatprep.subr.mxu0 %v1431_v24 }
 0x2fe   :  { %1577 = vmatprep.subr.mxu1 %v1433_v25  ;;  %1489 = vmatpush1.msra.mxu0 %v1430_v26 }
 0x2ff   :  { %1578 = vmatpush1.msra.mxu1 %v1432_v27 }
 0x3a5   :  { %v1199_v29 = vpop.f32.mrf.mxu1  ;;  %v1288_v55 = vpop.f32.mrf.mxu0 }
 0x3a6   :  { %v7411_v30 = vadd.f32 %v1199_v29, %v7345_v40  ;;  %v1313_v20 = vadd.f32 %v1288_v55, %v7347_v41 }
 0x3a7   :  { %v1201_v31 = vpop.f32.mrf.mxu1 }
 0x3a8   :  { %v7414_v33 = vadd.f32 %v1201_v31, %v7349_v44 }
 0x3a9   :  { %v1205_v34 = vpop.f32.mrf.mxu1 }
 0x3aa   :  { %v7417_v35 = vadd.f32 %v1205_v34, %v7353_v48 }
 0x3ab   :  { %v1207_v36 = vpop.f32.mrf.mxu1 }
 0x3ac   :  { %v7420_v38 = vadd.f32 %v1207_v36, %v7357_v52 }
 0x3ae   :  { %v1211_v39 = vpop.f32.mrf.mxu1 }
 0x3af   :  { %v7423_v42 = vadd.f32 %v1211_v39, %v7363_v57  ;;  %v1290_v57 = vpop.f32.mrf.mxu0 }
 0x3b0   :  { %v1213_v43 = vpop.f32.mrf.mxu1  ;;  %v1314_v21 = vadd.f32 %v1290_v57, %v7351_v45 }
 0x3b1   :  { %v7426_v40 = vadd.f32 %v1213_v43, %v7367_v61  ;;  %v1294_v58 = vpop.f32.mrf.mxu0 }
 0x3b2   :  { %v1217_v46 = vpop.f32.mrf.mxu1  ;;  %v1317_v22 = vadd.f32 %v1294_v58, %v7355_v49 }
 0x3b3   :  { %v7429_v44 = vadd.f32 %v1217_v46, %v7371_v9  ;;  %v1296_v59 = vpop.f32.mrf.mxu0 }
 0x3b4   :  { %v1219_v47 = vpop.f32.mrf.mxu1  ;;  %v1318_v23 = vadd.f32 %v1296_v59, %v7359_v53 }
 0x3b5   :  { %v7432_v48 = vadd.f32 %v1219_v47, %v7373_v11  ;;  %v1300_v61 = vpop.f32.mrf.mxu0  ;;  %v1654_v11 = vlaneseq }
 0x3b6   :  { %v6322_v50 = vpop.f32.mrf.mxu1  ;;  %v1321_v26 = vadd.f32 %v1300_v61, %v7361_v56 }
 0x3b7   :  { %v1302_v62 = vpop.f32.mrf.mxu0  ;;  %v1655_v0 = vshrl.u32 %v1654_v11, 7 }
 0x3b8   :  { %v1410_v51 = vpop.f32.mrf.mxu1  ;;  %v1322_v27 = vadd.f32 %v1302_v62, %v7365_v60 }
 0x3b9   :  { %5935 = vmatmul.mubr.msk.f32.vlgmr.msra.gmra.mxu0 %vm621_vm1, %v1410_v51  ;;  %5939 = vmatmul.mubr.msk.f32.vlgmr.msra.gmra.mxu1 %vm621_vm1, %v1410_v51  ;;  %v1306_v63 = vpop.f32.mrf.mxu0  ;;  %v7450_v6 = vsub.s32 0, %v1655_v0  ;;  %v1664_v7 = vsub.s32 2, %v1655_v0  ;;  %v7452_v15 = vsub.s32 1, %v1655_v0  ;;  %v1668_v16 = vsub.s32 3, %v1655_v0 }
 0x3ba   :  { %1528 = vmatprep.mubr.f32.mxu0 %v6981_v32  ;;  %1617 = vmatprep.mubr.f32.mxu1 %v6981_v32  ;;  %v6325_v52 = vpop.f32.mrf.mxu1  ;;  %v1325_v29 = vadd.f32 %v1306_v63, %v7369_v3 }
 0x3bb   :  { %v1308_v9 = vpop.f32.mrf.mxu0  ;;  %v1657_v37 = vrot.slane %v1652_v19, %v7450_v6  ;;  %v1665_v28 = vrot.slane %v1652_v19, %v1664_v7  ;;  %v1661_v41 = vrot.slane %v1652_v19, %v7452_v15  ;;  %v1669_v34 = vrot.slane %v1652_v19, %v1668_v16 }
 0x3bc   :  { %v1420_v54 = vpop.f32.mrf.mxu1  ;;  %v1326_v31 = vadd.f32 %v1308_v9, %v1000_v8 }
 0x3bd   :  { %5936 = vmatmul.mubr.msk.f32.gmra.mxu0 %vm621_vm1, %v6322_v50  ;;  %5940 = vmatmul.mubr.msk.f32.gmra.mxu1 %vm621_vm1, %v6322_v50 }
 0x3be   :  { %1534 = vmatprep.mubr.f32.mxu0 %v6981_v32  ;;  %1623 = vmatprep.mubr.f32.mxu1 %v6981_v32 }
 0x3c1   :  { %5937 = vmatmul.mubr.msk.f32.gmra.mxu0 %vm621_vm1, %v1420_v54  ;;  %5941 = vmatmul.mubr.msk.f32.gmra.mxu1 %vm621_vm1, %v1420_v54 }
 0x3c2   :  { %1540 = vmatprep.mubr.f32.mxu0 %v6981_v32  ;;  %1629 = vmatprep.mubr.f32.mxu1 %v6981_v32 }
 0x3c5   :  { %5938 = vmatmul.mubr.msk.f32.gmra.mxu0 %vm621_vm1, %v6325_v52  ;;  %5942 = vmatmul.mubr.msk.f32.gmra.mxu1 %vm621_vm1, %v6325_v52 }
 0x3c6   :  { %1778 = vmatprep.mubr.f32.mxu0 %v6981_v32  ;;  %1855 = vmatprep.mubr.f32.mxu1 %v6981_v32 }
 0x479   :  { %v1524_v10 = vpop.f32.mrf.mxu0  ;;  %v1613_v12 = vpop.f32.mrf.mxu1 }
 0x47a   :  { %v1638_v63 = vadd.f32 %v1613_v12, %v1313_v20 }
 0x47b   :  { %v1526_v13 = vpop.f32.mrf.mxu0  ;;  %v1615_v14 = vpop.f32.mrf.mxu1 }
 0x47c   :  { %v1637_v56 = vadd.f32 %v1526_v13, %v7414_v33  ;;  %v1639_v60 = vadd.f32 %v1615_v14, %v1314_v21  ;;  %v1676_v12 = vadd.f32 %v1665_v28, %v1638_v63  ;;  %v2176_v63 = vld [vmem:[#allocation11 + $0x480] sm:$0xff] }
 0x47d   :  { %v1530_v1 = vpop.f32.mrf.mxu0  ;;  %v1619_v2 = vpop.f32.mrf.mxu1 }
 0x47e   :  { %v1642_v57 = vadd.f32 %v1619_v2, %v1317_v22 }
 0x47f   :  { %v1532_v4 = vpop.f32.mrf.mxu0  ;;  %v1621_v5 = vpop.f32.mrf.mxu1 }
 0x480   :  { %v1641_v51 = vadd.f32 %v1532_v4, %v7420_v38  ;;  %v1643_v52 = vadd.f32 %v1621_v5, %v1318_v23  ;;  %v1675_v4 = vadd.f32 %v1661_v41, %v1637_v56  ;;  %v1677_v5 = vadd.f32 %v1669_v34, %v1639_v60  ;;  %v2250_v56 = vld [vmem:[#allocation11 + $0x6d0] sm:$0xff]  ;;  %v2185_v60 = vld [vmem:[#allocation11 + $0x4c8] sm:$0xff] }
 0x481   :  { %v1536_v17 = vpop.f32.mrf.mxu0  ;;  %v1625_v18 = vpop.f32.mrf.mxu1 }
 0x482   :  { %v1644_v3 = vadd.f32 %v1536_v17, %v7423_v42  ;;  %v1646_v46 = vadd.f32 %v1625_v18, %v1321_v26  ;;  %v1636_v42 = vadd.f32 %v1524_v10, %v7411_v30  ;;  %v1679_v13 = vadd.f32 %v1661_v41, %v1641_v51  ;;  %v1707_v26 = vld [vmem:[#allocation10 + $0x8] sm:$0xff]  ;;  %v2247_v51 = vld [vmem:[#allocation11 + $0x6b8] sm:$0xff] }
 0x483   :  { %v1538_v24 = vpop.f32.mrf.mxu0  ;;  %v1627_v25 = vpop.f32.mrf.mxu1  ;;  %v1681_v38 = vadd.f32 %v1669_v34, %v1643_v52  ;;  %v7504_v21 = vmax.f32 %v1675_v4, 0.0  ;;  %v7506_v22 = vmax.f32 %v1677_v5, 0.0  ;;  %v2182_v52 = vld [vmem:[#allocation11 + $0x4b0] sm:$0xff]  ;;  %v2237_v4 = vld [vmem:[#allocation11 + $0x668] sm:$0xff]  ;;  %v2172_v5 = vld [vmem:[#allocation11 + $0x460] sm:$0xff] }
 0x484   :  { %v1645_v49 = vadd.f32 %v1538_v24, %v7426_v40  ;;  %v1647_v53 = vadd.f32 %v1627_v25, %v1322_v27  ;;  %v1640_v40 = vadd.f32 %v1530_v1, %v7417_v35  ;;  %v1682_v9 = vadd.f32 %v1657_v37, %v1644_v3  ;;  %v1706_v25 = vld [vmem:[#allocation10] sm:$0xff]  ;;  %v1997_v27 = vld [vmem:[#allocation10 + $0x10] sm:$0xff]  ;;  %v2249_v3 = vld [vmem:[#allocation11 + $0x6c8] sm:$0xff] }
 0x485   :  { %v1542_v45 = vpop.f32.mrf.mxu0  ;;  %v1631_v36 = vpop.f32.mrf.mxu1  ;;  %v1684_v11 = vadd.f32 %v1665_v28, %v1646_v46  ;;  %v1680_v35 = vadd.f32 %v1665_v28, %v1642_v57  ;;  %v1674_v10 = vadd.f32 %v1657_v37, %v1636_v42  ;;  %v7492_v18 = vmax.f32 %v1679_v13, 0.0  ;;  %v2184_v46 = vld [vmem:[#allocation11 + $0x4c0] sm:$0xff]  ;;  %v2241_v42 = vld [vmem:[#allocation11 + $0x688] sm:$0xff]  ;;  %v2239_v13 = vld [vmem:[#allocation11 + $0x678] sm:$0xff] }
 0x486   :  { %v1648_v39 = vadd.f32 %v1542_v45, %v7429_v44  ;;  %v1650_v43 = vadd.f32 %v1631_v36, %v1325_v29  ;;  %v1683_v59 = vadd.f32 %v1661_v41, %v1645_v49  ;;  %v1685_v61 = vadd.f32 %v1669_v34, %v1647_v53  ;;  %v2191_v29 = vld [vmem:[#allocation11 + $0x4f8] sm:$0xff]  ;;  %v2253_v45 = vld [vmem:[#allocation11 + $0x6e8] sm:$0xff]  ;;  %v2188_v36 = vld [vmem:[#allocation11 + $0x4e0] sm:$0xff] }
 0x487   :  { %v1544_v47 = vpop.f32.mrf.mxu0  ;;  %v1633_v50 = vpop.f32.mrf.mxu1  ;;  %v1678_v0 = vadd.f32 %v1657_v37, %v1640_v40  ;;  %v7486_v16 = vmax.f32 %v1682_v9, 0.0  ;;  %v7488_v17 = vmax.f32 %v1684_v11, 0.0  ;;  %v7494_v8 = vmax.f32 %v1681_v38, 0.0  ;;  %v2252_v49 = vld [vmem:[#allocation11 + $0x6e0] sm:$0xff]  ;;  %v2187_v53 = vld [vmem:[#allocation11 + $0x4d8] sm:$0xff]  ;;  %v2245_v40 = vld [vmem:[#allocation11 + $0x6a8] sm:$0xff] }
 0x488   :  { %v1649_v54 = vadd.f32 %v1544_v47, %v7432_v48  ;;  %v1651_v55 = vadd.f32 %v1633_v50, %v1326_v31  ;;  %v1686_v58 = vadd.f32 %v1657_v37, %v1648_v39  ;;  %v1688_v44 = vadd.f32 %v1665_v28, %v1650_v43  ;;  %v2255_v31 = vld [vmem:[#allocation11 + $0x6f8] sm:$0xff]  ;;  %v2190_v37 = vld [vmem:[#allocation11 + $0x4f0] sm:$0xff]  ;;  %v2248_v47 = vld [vmem:[#allocation11 + $0x6c0] sm:$0xff] }
 0x489   :  { %v7480_v7 = vmax.f32 %v1683_v59, 0.0  ;;  %v7482_v30 = vmax.f32 %v1685_v61, 0.0  ;;  %v7498_v19 = vmax.f32 %v1678_v0, 0.0  ;;  %v7500_v20 = vmax.f32 %v1680_v35, 0.0  ;;  %v2254_v28 = vld [vmem:[#allocation11 + $0x6f0] sm:$0xff]  ;;  %v2251_v39 = vld [vmem:[#allocation11 + $0x6d8] sm:$0xff] }
 0x48a   :  { %v1687_v33 = vadd.f32 %v1661_v41, %v1649_v54  ;;  %v1689_v62 = vadd.f32 %v1669_v34, %v1651_v55  ;;  %v7476_v1 = vmax.f32 %v1686_v58, 0.0  ;;  %v7478_v2 = vmax.f32 %v1688_v44, 0.0  ;;  %v1998_v41 = vld [vmem:[#allocation10 + $0x18] sm:$0xff]  ;;  %v2189_v34 = vld [vmem:[#allocation11 + $0x4e8] sm:$0xff]  ;;  %v2186_v43 = vld [vmem:[#allocation11 + $0x4d0] sm:$0xff] }
 0x48b   :  { %v7510_v23 = vmax.f32 %v1674_v10, 0.0  ;;  %v7512_v24 = vmax.f32 %v1676_v12, 0.0  ;;  %v2183_v50 = vld [vmem:[#allocation11 + $0x4b8] sm:$0xff]  ;;  %v2246_v54 = vld [vmem:[#allocation11 + $0x6b0] sm:$0xff]  ;;  %v2181_v55 = vld [vmem:[#allocation11 + $0x4a8] sm:$0xff] }
 0x48c   :  { %v7472_v14 = vmax.f32 %v1687_v33, 0.0  ;;  %v7474_v48 = vmax.f32 %v1689_v62, 0.0  ;;  %v2180_v57 = vld [vmem:[#allocation11 + $0x4a0] sm:$0xff]  ;;  %v2179_v44 = vld [vmem:[#allocation11 + $0x498] sm:$0xff]  ;;  %v2178_v61 = vld [vmem:[#allocation11 + $0x490] sm:$0xff] }
 0x48d   :  { %v2244_v58 = vld [vmem:[#allocation11 + $0x6a0] sm:$0xff]  ;;  %v2243_v59 = vld [vmem:[#allocation11 + $0x698] sm:$0xff]  ;;  %v2242_v33 = vld [vmem:[#allocation11 + $0x690] sm:$0xff] }
 0x48e   :  { %1738 = vmatprep.subr.mxu0 %v7472_v14  ;;  %1815 = vmatprep.subr.mxu1 %v7474_v48  ;;  %v2177_v62 = vld [vmem:[#allocation11 + $0x488] sm:$0xff]  ;;  %v2240_v9 = vld [vmem:[#allocation11 + $0x680] sm:$0xff]  ;;  %v2175_v11 = vld [vmem:[#allocation11 + $0x478] sm:$0xff] }
 0x48f   :  { %1739 = vmatpush1.msra.mxu0 %v7476_v1  ;;  %1816 = vmatpush1.msra.mxu1 %v7478_v2  ;;  %v2174_v38 = vld [vmem:[#allocation11 + $0x470] sm:$0xff]  ;;  %v2173_v35 = vld [vmem:[#allocation11 + $0x468] sm:$0xff]  ;;  %v2236_v10 = vld [vmem:[#allocation11 + $0x660] sm:$0xff] }
 0x490   :  { %1740 = vmatprep.subr.mxu0 %v7480_v7  ;;  %1817 = vmatprep.subr.mxu1 %v7482_v30  ;;  %v2238_v0 = vld [vmem:[#allocation11 + $0x670] sm:$0xff]  ;;  %v2171_v12 = vld [vmem:[#allocation11 + $0x458] sm:$0xff] }
 0x491   :  { %1741 = vmatpush1.msra.mxu0 %v7486_v16  ;;  %1818 = vmatpush1.msra.mxu1 %v7488_v17 }
 0x492   :  { %1742 = vmatprep.subr.mxu0 %v7492_v18  ;;  %1819 = vmatprep.subr.mxu1 %v7494_v8 }
 0x493   :  { %1743 = vmatpush1.msra.mxu0 %v7498_v19  ;;  %1820 = vmatpush1.msra.mxu1 %v7500_v20 }
 0x494   :  { %1744 = vmatprep.subr.mxu0 %v7504_v21  ;;  %1821 = vmatprep.subr.mxu1 %v7506_v22 }
 0x495   :  { %1745 = vmatpush1.msra.mxu0 %v7510_v23  ;;  %1822 = vmatpush1.msra.mxu1 %v7512_v24 }
 0x496   :  { %5943 = vmatmul.mubr.msk.f32.vlgmr.msra.gmra.mxu0 %vm621_vm1, %v1706_v25  ;;  %5945 = vmatmul.mubr.msk.f32.vlgmr.msra.gmra.mxu1 %vm621_vm1, %v1706_v25  ;;  %v2235_v25 = vld [vmem:[#allocation11 + $0x658] sm:$0xff] }
 0x497   :  { %2029 = vmatprep.subr.mxu0 %v7472_v14  ;;  %2106 = vmatprep.subr.mxu1 %v7474_v48 }
 0x498   :  { %2030 = vmatpush1.msra.mxu0 %v7476_v1  ;;  %2107 = vmatpush1.msra.mxu1 %v7478_v2 }
 0x499   :  { %2031 = vmatprep.subr.mxu0 %v7480_v7  ;;  %2108 = vmatprep.subr.mxu1 %v7482_v30 }
 0x49a   :  { %1784 = vmatprep.mubr.f32.mxu0 %v6981_v32  ;;  %1861 = vmatprep.mubr.f32.mxu1 %v6981_v32 }
 0x49b   :  { %2032 = vmatpush1.msra.mxu0 %v7486_v16  ;;  %2109 = vmatpush1.msra.mxu1 %v7488_v17 }
 0x49c   :  { %5944 = vmatmul.mubr.msk.f32.gmra.mxu0 %vm621_vm1, %v1707_v26  ;;  %5946 = vmatmul.mubr.msk.f32.gmra.mxu1 %vm621_vm1, %v1707_v26  ;;  %v2170_v26 = vld [vmem:[#allocation11 + $0x450] sm:$0xff] }
 0x49d   :  { %2033 = vmatprep.subr.mxu0 %v7492_v18  ;;  %2110 = vmatprep.subr.mxu1 %v7494_v8 }
 0x49e   :  { %2034 = vmatpush1.msra.mxu0 %v7498_v19  ;;  %2111 = vmatpush1.msra.mxu1 %v7500_v20 }
 0x49f   :  { %2035 = vmatprep.subr.mxu0 %v7504_v21  ;;  %2112 = vmatprep.subr.mxu1 %v7506_v22 }
 0x4a0   :  { %2036 = vmatpush1.msra.mxu0 %v7510_v23  ;;  %2069 = vmatprep.mubr.f32.mxu0 %v6981_v32 }
 0x4a1   :  { %2113 = vmatpush1.msra.mxu1 %v7512_v24  ;;  %2146 = vmatprep.mubr.f32.mxu1 %v6981_v32 }
 0x4a2   :  { %5947 = vmatmul.mubr.msk.f32.vlgmr.msra.gmra.mxu0 %vm621_vm1, %v1997_v27  ;;  %5949 = vmatmul.mubr.msk.f32.vlgmr.msra.gmra.mxu1 %vm621_vm1, %v1997_v27  ;;  %v2234_v27 = vld [vmem:[#allocation11 + $0x650] sm:$0xff] }
 0x4a3   :  { %2075 = vmatprep.mubr.f32.mxu0 %v6981_v32  ;;  %2152 = vmatprep.mubr.f32.mxu1 %v6981_v32 }
 0x4a4   :  { %2288 = vmatprep.subr.mxu0 %v2191_v29  ;;  %2365 = vmatprep.subr.mxu1 %v2255_v31  ;;  %v2169_v29 = vld [vmem:[#allocation11 + $0x448] sm:$0xff] }
 0x4a5   :  { %2289 = vmatpush1.msra.mxu0 %v2190_v37  ;;  %2366 = vmatpush1.msra.mxu1 %v2254_v28  ;;  %v2233_v31 = vld [vmem:[#allocation11 + $0x648] sm:$0xff]  ;;  %v2168_v37 = vld [vmem:[#allocation11 + $0x440] sm:$0xff] }
 0x4a6   :  { %5948 = vmatmul.mubr.msk.f32.gmra.mxu0 %vm621_vm1, %v1998_v41  ;;  %5950 = vmatmul.mubr.msk.f32.gmra.mxu1 %vm621_vm1, %v1998_v41  ;;  %v2232_v28 = vld [vmem:[#allocation11 + $0x640] sm:$0xff]  ;;  %v2167_v41 = vld [vmem:[#allocation11 + $0x438] sm:$0xff] }
 0x4a7   :  { %2290 = vmatprep.subr.mxu0 %v2189_v34  ;;  %2367 = vmatprep.subr.mxu1 %v2253_v45  ;;  %v2231_v34 = vld [vmem:[#allocation11 + $0x638] sm:$0xff]  ;;  %v2166_v45 = vld [vmem:[#allocation11 + $0x430] sm:$0xff] }
 0x4a8   :  { %2291 = vmatpush1.msra.mxu0 %v2188_v36  ;;  %2368 = vmatpush1.msra.mxu1 %v2252_v49  ;;  %v2230_v36 = vld [vmem:[#allocation11 + $0x630] sm:$0xff]  ;;  %v2165_v49 = vld [vmem:[#allocation11 + $0x428] sm:$0xff] }
 0x4a9   :  { %2292 = vmatprep.subr.mxu0 %v2187_v53  ;;  %2369 = vmatprep.subr.mxu1 %v2251_v39  ;;  %v2229_v53 = vld [vmem:[#allocation11 + $0x628] sm:$0xff]  ;;  %v2164_v39 = vld [vmem:[#allocation11 + $0x420] sm:$0xff] }
 0x4aa   :  { %2293 = vmatpush1.msra.mxu0 %v2186_v43  ;;  %2370 = vmatpush1.msra.mxu1 %v2250_v56  ;;  %v2228_v43 = vld [vmem:[#allocation11 + $0x620] sm:$0xff]  ;;  %v2163_v56 = vld [vmem:[#allocation11 + $0x418] sm:$0xff] }
 0x4ab   :  { %2294 = vmatprep.subr.mxu0 %v2185_v60  ;;  %2371 = vmatprep.subr.mxu1 %v2249_v3  ;;  %v2227_v60 = vld [vmem:[#allocation11 + $0x618] sm:$0xff]  ;;  %v2162_v3 = vld [vmem:[#allocation11 + $0x410] sm:$0xff] }
 0x4ac   :  { %2295 = vmatpush1.msra.mxu0 %v2184_v46  ;;  %2372 = vmatpush1.msra.mxu1 %v2248_v47  ;;  %v2226_v46 = vld [vmem:[#allocation11 + $0x610] sm:$0xff]  ;;  %v2161_v47 = vld [vmem:[#allocation11 + $0x408] sm:$0xff] }
 0x4ad   :  { %2296 = vmatprep.subr.mxu0 %v2183_v50  ;;  %2373 = vmatprep.subr.mxu1 %v2247_v51  ;;  %v2225_v50 = vld [vmem:[#allocation11 + $0x608] sm:$0xff]  ;;  %v2160_v51 = vld [vmem:[#allocation11 + $0x400] sm:$0xff] }
 0x4ae   :  { %2297 = vmatpush1.msra.mxu0 %v2182_v52  ;;  %2374 = vmatpush1.msra.mxu1 %v2246_v54  ;;  %v2224_v52 = vld [vmem:[#allocation11 + $0x600] sm:$0xff]  ;;  %v2223_v54 = vld [vmem:[#allocation11 + $0x5f8] sm:$0xff] }
 0x4af   :  { %2298 = vmatprep.subr.mxu0 %v2181_v55  ;;  %2375 = vmatprep.subr.mxu1 %v2245_v40  ;;  %v2287_v55 = vld [vmem:[#allocation11 + $0x7f8] sm:$0xff]  ;;  %v2222_v40 = vld [vmem:[#allocation11 + $0x5f0] sm:$0xff] }
 0x4b0   :  { %2299 = vmatpush1.msra.mxu0 %v2180_v57  ;;  %2376 = vmatpush1.msra.mxu1 %v2244_v58  ;;  %v2286_v57 = vld [vmem:[#allocation11 + $0x7f0] sm:$0xff]  ;;  %v2221_v58 = vld [vmem:[#allocation11 + $0x5e8] sm:$0xff] }
 0x4b1   :  { %2300 = vmatprep.subr.mxu0 %v2179_v44  ;;  %2377 = vmatprep.subr.mxu1 %v2243_v59  ;;  %v2285_v44 = vld [vmem:[#allocation11 + $0x7e8] sm:$0xff]  ;;  %v2220_v59 = vld [vmem:[#allocation11 + $0x5e0] sm:$0xff] }
 0x4b2   :  { %2301 = vmatpush1.msra.mxu0 %v2178_v61  ;;  %2378 = vmatpush1.msra.mxu1 %v2242_v33  ;;  %v2284_v61 = vld [vmem:[#allocation11 + $0x7e0] sm:$0xff]  ;;  %v2219_v33 = vld [vmem:[#allocation11 + $0x5d8] sm:$0xff] }
 0x4b3   :  { %2302 = vmatprep.subr.mxu0 %v2177_v62  ;;  %2379 = vmatprep.subr.mxu1 %v2241_v42  ;;  %v2283_v62 = vld [vmem:[#allocation11 + $0x7d8] sm:$0xff]  ;;  %v2218_v42 = vld [vmem:[#allocation11 + $0x5d0] sm:$0xff] }
 0x4b4   :  { %2303 = vmatpush1.msra.mxu0 %v2176_v63  ;;  %2380 = vmatpush1.msra.mxu1 %v2240_v9  ;;  %v2282_v63 = vld [vmem:[#allocation11 + $0x7d0] sm:$0xff]  ;;  %v2217_v9 = vld [vmem:[#allocation11 + $0x5c8] sm:$0xff] }
 0x4b5   :  { %2304 = vmatprep.subr.mxu0 %v2175_v11  ;;  %2381 = vmatprep.subr.mxu1 %v2239_v13  ;;  %v2281_v11 = vld [vmem:[#allocation11 + $0x7c8] sm:$0xff]  ;;  %v2216_v13 = vld [vmem:[#allocation11 + $0x5c0] sm:$0xff] }
 0x4b6   :  { %2305 = vmatpush1.msra.mxu0 %v2174_v38  ;;  %2382 = vmatpush1.msra.mxu1 %v2238_v0  ;;  %v2280_v38 = vld [vmem:[#allocation11 + $0x7c0] sm:$0xff]  ;;  %v2215_v0 = vld [vmem:[#allocation11 + $0x5b8] sm:$0xff] }
 0x4b7   :  { %2306 = vmatprep.subr.mxu0 %v2173_v35  ;;  %2383 = vmatprep.subr.mxu1 %v2237_v4  ;;  %v2279_v35 = vld [vmem:[#allocation11 + $0x7b8] sm:$0xff]  ;;  %v2214_v4 = vld [vmem:[#allocation11 + $0x5b0] sm:$0xff] }
 0x4b8   :  { %2307 = vmatpush1.msra.mxu0 %v2172_v5  ;;  %2384 = vmatpush1.msra.mxu1 %v2236_v10  ;;  %v2278_v5 = vld [vmem:[#allocation11 + $0x7b0] sm:$0xff]  ;;  %v2213_v10 = vld [vmem:[#allocation11 + $0x5a8] sm:$0xff] }
 0x4b9   :  { %2308 = vmatprep.subr.mxu0 %v2171_v12  ;;  %2385 = vmatprep.subr.mxu1 %v2235_v25  ;;  %v2277_v12 = vld [vmem:[#allocation11 + $0x7a8] sm:$0xff]  ;;  %v2212_v25 = vld [vmem:[#allocation11 + $0x5a0] sm:$0xff] }
 0x4ba   :  { %2309 = vmatpush1.msra.mxu0 %v2170_v26  ;;  %2386 = vmatpush1.msra.mxu1 %v2234_v27  ;;  %v2276_v26 = vld [vmem:[#allocation11 + $0x7a0] sm:$0xff]  ;;  %v2211_v27 = vld [vmem:[#allocation11 + $0x598] sm:$0xff] }
 0x4bb   :  { %2310 = vmatprep.subr.mxu0 %v2169_v29  ;;  %2387 = vmatprep.subr.mxu1 %v2233_v31  ;;  %v2275_v29 = vld [vmem:[#allocation11 + $0x798] sm:$0xff]  ;;  %v2210_v31 = vld [vmem:[#allocation11 + $0x590] sm:$0xff] }
 0x4bc   :  { %2311 = vmatpush1.msra.mxu0 %v2168_v37  ;;  %2388 = vmatpush1.msra.mxu1 %v2232_v28  ;;  %v2274_v37 = vld [vmem:[#allocation11 + $0x790] sm:$0xff]  ;;  %v2209_v28 = vld [vmem:[#allocation11 + $0x588] sm:$0xff] }
 0x4bd   :  { %2312 = vmatprep.subr.mxu0 %v2167_v41  ;;  %2389 = vmatprep.subr.mxu1 %v2231_v34  ;;  %v2273_v41 = vld [vmem:[#allocation11 + $0x788] sm:$0xff]  ;;  %v2208_v34 = vld [vmem:[#allocation11 + $0x580] sm:$0xff] }
 0x4be   :  { %2313 = vmatpush1.msra.mxu0 %v2166_v45  ;;  %2390 = vmatpush1.msra.mxu1 %v2230_v36  ;;  %v2272_v45 = vld [vmem:[#allocation11 + $0x780] sm:$0xff]  ;;  %v2207_v36 = vld [vmem:[#allocation11 + $0x578] sm:$0xff] }
 0x4bf   :  { %2314 = vmatprep.subr.mxu0 %v2165_v49  ;;  %2391 = vmatprep.subr.mxu1 %v2229_v53  ;;  %v2271_v49 = vld [vmem:[#allocation11 + $0x778] sm:$0xff]  ;;  %v2206_v53 = vld [vmem:[#allocation11 + $0x570] sm:$0xff] }
 0x4c0   :  { %2315 = vmatpush1.msra.mxu0 %v2164_v39  ;;  %2392 = vmatpush1.msra.mxu1 %v2228_v43  ;;  %v2270_v39 = vld [vmem:[#allocation11 + $0x770] sm:$0xff]  ;;  %v2205_v43 = vld [vmem:[#allocation11 + $0x568] sm:$0xff] }
 0x4c1   :  { %2316 = vmatprep.subr.mxu0 %v2163_v56  ;;  %2393 = vmatprep.subr.mxu1 %v2227_v60  ;;  %v2269_v56 = vld [vmem:[#allocation11 + $0x768] sm:$0xff]  ;;  %v2204_v60 = vld [vmem:[#allocation11 + $0x560] sm:$0xff] }
 0x4c2   :  { %2317 = vmatpush1.msra.mxu0 %v2162_v3  ;;  %2394 = vmatpush1.msra.mxu1 %v2226_v46  ;;  %v2268_v3 = vld [vmem:[#allocation11 + $0x760] sm:$0xff]  ;;  %v2203_v46 = vld [vmem:[#allocation11 + $0x558] sm:$0xff] }
 0x4c3   :  { %2318 = vmatprep.subr.mxu0 %v2161_v47  ;;  %2395 = vmatprep.subr.mxu1 %v2225_v50  ;;  %v2267_v47 = vld [vmem:[#allocation11 + $0x758] sm:$0xff]  ;;  %v2202_v50 = vld [vmem:[#allocation11 + $0x550] sm:$0xff] }
 0x4c4   :  { %2319 = vmatpush1.msra.mxu0 %v2160_v51  ;;  %2396 = vmatpush1.msra.mxu1 %v2224_v52  ;;  %v2266_v51 = vld [vmem:[#allocation11 + $0x750] sm:$0xff]  ;;  %v2201_v52 = vld [vmem:[#allocation11 + $0x548] sm:$0xff] }
 0x4c5   :  { %2320 = vmatprep.subr.mxu0 %v2223_v54  ;;  %2397 = vmatprep.subr.mxu1 %v2287_v55  ;;  %v2265_v54 = vld [vmem:[#allocation11 + $0x748] sm:$0xff]  ;;  %v2200_v55 = vld [vmem:[#allocation11 + $0x540] sm:$0xff] }
 0x4c6   :  { %2321 = vmatpush2.msra.mxu0 %v2222_v40  ;;  %2398 = vmatpush2.msra.mxu1 %v2286_v57  ;;  %v2264_v40 = vld [vmem:[#allocation11 + $0x740] sm:$0xff]  ;;  %v2199_v57 = vld [vmem:[#allocation11 + $0x538] sm:$0xff] }
 0x4c7   :  { %2322 = vmatprep.subr.mxu0 %v2221_v58  ;;  %2399 = vmatprep.subr.mxu1 %v2285_v44  ;;  %v2263_v58 = vld [vmem:[#allocation11 + $0x738] sm:$0xff]  ;;  %v2198_v44 = vld [vmem:[#allocation11 + $0x530] sm:$0xff] }
 0x4c8   :  { %2323 = vmatpush2.msra.mxu0 %v2220_v59  ;;  %2400 = vmatpush2.msra.mxu1 %v2284_v61  ;;  %v2262_v59 = vld [vmem:[#allocation11 + $0x730] sm:$0xff]  ;;  %v2197_v61 = vld [vmem:[#allocation11 + $0x528] sm:$0xff] }
 0x4c9   :  { %2324 = vmatprep.subr.mxu0 %v2219_v33  ;;  %2401 = vmatprep.subr.mxu1 %v2283_v62  ;;  %v2261_v33 = vld [vmem:[#allocation11 + $0x728] sm:$0xff]  ;;  %v2196_v62 = vld [vmem:[#allocation11 + $0x520] sm:$0xff] }
 0x4ca   :  { %2325 = vmatpush2.msra.mxu0 %v2218_v42  ;;  %2402 = vmatpush2.msra.mxu1 %v2282_v63  ;;  %v2260_v42 = vld [vmem:[#allocation11 + $0x720] sm:$0xff]  ;;  %v2195_v63 = vld [vmem:[#allocation11 + $0x518] sm:$0xff] }
 0x4cb   :  { %2326 = vmatprep.subr.mxu0 %v2217_v9  ;;  %2403 = vmatprep.subr.mxu1 %v2281_v11  ;;  %v2259_v9 = vld [vmem:[#allocation11 + $0x718] sm:$0xff]  ;;  %v2194_v11 = vld [vmem:[#allocation11 + $0x510] sm:$0xff] }
 0x4cc   :  { %2327 = vmatpush2.msra.mxu0 %v2216_v13  ;;  %2404 = vmatpush2.msra.mxu1 %v2280_v38  ;;  %v2258_v13 = vld [vmem:[#allocation11 + $0x710] sm:$0xff]  ;;  %v2193_v38 = vld [vmem:[#allocation11 + $0x508] sm:$0xff] }
 0x4cd   :  { %2328 = vmatprep.subr.mxu0 %v2215_v0  ;;  %2405 = vmatprep.subr.mxu1 %v2279_v35  ;;  %v2257_v0 = vld [vmem:[#allocation11 + $0x708] sm:$0xff]  ;;  %v2192_v35 = vld [vmem:[#allocation11 + $0x500] sm:$0xff] }
 0x4ce   :  { %2329 = vmatpush2.msra.mxu0 %v2214_v4  ;;  %2406 = vmatpush2.msra.mxu1 %v2278_v5  ;;  %v2256_v4 = vld [vmem:[#allocation11 + $0x700] sm:$0xff]  ;;  %v1899_v5 = vld [vmem:[#allocation11 + $0xf8] sm:$0xff] }
 0x4cf   :  { %2330 = vmatprep.subr.mxu0 %v2213_v10  ;;  %2407 = vmatprep.subr.mxu1 %v2277_v12  ;;  %v1963_v10 = vld [vmem:[#allocation11 + $0x2f8] sm:$0xff] }
 0x4d0   :  { %2331 = vmatpush2.msra.mxu0 %v2212_v25  ;;  %2408 = vmatpush2.msra.mxu1 %v2276_v26 }
 0x4d1   :  { %2332 = vmatprep.subr.mxu0 %v2211_v27  ;;  %2409 = vmatprep.subr.mxu1 %v2275_v29 }
 0x4d2   :  { %2333 = vmatpush2.msra.mxu0 %v2210_v31  ;;  %2410 = vmatpush2.msra.mxu1 %v2274_v37 }
 0x4d3   :  { %2334 = vmatprep.subr.mxu0 %v2209_v28  ;;  %2411 = vmatprep.subr.mxu1 %v2273_v41 }
 0x4d4   :  { %2335 = vmatpush2.msra.mxu0 %v2208_v34  ;;  %2412 = vmatpush2.msra.mxu1 %v2272_v45 }
 0x4d5   :  { %2336 = vmatprep.subr.mxu0 %v2207_v36  ;;  %2413 = vmatprep.subr.mxu1 %v2271_v49  ;;  %v1898_v49 = vld [vmem:[#allocation11 + $0xf0] sm:$0xff] }
 0x4d6   :  { %2337 = vmatpush2.msra.mxu0 %v2206_v53  ;;  %2414 = vmatpush2.msra.mxu1 %v2270_v39  ;;  %v1962_v53 = vld [vmem:[#allocation11 + $0x2f0] sm:$0xff]  ;;  %v1897_v39 = vld [vmem:[#allocation11 + $0xe8] sm:$0xff] }
 0x4d7   :  { %2338 = vmatprep.subr.mxu0 %v2205_v43  ;;  %2415 = vmatprep.subr.mxu1 %v2269_v56  ;;  %v1961_v43 = vld [vmem:[#allocation11 + $0x2e8] sm:$0xff] }
 0x4d8   :  { %2339 = vmatpush2.msra.mxu0 %v2204_v60  ;;  %2416 = vmatpush2.msra.mxu1 %v2268_v3  ;;  %v1896_v3 = vld [vmem:[#allocation11 + $0xe0] sm:$0xff] }
 0x4d9   :  { %2340 = vmatprep.subr.mxu0 %v2203_v46  ;;  %2417 = vmatprep.subr.mxu1 %v2267_v47  ;;  %v1960_v46 = vld [vmem:[#allocation11 + $0x2e0] sm:$0xff] }
 0x4da   :  { %2341 = vmatpush2.msra.mxu0 %v2202_v50  ;;  %2418 = vmatpush2.msra.mxu1 %v2266_v51  ;;  %v1895_v51 = vld [vmem:[#allocation11 + $0xd8] sm:$0xff] }
 0x4db   :  { %2342 = vmatprep.subr.mxu0 %v2201_v52  ;;  %2419 = vmatprep.subr.mxu1 %v2265_v54  ;;  %v1959_v52 = vld [vmem:[#allocation11 + $0x2d8] sm:$0xff]  ;;  %v1894_v54 = vld [vmem:[#allocation11 + $0xd0] sm:$0xff] }
 0x4dc   :  { %2343 = vmatpush2.msra.mxu0 %v2200_v55  ;;  %2420 = vmatpush2.msra.mxu1 %v2264_v40  ;;  %v1958_v55 = vld [vmem:[#allocation11 + $0x2d0] sm:$0xff]  ;;  %v1893_v40 = vld [vmem:[#allocation11 + $0xc8] sm:$0xff] }
 0x4dd   :  { %2344 = vmatprep.subr.mxu0 %v2199_v57  ;;  %2421 = vmatprep.subr.mxu1 %v2263_v58  ;;  %v1957_v57 = vld [vmem:[#allocation11 + $0x2c8] sm:$0xff]  ;;  %v1892_v58 = vld [vmem:[#allocation11 + $0xc0] sm:$0xff] }
 0x4de   :  { %2345 = vmatpush2.msra.mxu0 %v2198_v44  ;;  %2422 = vmatpush2.msra.mxu1 %v2262_v59  ;;  %v1956_v44 = vld [vmem:[#allocation11 + $0x2c0] sm:$0xff]  ;;  %v1891_v59 = vld [vmem:[#allocation11 + $0xb8] sm:$0xff] }
 0x4df   :  { %2346 = vmatprep.subr.mxu0 %v2197_v61  ;;  %2423 = vmatprep.subr.mxu1 %v2261_v33  ;;  %v1955_v61 = vld [vmem:[#allocation11 + $0x2b8] sm:$0xff]  ;;  %v1890_v33 = vld [vmem:[#allocation11 + $0xb0] sm:$0xff] }
 0x4e0   :  { %2347 = vmatpush2.msra.mxu0 %v2196_v62  ;;  %2424 = vmatpush2.msra.mxu1 %v2260_v42  ;;  %v1954_v62 = vld [vmem:[#allocation11 + $0x2b0] sm:$0xff]  ;;  %v1889_v42 = vld [vmem:[#allocation11 + $0xa8] sm:$0xff] }
 0x4e1   :  { %2348 = vmatprep.subr.mxu0 %v2195_v63  ;;  %2425 = vmatprep.subr.mxu1 %v2259_v9  ;;  %v1953_v63 = vld [vmem:[#allocation11 + $0x2a8] sm:$0xff]  ;;  %v1888_v9 = vld [vmem:[#allocation11 + $0xa0] sm:$0xff] }
 0x4e2   :  { %2349 = vmatpush2.msra.mxu0 %v2194_v11  ;;  %2426 = vmatpush2.msra.mxu1 %v2258_v13  ;;  %v1952_v11 = vld [vmem:[#allocation11 + $0x2a0] sm:$0xff]  ;;  %v1887_v13 = vld [vmem:[#allocation11 + $0x98] sm:$0xff] }
 0x4e3   :  { %2350 = vmatprep.subr.mxu0 %v2193_v38  ;;  %2427 = vmatprep.subr.mxu1 %v2257_v0  ;;  %v1951_v38 = vld [vmem:[#allocation11 + $0x298] sm:$0xff]  ;;  %v1886_v0 = vld [vmem:[#allocation11 + $0x90] sm:$0xff] }
 0x4e4   :  { %2351 = vmatpush2.msra.mxu0 %v2192_v35  ;;  %2428 = vmatpush2.msra.mxu1 %v2256_v4  ;;  %v1950_v35 = vld [vmem:[#allocation11 + $0x290] sm:$0xff]  ;;  %v1885_v4 = vld [vmem:[#allocation11 + $0x88] sm:$0xff] }
 0x4e5   :  { %2442 = vmatprep.subr.mxu0 %v1899_v5  ;;  %2519 = vmatprep.subr.mxu1 %v1963_v10  ;;  %v1949_v5 = vld [vmem:[#allocation11 + $0x288] sm:$0xff]  ;;  %v1884_v10 = vld [vmem:[#allocation11 + $0x80] sm:$0xff] }
 0x556   :  { %v7550_v12 = vpop.f32.mrf.mxu0  ;;  %v7552_v25 = vpop.f32.mrf.mxu1 }
 0x558   :  { %v1782_v26 = vpop.f32.mrf.mxu0  ;;  %v1859_v27 = vpop.f32.mrf.mxu1 }
 0x55c   :  { %v7554_v29 = vpop.f32.mrf.mxu0  ;;  %v7556_v31 = vpop.f32.mrf.mxu1 }
 0x55e   :  { %v7558_v37 = vpop.f32.mrf.mxu0  ;;  %v7560_v28 = vpop.f32.mrf.mxu1 }
 0x562   :  { %v2071_v41 = vpop.f32.mrf.mxu0  ;;  %v2148_v34 = vpop.f32.mrf.mxu1 }
 0x564   :  { %v2073_v45 = vpop.f32.mrf.mxu0  ;;  %v2150_v36 = vpop.f32.mrf.mxu1 }
 0x565   :  { %2352 = vmatprep.mubr.f32.mxu0 %v2073_v45  ;;  %2429 = vmatprep.mubr.f32.mxu1 %v2150_v36  ;;  %v1946_v45 = vld [vmem:[#allocation11 + $0x270] sm:$0xff]  ;;  %v1881_v36 = vld [vmem:[#allocation11 + $0x68] sm:$0xff] }
 0x566   :  { %v2077_v56 = vpop.f32.mrf.mxu0  ;;  %v2154_v60 = vpop.f32.mrf.mxu1  ;;  %2353 = vmatmul.mubr.f32.vlgmr.msra.gmra.mxu0 %v2071_v41  ;;  %2430 = vmatmul.mubr.f32.vlgmr.msra.gmra.mxu1 %v2148_v34  ;;  %v1947_v41 = vld [vmem:[#allocation11 + $0x278] sm:$0xff]  ;;  %v1882_v34 = vld [vmem:[#allocation11 + $0x70] sm:$0xff] }
 0x567   :  { %2443 = vmatpush1.msra.mxu0 %v1898_v49  ;;  %2520 = vmatpush1.msra.mxu1 %v1962_v53  ;;  %v1945_v49 = vld [vmem:[#allocation11 + $0x268] sm:$0xff]  ;;  %v1880_v53 = vld [vmem:[#allocation11 + $0x60] sm:$0xff] }
 0x568   :  { %2444 = vmatprep.subr.mxu0 %v1897_v39  ;;  %2521 = vmatprep.subr.mxu1 %v1961_v43  ;;  %v2079_v47 = vpop.f32.mrf.mxu0  ;;  %v2156_v50 = vpop.f32.mrf.mxu1  ;;  %v1944_v39 = vld [vmem:[#allocation11 + $0x260] sm:$0xff]  ;;  %v1879_v43 = vld [vmem:[#allocation11 + $0x58] sm:$0xff] }
 0x569   :  { %2445 = vmatpush1.msra.mxu0 %v1896_v3  ;;  %2522 = vmatpush1.msra.mxu1 %v1960_v46  ;;  %v1942_v3 = vld [vmem:[#allocation11 + $0x250] sm:$0xff]  ;;  %v1877_v46 = vld [vmem:[#allocation11 + $0x48] sm:$0xff] }
 0x56a   :  { %2358 = vmatprep.mubr.f32.mxu0 %v2079_v47  ;;  %2435 = vmatprep.mubr.f32.mxu1 %v2156_v50  ;;  %v1941_v47 = vld [vmem:[#allocation11 + $0x248] sm:$0xff]  ;;  %v1876_v50 = vld [vmem:[#allocation11 + $0x40] sm:$0xff] }
 0x56b   :  { %2446 = vmatprep.subr.mxu0 %v1895_v51  ;;  %2523 = vmatprep.subr.mxu1 %v1959_v52  ;;  %v1940_v51 = vld [vmem:[#allocation11 + $0x240] sm:$0xff]  ;;  %v1875_v52 = vld [vmem:[#allocation11 + $0x38] sm:$0xff] }
 0x56c   :  { %2359 = vmatmul.mubr.f32.gmra.mxu0 %v2077_v56  ;;  %2436 = vmatmul.mubr.f32.gmra.mxu1 %v2154_v60  ;;  %v1943_v56 = vld [vmem:[#allocation11 + $0x258] sm:$0xff]  ;;  %v1878_v60 = vld [vmem:[#allocation11 + $0x50] sm:$0xff] }
 0x56d   :  { %2447 = vmatpush1.msra.mxu0 %v1894_v54  ;;  %2524 = vmatpush1.msra.mxu1 %v1958_v55  ;;  %v1939_v54 = vld [vmem:[#allocation11 + $0x238] sm:$0xff]  ;;  %v1874_v55 = vld [vmem:[#allocation11 + $0x30] sm:$0xff] }
 0x56e   :  { %2448 = vmatprep.subr.mxu0 %v1893_v40  ;;  %2506 = vmatprep.mubr.f32.mxu0 %v1782_v26  ;;  %v1948_v26 = vld [vmem:[#allocation11 + $0x280] sm:$0xff]  ;;  %v1938_v40 = vld [vmem:[#allocation11 + $0x230] sm:$0xff] }
 0x56f   :  { %2525 = vmatprep.subr.mxu1 %v1957_v57  ;;  %2583 = vmatprep.mubr.f32.mxu1 %v1859_v27  ;;  %v1883_v27 = vld [vmem:[#allocation11 + $0x78] sm:$0xff]  ;;  %v1873_v57 = vld [vmem:[#allocation11 + $0x28] sm:$0xff] }
 0x570   :  { %2449 = vmatpush1.msra.mxu0 %v1892_v58  ;;  %2526 = vmatpush1.msra.mxu1 %v1956_v44  ;;  %v1937_v58 = vld [vmem:[#allocation11 + $0x228] sm:$0xff]  ;;  %v1872_v44 = vld [vmem:[#allocation11 + $0x20] sm:$0xff] }
 0x571   :  { %2450 = vmatprep.subr.mxu0 %v1891_v59  ;;  %2527 = vmatprep.subr.mxu1 %v1955_v61  ;;  %v1936_v59 = vld [vmem:[#allocation11 + $0x220] sm:$0xff]  ;;  %v1871_v61 = vld [vmem:[#allocation11 + $0x18] sm:$0xff] }
 0x572   :  { %2451 = vmatpush1.msra.mxu0 %v1890_v33  ;;  %2528 = vmatpush1.msra.mxu1 %v1954_v62  ;;  %v1935_v33 = vld [vmem:[#allocation11 + $0x218] sm:$0xff]  ;;  %v1870_v62 = vld [vmem:[#allocation11 + $0x10] sm:$0xff] }
 0x573   :  { %2452 = vmatprep.subr.mxu0 %v1889_v42  ;;  %2529 = vmatprep.subr.mxu1 %v1953_v63  ;;  %v1934_v42 = vld [vmem:[#allocation11 + $0x210] sm:$0xff]  ;;  %v1869_v63 = vld [vmem:[#allocation11 + $0x8] sm:$0xff] }
 0x574   :  { %2453 = vmatpush1.msra.mxu0 %v1888_v9  ;;  %2530 = vmatpush1.msra.mxu1 %v1952_v11  ;;  %v1933_v9 = vld [vmem:[#allocation11 + $0x208] sm:$0xff]  ;;  %v1868_v11 = vld [vmem:[#allocation11] sm:$0xff] }
 0x575   :  { %2454 = vmatprep.subr.mxu0 %v1887_v13  ;;  %2531 = vmatprep.subr.mxu1 %v1951_v38  ;;  %v1932_v13 = vld [vmem:[#allocation11 + $0x200] sm:$0xff]  ;;  %v1931_v38 = vld [vmem:[#allocation11 + $0x1f8] sm:$0xff] }
 0x576   :  { %2455 = vmatpush1.msra.mxu0 %v1886_v0  ;;  %2532 = vmatpush1.msra.mxu1 %v1950_v35  ;;  %v1995_v0 = vld [vmem:[#allocation11 + $0x3f8] sm:$0xff]  ;;  %v1930_v35 = vld [vmem:[#allocation11 + $0x1f0] sm:$0xff] }
 0x577   :  { %2456 = vmatprep.subr.mxu0 %v1885_v4  ;;  %2533 = vmatprep.subr.mxu1 %v1949_v5  ;;  %v1994_v4 = vld [vmem:[#allocation11 + $0x3f0] sm:$0xff]  ;;  %v1929_v5 = vld [vmem:[#allocation11 + $0x1e8] sm:$0xff] }
 0x578   :  { %2457 = vmatpush1.msra.mxu0 %v1884_v10  ;;  %2534 = vmatpush1.msra.mxu1 %v1948_v26  ;;  %v1993_v10 = vld [vmem:[#allocation11 + $0x3e8] sm:$0xff]  ;;  %v1928_v26 = vld [vmem:[#allocation11 + $0x1e0] sm:$0xff] }
 0x579   :  { %2458 = vmatprep.subr.mxu0 %v1883_v27  ;;  %2535 = vmatprep.subr.mxu1 %v1947_v41  ;;  %v1992_v27 = vld [vmem:[#allocation11 + $0x3e0] sm:$0xff]  ;;  %v1927_v41 = vld [vmem:[#allocation11 + $0x1d8] sm:$0xff] }
 0x57a   :  { %2459 = vmatpush1.msra.mxu0 %v1882_v34  ;;  %2536 = vmatpush1.msra.mxu1 %v1946_v45  ;;  %v1991_v34 = vld [vmem:[#allocation11 + $0x3d8] sm:$0xff]  ;;  %v1926_v45 = vld [vmem:[#allocation11 + $0x1d0] sm:$0xff] }
 0x57b   :  { %2460 = vmatprep.subr.mxu0 %v1881_v36  ;;  %2537 = vmatprep.subr.mxu1 %v1945_v49  ;;  %v1990_v36 = vld [vmem:[#allocation11 + $0x3d0] sm:$0xff]  ;;  %v1925_v49 = vld [vmem:[#allocation11 + $0x1c8] sm:$0xff] }
 0x57c   :  { %2461 = vmatpush1.msra.mxu0 %v1880_v53  ;;  %2538 = vmatpush1.msra.mxu1 %v1944_v39  ;;  %v1989_v53 = vld [vmem:[#allocation11 + $0x3c8] sm:$0xff]  ;;  %v1924_v39 = vld [vmem:[#allocation11 + $0x1c0] sm:$0xff] }
 0x57d   :  { %2462 = vmatprep.subr.mxu0 %v1879_v43  ;;  %2539 = vmatprep.subr.mxu1 %v1943_v56  ;;  %v1988_v43 = vld [vmem:[#allocation11 + $0x3c0] sm:$0xff]  ;;  %v1923_v56 = vld [vmem:[#allocation11 + $0x1b8] sm:$0xff] }
 0x57e   :  { %2463 = vmatpush1.msra.mxu0 %v1878_v60  ;;  %2540 = vmatpush1.msra.mxu1 %v1942_v3  ;;  %v1987_v60 = vld [vmem:[#allocation11 + $0x3b8] sm:$0xff]  ;;  %v1922_v3 = vld [vmem:[#allocation11 + $0x1b0] sm:$0xff] }
 0x57f   :  { %2464 = vmatprep.subr.mxu0 %v1877_v46  ;;  %2541 = vmatprep.subr.mxu1 %v1941_v47  ;;  %v1986_v46 = vld [vmem:[#allocation11 + $0x3b0] sm:$0xff]  ;;  %v1921_v47 = vld [vmem:[#allocation11 + $0x1a8] sm:$0xff] }
 0x580   :  { %2465 = vmatpush1.msra.mxu0 %v1876_v50  ;;  %2542 = vmatpush1.msra.mxu1 %v1940_v51  ;;  %v1985_v50 = vld [vmem:[#allocation11 + $0x3a8] sm:$0xff]  ;;  %v1920_v51 = vld [vmem:[#allocation11 + $0x1a0] sm:$0xff] }
 0x581   :  { %2466 = vmatprep.subr.mxu0 %v1875_v52  ;;  %2543 = vmatprep.subr.mxu1 %v1939_v54  ;;  %v1984_v52 = vld [vmem:[#allocation11 + $0x3a0] sm:$0xff]  ;;  %v1919_v54 = vld [vmem:[#allocation11 + $0x198] sm:$0xff] }
 0x582   :  { %2467 = vmatpush1.msra.mxu0 %v1874_v55  ;;  %2544 = vmatpush1.msra.mxu1 %v1938_v40  ;;  %v1983_v55 = vld [vmem:[#allocation11 + $0x398] sm:$0xff]  ;;  %v1918_v40 = vld [vmem:[#allocation11 + $0x190] sm:$0xff] }
 0x583   :  { %2468 = vmatprep.subr.mxu0 %v1873_v57  ;;  %2545 = vmatprep.subr.mxu1 %v1937_v58  ;;  %v1982_v57 = vld [vmem:[#allocation11 + $0x390] sm:$0xff]  ;;  %v1917_v58 = vld [vmem:[#allocation11 + $0x188] sm:$0xff] }
 0x584   :  { %2469 = vmatpush1.msra.mxu0 %v1872_v44  ;;  %2546 = vmatpush1.msra.mxu1 %v1936_v59  ;;  %v1981_v44 = vld [vmem:[#allocation11 + $0x388] sm:$0xff]  ;;  %v1916_v59 = vld [vmem:[#allocation11 + $0x180] sm:$0xff] }
 0x585   :  { %2470 = vmatprep.subr.mxu0 %v1871_v61  ;;  %2547 = vmatprep.subr.mxu1 %v1935_v33  ;;  %v1980_v61 = vld [vmem:[#allocation11 + $0x380] sm:$0xff]  ;;  %v1915_v33 = vld [vmem:[#allocation11 + $0x178] sm:$0xff] }
 0x586   :  { %2471 = vmatpush1.msra.mxu0 %v1870_v62  ;;  %2548 = vmatpush1.msra.mxu1 %v1934_v42  ;;  %v1979_v62 = vld [vmem:[#allocation11 + $0x378] sm:$0xff]  ;;  %v1914_v42 = vld [vmem:[#allocation11 + $0x170] sm:$0xff] }
 0x587   :  { %2472 = vmatprep.subr.mxu0 %v1869_v63  ;;  %2549 = vmatprep.subr.mxu1 %v1933_v9  ;;  %v1978_v63 = vld [vmem:[#allocation11 + $0x370] sm:$0xff]  ;;  %v1913_v9 = vld [vmem:[#allocation11 + $0x168] sm:$0xff] }
 0x588   :  { %2473 = vmatpush1.msra.mxu0 %v1868_v11  ;;  %2550 = vmatpush1.msra.mxu1 %v1932_v13  ;;  %v1977_v11 = vld [vmem:[#allocation11 + $0x368] sm:$0xff]  ;;  %v1912_v13 = vld [vmem:[#allocation11 + $0x160] sm:$0xff] }
 0x589   :  { %2474 = vmatprep.subr.mxu0 %v1931_v38  ;;  %2551 = vmatprep.subr.mxu1 %v1995_v0  ;;  %v1976_v38 = vld [vmem:[#allocation11 + $0x360] sm:$0xff]  ;;  %v1911_v0 = vld [vmem:[#allocation11 + $0x158] sm:$0xff] }
 0x58a   :  { %2475 = vmatpush2.msra.mxu0 %v1930_v35  ;;  %2552 = vmatpush2.msra.mxu1 %v1994_v4  ;;  %v1975_v35 = vld [vmem:[#allocation11 + $0x358] sm:$0xff]  ;;  %v1910_v4 = vld [vmem:[#allocation11 + $0x150] sm:$0xff] }
 0x58b   :  { %2476 = vmatprep.subr.mxu0 %v1929_v5  ;;  %2553 = vmatprep.subr.mxu1 %v1993_v10  ;;  %v1974_v5 = vld [vmem:[#allocation11 + $0x350] sm:$0xff]  ;;  %v1909_v10 = vld [vmem:[#allocation11 + $0x148] sm:$0xff] }
 0x58c   :  { %2477 = vmatpush2.msra.mxu0 %v1928_v26  ;;  %2554 = vmatpush2.msra.mxu1 %v1992_v27  ;;  %v1973_v26 = vld [vmem:[#allocation11 + $0x348] sm:$0xff]  ;;  %v1908_v27 = vld [vmem:[#allocation11 + $0x140] sm:$0xff] }
 0x58d   :  { %2478 = vmatprep.subr.mxu0 %v1927_v41  ;;  %2555 = vmatprep.subr.mxu1 %v1991_v34  ;;  %v1972_v41 = vld [vmem:[#allocation11 + $0x340] sm:$0xff]  ;;  %v1907_v34 = vld [vmem:[#allocation11 + $0x138] sm:$0xff] }
 0x58e   :  { %2479 = vmatpush2.msra.mxu0 %v1926_v45  ;;  %2556 = vmatpush2.msra.mxu1 %v1990_v36  ;;  %v1971_v45 = vld [vmem:[#allocation11 + $0x338] sm:$0xff]  ;;  %v1906_v36 = vld [vmem:[#allocation11 + $0x130] sm:$0xff] }
 0x58f   :  { %2480 = vmatprep.subr.mxu0 %v1925_v49  ;;  %2557 = vmatprep.subr.mxu1 %v1989_v53  ;;  %v1970_v49 = vld [vmem:[#allocation11 + $0x330] sm:$0xff]  ;;  %v1905_v53 = vld [vmem:[#allocation11 + $0x128] sm:$0xff] }
 0x590   :  { %2481 = vmatpush2.msra.mxu0 %v1924_v39  ;;  %2558 = vmatpush2.msra.mxu1 %v1988_v43  ;;  %v1969_v39 = vld [vmem:[#allocation11 + $0x328] sm:$0xff]  ;;  %v1904_v43 = vld [vmem:[#allocation11 + $0x120] sm:$0xff] }
 0x591   :  { %2482 = vmatprep.subr.mxu0 %v1923_v56  ;;  %2559 = vmatprep.subr.mxu1 %v1987_v60  ;;  %v1968_v56 = vld [vmem:[#allocation11 + $0x320] sm:$0xff]  ;;  %v1903_v60 = vld [vmem:[#allocation11 + $0x118] sm:$0xff] }
 0x592   :  { %2483 = vmatpush2.msra.mxu0 %v1922_v3  ;;  %2560 = vmatpush2.msra.mxu1 %v1986_v46  ;;  %v1967_v3 = vld [vmem:[#allocation11 + $0x318] sm:$0xff]  ;;  %v1902_v46 = vld [vmem:[#allocation11 + $0x110] sm:$0xff] }
 0x593   :  { %2484 = vmatprep.subr.mxu0 %v1921_v47  ;;  %2561 = vmatprep.subr.mxu1 %v1985_v50  ;;  %v1966_v47 = vld [vmem:[#allocation11 + $0x310] sm:$0xff]  ;;  %v1901_v50 = vld [vmem:[#allocation11 + $0x108] sm:$0xff] }
 0x594   :  { %2485 = vmatpush2.msra.mxu0 %v1920_v51  ;;  %2562 = vmatpush2.msra.mxu1 %v1984_v52  ;;  %v1965_v51 = vld [vmem:[#allocation11 + $0x308] sm:$0xff]  ;;  %v1900_v52 = vld [vmem:[#allocation11 + $0x100] sm:$0xff] }
 0x595   :  { %2486 = vmatprep.subr.mxu0 %v1919_v54  ;;  %2563 = vmatprep.subr.mxu1 %v1983_v55  ;;  %v1964_v54 = vld [vmem:[#allocation11 + $0x300] sm:$0xff]  ;;  %v2853_v55 = vld [vmem:[#allocation11 + $0xae8] sm:$0xff] }
 0x596   :  { %2487 = vmatpush2.msra.mxu0 %v1918_v40  ;;  %2564 = vmatpush2.msra.mxu1 %v1982_v57  ;;  %v2788_v40 = vld [vmem:[#allocation11 + $0x8e0] sm:$0xff] }
 0x597   :  { %2488 = vmatprep.subr.mxu0 %v1917_v58  ;;  %2565 = vmatprep.subr.mxu1 %v1981_v44  ;;  %v2852_v57 = vld [vmem:[#allocation11 + $0xae0] sm:$0xff]  ;;  %v2598_v58 = vld [vmem:[#allocation10 + $0x28] sm:$0xff]  ;;  %v2787_v44 = vld [vmem:[#allocation11 + $0x8d8] sm:$0xff] }
 0x598   :  { %2489 = vmatpush2.msra.mxu0 %v1916_v59  ;;  %2566 = vmatpush2.msra.mxu1 %v1980_v61  ;;  %v2851_v59 = vld [vmem:[#allocation11 + $0xad8] sm:$0xff]  ;;  %v2786_v61 = vld [vmem:[#allocation11 + $0x8d0] sm:$0xff] }
 0x599   :  { %2490 = vmatprep.subr.mxu0 %v1915_v33  ;;  %2567 = vmatprep.subr.mxu1 %v1979_v62  ;;  %v2850_v33 = vld [vmem:[#allocation11 + $0xad0] sm:$0xff]  ;;  %v2785_v62 = vld [vmem:[#allocation11 + $0x8c8] sm:$0xff] }
 0x59a   :  { %2491 = vmatpush2.msra.mxu0 %v1914_v42  ;;  %2568 = vmatpush2.msra.mxu1 %v1978_v63  ;;  %v2849_v42 = vld [vmem:[#allocation11 + $0xac8] sm:$0xff]  ;;  %v2784_v63 = vld [vmem:[#allocation11 + $0x8c0] sm:$0xff] }
 0x59b   :  { %2492 = vmatprep.subr.mxu0 %v1913_v9  ;;  %2569 = vmatprep.subr.mxu1 %v1977_v11  ;;  %v2848_v9 = vld [vmem:[#allocation11 + $0xac0] sm:$0xff]  ;;  %v2783_v11 = vld [vmem:[#allocation11 + $0x8b8] sm:$0xff] }
 0x59c   :  { %2493 = vmatpush2.msra.mxu0 %v1912_v13  ;;  %2570 = vmatpush2.msra.mxu1 %v1976_v38  ;;  %v2847_v13 = vld [vmem:[#allocation11 + $0xab8] sm:$0xff]  ;;  %v2782_v38 = vld [vmem:[#allocation11 + $0x8b0] sm:$0xff] }
 0x59d   :  { %2494 = vmatprep.subr.mxu0 %v1911_v0  ;;  %2571 = vmatprep.subr.mxu1 %v1975_v35  ;;  %v2846_v0 = vld [vmem:[#allocation11 + $0xab0] sm:$0xff]  ;;  %v2781_v35 = vld [vmem:[#allocation11 + $0x8a8] sm:$0xff] }
 0x59e   :  { %2495 = vmatpush2.msra.mxu0 %v1910_v4  ;;  %2572 = vmatpush2.msra.mxu1 %v1974_v5  ;;  %v2845_v4 = vld [vmem:[#allocation11 + $0xaa8] sm:$0xff]  ;;  %v2780_v5 = vld [vmem:[#allocation11 + $0x8a0] sm:$0xff] }
 0x59f   :  { %2496 = vmatprep.subr.mxu0 %v1909_v10  ;;  %2573 = vmatprep.subr.mxu1 %v1973_v26  ;;  %v2844_v10 = vld [vmem:[#allocation11 + $0xaa0] sm:$0xff]  ;;  %v2779_v26 = vld [vmem:[#allocation11 + $0x898] sm:$0xff] }
 0x5a0   :  { %2497 = vmatpush2.msra.mxu0 %v1908_v27  ;;  %2574 = vmatpush2.msra.mxu1 %v1972_v41  ;;  %v2843_v27 = vld [vmem:[#allocation11 + $0xa98] sm:$0xff]  ;;  %v2778_v41 = vld [vmem:[#allocation11 + $0x890] sm:$0xff] }
 0x5a1   :  { %2498 = vmatprep.subr.mxu0 %v1907_v34  ;;  %2575 = vmatprep.subr.mxu1 %v1971_v45  ;;  %v2842_v34 = vld [vmem:[#allocation11 + $0xa90] sm:$0xff]  ;;  %v2777_v45 = vld [vmem:[#allocation11 + $0x888] sm:$0xff] }
 0x5a2   :  { %2499 = vmatpush2.msra.mxu0 %v1906_v36  ;;  %2576 = vmatpush2.msra.mxu1 %v1970_v49  ;;  %v2841_v36 = vld [vmem:[#allocation11 + $0xa88] sm:$0xff]  ;;  %v2776_v49 = vld [vmem:[#allocation11 + $0x880] sm:$0xff] }
 0x5a3   :  { %2500 = vmatprep.subr.mxu0 %v1905_v53  ;;  %2577 = vmatprep.subr.mxu1 %v1969_v39  ;;  %v2840_v53 = vld [vmem:[#allocation11 + $0xa80] sm:$0xff]  ;;  %v2775_v39 = vld [vmem:[#allocation11 + $0x878] sm:$0xff] }
 0x5a4   :  { %2501 = vmatpush2.msra.mxu0 %v1904_v43  ;;  %2578 = vmatpush2.msra.mxu1 %v1968_v56  ;;  %v2839_v43 = vld [vmem:[#allocation11 + $0xa78] sm:$0xff]  ;;  %v2774_v56 = vld [vmem:[#allocation11 + $0x870] sm:$0xff] }
 0x5a5   :  { %2502 = vmatprep.subr.mxu0 %v1903_v60  ;;  %2579 = vmatprep.subr.mxu1 %v1967_v3  ;;  %v2838_v60 = vld [vmem:[#allocation11 + $0xa70] sm:$0xff]  ;;  %v2773_v3 = vld [vmem:[#allocation11 + $0x868] sm:$0xff] }
 0x5a6   :  { %2503 = vmatpush2.msra.mxu0 %v1902_v46  ;;  %2580 = vmatpush2.msra.mxu1 %v1966_v47  ;;  %v2837_v46 = vld [vmem:[#allocation11 + $0xa68] sm:$0xff]  ;;  %v2772_v47 = vld [vmem:[#allocation11 + $0x860] sm:$0xff] }
 0x5a7   :  { %2504 = vmatprep.subr.mxu0 %v1901_v50  ;;  %2581 = vmatprep.subr.mxu1 %v1965_v51  ;;  %v2836_v50 = vld [vmem:[#allocation11 + $0xa60] sm:$0xff]  ;;  %v2771_v51 = vld [vmem:[#allocation11 + $0x858] sm:$0xff] }
 0x5a8   :  { %2505 = vmatpush2.msra.mxu0 %v1900_v52  ;;  %2582 = vmatpush2.msra.mxu1 %v1964_v54  ;;  %v2835_v52 = vld [vmem:[#allocation11 + $0xa58] sm:$0xff]  ;;  %v2770_v54 = vld [vmem:[#allocation11 + $0x850] sm:$0xff] }
 0x5a9   :  { %2507 = vmatmul.mubr.f32.vlgmr.msra.gmra.mxu0 %v7550_v12  ;;  %2584 = vmatmul.mubr.f32.vlgmr.msra.gmra.mxu1 %v7552_v25  ;;  %v2597_v12 = vld [vmem:[#allocation10 + $0x20] sm:$0xff]  ;;  %v2791_v25 = vld [vmem:[#allocation11 + $0x8f8] sm:$0xff] }
 0x5aa   :  { %2629 = vmatprep.subr.mxu0 %v7472_v14  ;;  %2706 = vmatprep.subr.mxu1 %v7474_v48 }
 0x5ab   :  { %2512 = vmatprep.mubr.f32.mxu0 %v7558_v37  ;;  %2589 = vmatprep.mubr.f32.mxu1 %v7560_v28  ;;  %v2854_v37 = vld [vmem:[#allocation11 + $0xaf0] sm:$0xff]  ;;  %v2789_v28 = vld [vmem:[#allocation11 + $0x8e8] sm:$0xff] }
 0x5ac   :  { %2630 = vmatpush1.msra.mxu0 %v7476_v1  ;;  %2707 = vmatpush1.msra.mxu1 %v7478_v2 }
 0x5ad   :  { %2631 = vmatprep.subr.mxu0 %v7480_v7  ;;  %2708 = vmatprep.subr.mxu1 %v7482_v30 }
 0x5ae   :  { %2632 = vmatpush1.msra.mxu0 %v7486_v16  ;;  %2709 = vmatpush1.msra.mxu1 %v7488_v17 }
 0x5af   :  { %2513 = vmatmul.mubr.f32.gmra.mxu0 %v7554_v29  ;;  %2590 = vmatmul.mubr.f32.gmra.mxu1 %v7556_v31  ;;  %v2855_v29 = vld [vmem:[#allocation11 + $0xaf8] sm:$0xff]  ;;  %v2790_v31 = vld [vmem:[#allocation11 + $0x8f0] sm:$0xff] }
 0x5b0   :  { %2633 = vmatprep.subr.mxu0 %v7492_v18  ;;  %2710 = vmatprep.subr.mxu1 %v7494_v8 }
 0x5b1   :  { %2634 = vmatpush1.msra.mxu0 %v7498_v19  ;;  %2711 = vmatpush1.msra.mxu1 %v7500_v20 }
 0x5b2   :  { %2635 = vmatprep.subr.mxu0 %v7504_v21  ;;  %2712 = vmatprep.subr.mxu1 %v7506_v22 }
 0x5b3   :  { %2636 = vmatpush1.msra.mxu0 %v7510_v23  ;;  %2669 = vmatprep.mubr.f32.mxu0 %v6981_v32 }
 0x5b4   :  { %2713 = vmatpush1.msra.mxu1 %v7512_v24  ;;  %2746 = vmatprep.mubr.f32.mxu1 %v6981_v32 }
 0x5b5   :  { %5951 = vmatmul.mubr.msk.f32.vlgmr.msra.gmra.mxu0 %vm621_vm1, %v2597_v12  ;;  %5953 = vmatmul.mubr.msk.f32.vlgmr.msra.gmra.mxu1 %vm621_vm1, %v2597_v12  ;;  %v2834_v12 = vld [vmem:[#allocation11 + $0xa50] sm:$0xff] }
 0x5b6   :  { %2888 = vmatprep.subr.mxu0 %v2791_v25  ;;  %2965 = vmatprep.subr.mxu1 %v2855_v29  ;;  %v2769_v25 = vld [vmem:[#allocation11 + $0x848] sm:$0xff] }
 0x5b7   :  { %2889 = vmatpush1.msra.mxu0 %v2790_v31  ;;  %2966 = vmatpush1.msra.mxu1 %v2854_v37  ;;  %v2833_v29 = vld [vmem:[#allocation11 + $0xa48] sm:$0xff]  ;;  %v2768_v31 = vld [vmem:[#allocation11 + $0x840] sm:$0xff] }
 0x5b8   :  { %2890 = vmatprep.subr.mxu0 %v2789_v28  ;;  %2967 = vmatprep.subr.mxu1 %v2853_v55  ;;  %v2832_v37 = vld [vmem:[#allocation11 + $0xa40] sm:$0xff]  ;;  %v2767_v28 = vld [vmem:[#allocation11 + $0x838] sm:$0xff] }
 0x5b9   :  { %2675 = vmatprep.mubr.f32.mxu0 %v6981_v32  ;;  %2752 = vmatprep.mubr.f32.mxu1 %v6981_v32  ;;  %v2831_v55 = vld [vmem:[#allocation11 + $0xa38] sm:$0xff] }
 0x5ba   :  { %2891 = vmatpush1.msra.mxu0 %v2788_v40  ;;  %2968 = vmatpush1.msra.mxu1 %v2852_v57  ;;  %v2766_v40 = vld [vmem:[#allocation11 + $0x830] sm:$0xff] }
 0x5bb   :  { %5952 = vmatmul.mubr.msk.f32.gmra.mxu0 %vm621_vm1, %v2598_v58  ;;  %5954 = vmatmul.mubr.msk.f32.gmra.mxu1 %vm621_vm1, %v2598_v58  ;;  %v2830_v57 = vld [vmem:[#allocation11 + $0xa30] sm:$0xff]  ;;  %v2765_v58 = vld [vmem:[#allocation11 + $0x828] sm:$0xff] }
 0x5bc   :  { %2892 = vmatprep.subr.mxu0 %v2787_v44  ;;  %2969 = vmatprep.subr.mxu1 %v2851_v59  ;;  %v2829_v44 = vld [vmem:[#allocation11 + $0xa28] sm:$0xff]  ;;  %v2764_v59 = vld [vmem:[#allocation11 + $0x820] sm:$0xff] }
 0x5bd   :  { %2893 = vmatpush1.msra.mxu0 %v2786_v61  ;;  %2970 = vmatpush1.msra.mxu1 %v2850_v33  ;;  %v2828_v61 = vld [vmem:[#allocation11 + $0xa20] sm:$0xff]  ;;  %v2763_v33 = vld [vmem:[#allocation11 + $0x818] sm:$0xff] }
 0x5be   :  { %2894 = vmatprep.subr.mxu0 %v2785_v62  ;;  %2971 = vmatprep.subr.mxu1 %v2849_v42  ;;  %v2827_v62 = vld [vmem:[#allocation11 + $0xa18] sm:$0xff]  ;;  %v2762_v42 = vld [vmem:[#allocation11 + $0x810] sm:$0xff] }
 0x5bf   :  { %2895 = vmatpush1.msra.mxu0 %v2784_v63  ;;  %2972 = vmatpush1.msra.mxu1 %v2848_v9  ;;  %v2826_v63 = vld [vmem:[#allocation11 + $0xa10] sm:$0xff]  ;;  %v2761_v9 = vld [vmem:[#allocation11 + $0x808] sm:$0xff] }
 0x5c0   :  { %2896 = vmatprep.subr.mxu0 %v2783_v11  ;;  %2973 = vmatprep.subr.mxu1 %v2847_v13  ;;  %v2825_v11 = vld [vmem:[#allocation11 + $0xa08] sm:$0xff]  ;;  %v2760_v13 = vld [vmem:[#allocation11 + $0x800] sm:$0xff] }
 0x5c1   :  { %2897 = vmatpush1.msra.mxu0 %v2782_v38  ;;  %2974 = vmatpush1.msra.mxu1 %v2846_v0  ;;  %v2824_v38 = vld [vmem:[#allocation11 + $0xa00] sm:$0xff]  ;;  %v2823_v0 = vld [vmem:[#allocation11 + $0x9f8] sm:$0xff] }
 0x5c2   :  { %2898 = vmatprep.subr.mxu0 %v2781_v35  ;;  %2975 = vmatprep.subr.mxu1 %v2845_v4  ;;  %v2887_v35 = vld [vmem:[#allocation11 + $0xbf8] sm:$0xff]  ;;  %v2822_v4 = vld [vmem:[#allocation11 + $0x9f0] sm:$0xff] }
 0x5c3   :  { %2899 = vmatpush1.msra.mxu0 %v2780_v5  ;;  %2976 = vmatpush1.msra.mxu1 %v2844_v10  ;;  %v2886_v5 = vld [vmem:[#allocation11 + $0xbf0] sm:$0xff]  ;;  %v2821_v10 = vld [vmem:[#allocation11 + $0x9e8] sm:$0xff] }
 0x5c4   :  { %2900 = vmatprep.subr.mxu0 %v2779_v26  ;;  %2977 = vmatprep.subr.mxu1 %v2843_v27  ;;  %v2885_v26 = vld [vmem:[#allocation11 + $0xbe8] sm:$0xff]  ;;  %v2820_v27 = vld [vmem:[#allocation11 + $0x9e0] sm:$0xff] }
 0x5c5   :  { %2901 = vmatpush1.msra.mxu0 %v2778_v41  ;;  %2978 = vmatpush1.msra.mxu1 %v2842_v34  ;;  %v2884_v41 = vld [vmem:[#allocation11 + $0xbe0] sm:$0xff]  ;;  %v2819_v34 = vld [vmem:[#allocation11 + $0x9d8] sm:$0xff] }
 0x5c6   :  { %2902 = vmatprep.subr.mxu0 %v2777_v45  ;;  %2979 = vmatprep.subr.mxu1 %v2841_v36  ;;  %v2883_v45 = vld [vmem:[#allocation11 + $0xbd8] sm:$0xff]  ;;  %v2818_v36 = vld [vmem:[#allocation11 + $0x9d0] sm:$0xff] }
 0x5c7   :  { %2903 = vmatpush1.msra.mxu0 %v2776_v49  ;;  %2980 = vmatpush1.msra.mxu1 %v2840_v53  ;;  %v2882_v49 = vld [vmem:[#allocation11 + $0xbd0] sm:$0xff]  ;;  %v2817_v53 = vld [vmem:[#allocation11 + $0x9c8] sm:$0xff] }
 0x5c8   :  { %2904 = vmatprep.subr.mxu0 %v2775_v39  ;;  %2981 = vmatprep.subr.mxu1 %v2839_v43  ;;  %v2881_v39 = vld [vmem:[#allocation11 + $0xbc8] sm:$0xff]  ;;  %v2816_v43 = vld [vmem:[#allocation11 + $0x9c0] sm:$0xff] }
 0x5c9   :  { %2905 = vmatpush1.msra.mxu0 %v2774_v56  ;;  %2982 = vmatpush1.msra.mxu1 %v2838_v60  ;;  %v2880_v56 = vld [vmem:[#allocation11 + $0xbc0] sm:$0xff]  ;;  %v2815_v60 = vld [vmem:[#allocation11 + $0x9b8] sm:$0xff] }
 0x5ca   :  { %2906 = vmatprep.subr.mxu0 %v2773_v3  ;;  %2983 = vmatprep.subr.mxu1 %v2837_v46  ;;  %v2879_v3 = vld [vmem:[#allocation11 + $0xbb8] sm:$0xff]  ;;  %v2814_v46 = vld [vmem:[#allocation11 + $0x9b0] sm:$0xff] }
 0x5cb   :  { %2907 = vmatpush1.msra.mxu0 %v2772_v47  ;;  %2984 = vmatpush1.msra.mxu1 %v2836_v50  ;;  %v2878_v47 = vld [vmem:[#allocation11 + $0xbb0] sm:$0xff]  ;;  %v2813_v50 = vld [vmem:[#allocation11 + $0x9a8] sm:$0xff] }
 0x5cc   :  { %2908 = vmatprep.subr.mxu0 %v2771_v51  ;;  %2985 = vmatprep.subr.mxu1 %v2835_v52  ;;  %v2877_v51 = vld [vmem:[#allocation11 + $0xba8] sm:$0xff]  ;;  %v2812_v52 = vld [vmem:[#allocation11 + $0x9a0] sm:$0xff] }
 0x5cd   :  { %2909 = vmatpush1.msra.mxu0 %v2770_v54  ;;  %2986 = vmatpush1.msra.mxu1 %v2834_v12  ;;  %v2876_v54 = vld [vmem:[#allocation11 + $0xba0] sm:$0xff]  ;;  %v2811_v12 = vld [vmem:[#allocation11 + $0x998] sm:$0xff] }
 0x5ce   :  { %2910 = vmatprep.subr.mxu0 %v2769_v25  ;;  %2987 = vmatprep.subr.mxu1 %v2833_v29  ;;  %v2875_v25 = vld [vmem:[#allocation11 + $0xb98] sm:$0xff]  ;;  %v2810_v29 = vld [vmem:[#allocation11 + $0x990] sm:$0xff] }
 0x5cf   :  { %2911 = vmatpush1.msra.mxu0 %v2768_v31  ;;  %2988 = vmatpush1.msra.mxu1 %v2832_v37  ;;  %v2874_v31 = vld [vmem:[#allocation11 + $0xb90] sm:$0xff]  ;;  %v2809_v37 = vld [vmem:[#allocation11 + $0x988] sm:$0xff] }
 0x5d0   :  { %2912 = vmatprep.subr.mxu0 %v2767_v28  ;;  %2989 = vmatprep.subr.mxu1 %v2831_v55  ;;  %v2873_v28 = vld [vmem:[#allocation11 + $0xb88] sm:$0xff]  ;;  %v2808_v55 = vld [vmem:[#allocation11 + $0x980] sm:$0xff] }
 0x5d1   :  { %2913 = vmatpush1.msra.mxu0 %v2766_v40  ;;  %2990 = vmatpush1.msra.mxu1 %v2830_v57  ;;  %v2872_v40 = vld [vmem:[#allocation11 + $0xb80] sm:$0xff]  ;;  %v2807_v57 = vld [vmem:[#allocation11 + $0x978] sm:$0xff] }
 0x5d2   :  { %2914 = vmatprep.subr.mxu0 %v2765_v58  ;;  %2991 = vmatprep.subr.mxu1 %v2829_v44  ;;  %v2871_v58 = vld [vmem:[#allocation11 + $0xb78] sm:$0xff]  ;;  %v2806_v44 = vld [vmem:[#allocation11 + $0x970] sm:$0xff] }
 0x5d3   :  { %2915 = vmatpush1.msra.mxu0 %v2764_v59  ;;  %2992 = vmatpush1.msra.mxu1 %v2828_v61  ;;  %v2870_v59 = vld [vmem:[#allocation11 + $0xb70] sm:$0xff]  ;;  %v2805_v61 = vld [vmem:[#allocation11 + $0x968] sm:$0xff] }
 0x5d4   :  { %2916 = vmatprep.subr.mxu0 %v2763_v33  ;;  %2993 = vmatprep.subr.mxu1 %v2827_v62  ;;  %v2869_v33 = vld [vmem:[#allocation11 + $0xb68] sm:$0xff]  ;;  %v2804_v62 = vld [vmem:[#allocation11 + $0x960] sm:$0xff] }
 0x5d5   :  { %2917 = vmatpush1.msra.mxu0 %v2762_v42  ;;  %2994 = vmatpush1.msra.mxu1 %v2826_v63  ;;  %v2868_v42 = vld [vmem:[#allocation11 + $0xb60] sm:$0xff]  ;;  %v2803_v63 = vld [vmem:[#allocation11 + $0x958] sm:$0xff] }
 0x5d6   :  { %2918 = vmatprep.subr.mxu0 %v2761_v9  ;;  %2995 = vmatprep.subr.mxu1 %v2825_v11  ;;  %v2867_v9 = vld [vmem:[#allocation11 + $0xb58] sm:$0xff]  ;;  %v2802_v11 = vld [vmem:[#allocation11 + $0x950] sm:$0xff] }
 0x5d7   :  { %2919 = vmatpush1.msra.mxu0 %v2760_v13  ;;  %2996 = vmatpush1.msra.mxu1 %v2824_v38  ;;  %v2866_v13 = vld [vmem:[#allocation11 + $0xb50] sm:$0xff]  ;;  %v2801_v38 = vld [vmem:[#allocation11 + $0x948] sm:$0xff] }
 0x5d8   :  { %2920 = vmatprep.subr.mxu0 %v2823_v0  ;;  %2997 = vmatprep.subr.mxu1 %v2887_v35  ;;  %v2865_v0 = vld [vmem:[#allocation11 + $0xb48] sm:$0xff]  ;;  %v2800_v35 = vld [vmem:[#allocation11 + $0x940] sm:$0xff] }
 0x5d9   :  { %2921 = vmatpush2.msra.mxu0 %v2822_v4  ;;  %2998 = vmatpush2.msra.mxu1 %v2886_v5  ;;  %v2864_v4 = vld [vmem:[#allocation11 + $0xb40] sm:$0xff]  ;;  %v2799_v5 = vld [vmem:[#allocation11 + $0x938] sm:$0xff] }
 0x5da   :  { %2922 = vmatprep.subr.mxu0 %v2821_v10  ;;  %2999 = vmatprep.subr.mxu1 %v2885_v26  ;;  %v2863_v10 = vld [vmem:[#allocation11 + $0xb38] sm:$0xff]  ;;  %v2798_v26 = vld [vmem:[#allocation11 + $0x930] sm:$0xff] }
 0x5db   :  { %2923 = vmatpush2.msra.mxu0 %v2820_v27  ;;  %3000 = vmatpush2.msra.mxu1 %v2884_v41  ;;  %v2862_v27 = vld [vmem:[#allocation11 + $0xb30] sm:$0xff]  ;;  %v2797_v41 = vld [vmem:[#allocation11 + $0x928] sm:$0xff] }
 0x5dc   :  { %2924 = vmatprep.subr.mxu0 %v2819_v34  ;;  %3001 = vmatprep.subr.mxu1 %v2883_v45  ;;  %v2861_v34 = vld [vmem:[#allocation11 + $0xb28] sm:$0xff]  ;;  %v2796_v45 = vld [vmem:[#allocation11 + $0x920] sm:$0xff] }
 0x5dd   :  { %2925 = vmatpush2.msra.mxu0 %v2818_v36  ;;  %3002 = vmatpush2.msra.mxu1 %v2882_v49  ;;  %v2860_v36 = vld [vmem:[#allocation11 + $0xb20] sm:$0xff]  ;;  %v2795_v49 = vld [vmem:[#allocation11 + $0x918] sm:$0xff] }
 0x5de   :  { %2926 = vmatprep.subr.mxu0 %v2817_v53  ;;  %3003 = vmatprep.subr.mxu1 %v2881_v39  ;;  %v2859_v53 = vld [vmem:[#allocation11 + $0xb18] sm:$0xff]  ;;  %v2794_v39 = vld [vmem:[#allocation11 + $0x910] sm:$0xff] }
 0x5df   :  { %2927 = vmatpush2.msra.mxu0 %v2816_v43  ;;  %3004 = vmatpush2.msra.mxu1 %v2880_v56  ;;  %v2858_v43 = vld [vmem:[#allocation11 + $0xb10] sm:$0xff]  ;;  %v2793_v56 = vld [vmem:[#allocation11 + $0x908] sm:$0xff] }
 0x5e0   :  { %2928 = vmatprep.subr.mxu0 %v2815_v60  ;;  %3005 = vmatprep.subr.mxu1 %v2879_v3  ;;  %v2857_v60 = vld [vmem:[#allocation11 + $0xb08] sm:$0xff]  ;;  %v2792_v3 = vld [vmem:[#allocation11 + $0x900] sm:$0xff] }
 0x5e1   :  { %2929 = vmatpush2.msra.mxu0 %v2814_v46  ;;  %3006 = vmatpush2.msra.mxu1 %v2878_v47  ;;  %v2856_v46 = vld [vmem:[#allocation11 + $0xb00] sm:$0xff] }
 0x5e2   :  { %2930 = vmatprep.subr.mxu0 %v2813_v50  ;;  %3007 = vmatprep.subr.mxu1 %v2877_v51 }
 0x5e3   :  { %2931 = vmatpush2.msra.mxu0 %v2812_v52  ;;  %3008 = vmatpush2.msra.mxu1 %v2876_v54 }
 0x5e4   :  { %2932 = vmatprep.subr.mxu0 %v2811_v12  ;;  %3009 = vmatprep.subr.mxu1 %v2875_v25 }
 0x5e5   :  { %2933 = vmatpush2.msra.mxu0 %v2810_v29  ;;  %3010 = vmatpush2.msra.mxu1 %v2874_v31 }
 0x5e6   :  { %2934 = vmatprep.subr.mxu0 %v2809_v37  ;;  %3011 = vmatprep.subr.mxu1 %v2873_v28 }
 0x5e7   :  { %2935 = vmatpush2.msra.mxu0 %v2808_v55  ;;  %3012 = vmatpush2.msra.mxu1 %v2872_v40 }
 0x5e8   :  { %2936 = vmatprep.subr.mxu0 %v2807_v57  ;;  %3013 = vmatprep.subr.mxu1 %v2871_v58 }
 0x5e9   :  { %2937 = vmatpush2.msra.mxu0 %v2806_v44  ;;  %3014 = vmatpush2.msra.mxu1 %v2870_v59 }
 0x5ea   :  { %2938 = vmatprep.subr.mxu0 %v2805_v61  ;;  %3015 = vmatprep.subr.mxu1 %v2869_v33 }
 0x5eb   :  { %2939 = vmatpush2.msra.mxu0 %v2804_v62  ;;  %3016 = vmatpush2.msra.mxu1 %v2868_v42 }
 0x5ec   :  { %2940 = vmatprep.subr.mxu0 %v2803_v63  ;;  %3017 = vmatprep.subr.mxu1 %v2867_v9 }
 0x5ed   :  { %2941 = vmatpush2.msra.mxu0 %v2802_v11  ;;  %3018 = vmatpush2.msra.mxu1 %v2866_v13 }
 0x5ee   :  { %2942 = vmatprep.subr.mxu0 %v2801_v38  ;;  %3019 = vmatprep.subr.mxu1 %v2865_v0 }
 0x5ef   :  { %2943 = vmatpush2.msra.mxu0 %v2800_v35  ;;  %3020 = vmatpush2.msra.mxu1 %v2864_v4 }
 0x5f0   :  { %2944 = vmatprep.subr.mxu0 %v2799_v5  ;;  %3021 = vmatprep.subr.mxu1 %v2863_v10 }
 0x5f1   :  { %2945 = vmatpush2.msra.mxu0 %v2798_v26  ;;  %3022 = vmatpush2.msra.mxu1 %v2862_v27 }
 0x5f2   :  { %2946 = vmatprep.subr.mxu0 %v2797_v41  ;;  %3023 = vmatprep.subr.mxu1 %v2861_v34  ;;  %v3235_v34 = vld [vmem:[#allocation11 + $0xcc8] sm:$0xff] }
 0x5f3   :  { %2947 = vmatpush2.msra.mxu0 %v2796_v45  ;;  %3024 = vmatpush2.msra.mxu1 %v2860_v36  ;;  %v3299_v45 = vld [vmem:[#allocation11 + $0xec8] sm:$0xff]  ;;  %v3234_v36 = vld [vmem:[#allocation11 + $0xcc0] sm:$0xff] }
 0x5f4   :  { %2948 = vmatprep.subr.mxu0 %v2795_v49  ;;  %3025 = vmatprep.subr.mxu1 %v2859_v53  ;;  %v3298_v49 = vld [vmem:[#allocation11 + $0xec0] sm:$0xff]  ;;  %v3233_v53 = vld [vmem:[#allocation11 + $0xcb8] sm:$0xff] }
 0x5f5   :  { %2949 = vmatpush2.msra.mxu0 %v2794_v39  ;;  %3026 = vmatpush2.msra.mxu1 %v2858_v43  ;;  %v3297_v39 = vld [vmem:[#allocation11 + $0xeb8] sm:$0xff]  ;;  %v3232_v43 = vld [vmem:[#allocation11 + $0xcb0] sm:$0xff] }
 0x5f6   :  { %2950 = vmatprep.subr.mxu0 %v2793_v56  ;;  %3027 = vmatprep.subr.mxu1 %v2857_v60  ;;  %v3296_v56 = vld [vmem:[#allocation11 + $0xeb0] sm:$0xff]  ;;  %v3231_v60 = vld [vmem:[#allocation11 + $0xca8] sm:$0xff] }
 0x5f7   :  { %2951 = vmatpush2.msra.mxu0 %v2792_v3  ;;  %3028 = vmatpush2.msra.mxu1 %v2856_v46  ;;  %v3295_v3 = vld [vmem:[#allocation11 + $0xea8] sm:$0xff]  ;;  %v3230_v46 = vld [vmem:[#allocation11 + $0xca0] sm:$0xff] }
 0x5f8   :  { %3079 = vmatprep.subr.mxu0 %v7472_v14  ;;  %3156 = vmatprep.subr.mxu1 %v7474_v48 }
 0x626   :  { %v2354_v47 = vpop.f32.mrf.mxu0  ;;  %v2431_v50 = vpop.f32.mrf.mxu1 }
 0x627   :  { %v2432_v51 = vadd.f32 %v2431_v50, %v2354_v47  ;;  %v3294_v47 = vld [vmem:[#allocation11 + $0xea0] sm:$0xff]  ;;  %v3229_v50 = vld [vmem:[#allocation11 + $0xc98] sm:$0xff] }
 0x628   :  { %v2356_v52 = vpop.f32.mrf.mxu0  ;;  %v2433_v54 = vpop.f32.mrf.mxu1 }
 0x629   :  { %v2434_v12 = vadd.f32 %v2433_v54, %v2356_v52  ;;  %v3228_v52 = vld [vmem:[#allocation11 + $0xc90] sm:$0xff] }
 0x62a   :  { %v3292_v54 = vld [vmem:[#allocation11 + $0xe90] sm:$0xff] }
 0x62c   :  { %v2360_v25 = vpop.f32.mrf.mxu0  ;;  %v2437_v29 = vpop.f32.mrf.mxu1 }
 0x62d   :  { %v2438_v31 = vadd.f32 %v2437_v29, %v2360_v25  ;;  %v3291_v25 = vld [vmem:[#allocation11 + $0xe88] sm:$0xff]  ;;  %v3226_v29 = vld [vmem:[#allocation11 + $0xc80] sm:$0xff] }
 0x62e   :  { %v2362_v37 = vpop.f32.mrf.mxu0  ;;  %v2439_v28 = vpop.f32.mrf.mxu1 }
 0x62f   :  { %v2440_v55 = vadd.f32 %v2439_v28, %v2362_v37  ;;  %v3225_v37 = vld [vmem:[#allocation11 + $0xc78] sm:$0xff] }
 0x630   :  { %v3289_v28 = vld [vmem:[#allocation11 + $0xe78] sm:$0xff] }
 0x669   :  { %v2508_v40 = vpop.f32.mrf.mxu0  ;;  %v2585_v57 = vpop.f32.mrf.mxu1 }
 0x66a   :  { %v2509_v58 = vadd.f32 %v2508_v40, %v2432_v51  ;;  %v3293_v51 = vld [vmem:[#allocation11 + $0xe98] sm:$0xff]  ;;  %v3288_v40 = vld [vmem:[#allocation11 + $0xe70] sm:$0xff] }
 0x66b   :  { %v2510_v44 = vpop.f32.mrf.mxu0  ;;  %v2587_v59 = vpop.f32.mrf.mxu1 }
 0x66c   :  { %v7594_v14 = vadd.f32 %v2585_v57, %v2509_v58  ;;  %v2511_v48 = vadd.f32 %v2510_v44, %v2434_v12  ;;  %v3227_v12 = vld [vmem:[#allocation11 + $0xc88] sm:$0xff]  ;;  %v3222_v44 = vld [vmem:[#allocation11 + $0xc60] sm:$0xff] }
 0x66d   :  { %v3223_v57 = vld [vmem:[#allocation11 + $0xc68] sm:$0xff] }
 0x66e   :  { %v7596_v61 = vadd.f32 %v2587_v59, %v2511_v48  ;;  %v3287_v58 = vld [vmem:[#allocation11 + $0xe68] sm:$0xff]  ;;  %v3286_v59 = vld [vmem:[#allocation11 + $0xe60] sm:$0xff]  ;;  %v3221_v48 = vld [vmem:[#allocation11 + $0xc58] sm:$0xff] }
 0x66f   :  { %v2514_v33 = vpop.f32.mrf.mxu0  ;;  %v2591_v62 = vpop.f32.mrf.mxu1 }
 0x670   :  { %v2515_v42 = vadd.f32 %v2514_v33, %v2438_v31  ;;  %v3290_v31 = vld [vmem:[#allocation11 + $0xe80] sm:$0xff]  ;;  %v3285_v33 = vld [vmem:[#allocation11 + $0xe58] sm:$0xff] }
 0x671   :  { %v2516_v63 = vpop.f32.mrf.mxu0  ;;  %v2593_v9 = vpop.f32.mrf.mxu1 }
 0x672   :  { %v7598_v11 = vadd.f32 %v2591_v62, %v2515_v42  ;;  %v2517_v13 = vadd.f32 %v2516_v63, %v2440_v55  ;;  %v3224_v55 = vld [vmem:[#allocation11 + $0xc70] sm:$0xff]  ;;  %v3219_v63 = vld [vmem:[#allocation11 + $0xc48] sm:$0xff] }
 0x673   :  { %v3220_v62 = vld [vmem:[#allocation11 + $0xc50] sm:$0xff] }
 0x674   :  { %v7600_v38 = vadd.f32 %v2593_v9, %v2517_v13  ;;  %v3284_v42 = vld [vmem:[#allocation11 + $0xe50] sm:$0xff]  ;;  %v3283_v9 = vld [vmem:[#allocation11 + $0xe48] sm:$0xff]  ;;  %v3218_v13 = vld [vmem:[#allocation11 + $0xc40] sm:$0xff] }
 0x675   :  { %v2671_v0 = vpop.f32.mrf.mxu0  ;;  %v2748_v35 = vpop.f32.mrf.mxu1 }
 0x677   :  { %v2673_v4 = vpop.f32.mrf.mxu0  ;;  %v2750_v5 = vpop.f32.mrf.mxu1 }
 0x678   :  { %2952 = vmatprep.mubr.f32.mxu0 %v2673_v4  ;;  %3029 = vmatprep.mubr.f32.mxu1 %v2750_v5  ;;  %v3281_v4 = vld [vmem:[#allocation11 + $0xe38] sm:$0xff]  ;;  %v3216_v5 = vld [vmem:[#allocation11 + $0xc30] sm:$0xff] }
 0x679   :  { %2953 = vmatmul.mubr.f32.vlgmr.msra.gmra.mxu0 %v2671_v0  ;;  %3030 = vmatmul.mubr.f32.vlgmr.msra.gmra.mxu1 %v2748_v35  ;;  %v3282_v0 = vld [vmem:[#allocation11 + $0xe40] sm:$0xff]  ;;  %v3217_v35 = vld [vmem:[#allocation11 + $0xc38] sm:$0xff] }
 0x67a   :  { %3080 = vmatpush1.msra.mxu0 %v7476_v1  ;;  %3157 = vmatpush1.msra.mxu1 %v7478_v2  ;;  %v3047_v1 = vld [vmem:[#allocation10 + $0x30] sm:$0xff]  ;;  %v3241_v2 = vld [vmem:[#allocation11 + $0xcf8] sm:$0xff] }
 0x67b   :  { %v2677_v10 = vpop.f32.mrf.mxu0  ;;  %v2754_v26 = vpop.f32.mrf.mxu1  ;;  %3081 = vmatprep.subr.mxu0 %v7480_v7  ;;  %3158 = vmatprep.subr.mxu1 %v7482_v30  ;;  %v3305_v7 = vld [vmem:[#allocation11 + $0xef8] sm:$0xff]  ;;  %v3240_v30 = vld [vmem:[#allocation11 + $0xcf0] sm:$0xff] }
 0x67c   :  { %3082 = vmatpush1.msra.mxu0 %v7486_v16  ;;  %3159 = vmatpush1.msra.mxu1 %v7488_v17  ;;  %v3304_v16 = vld [vmem:[#allocation11 + $0xef0] sm:$0xff]  ;;  %v3048_v17 = vld [vmem:[#allocation10 + $0x38] sm:$0xff] }
 0x67d   :  { %v2679_v27 = vpop.f32.mrf.mxu0  ;;  %v2756_v41 = vpop.f32.mrf.mxu1  ;;  %3083 = vmatprep.subr.mxu0 %v7492_v18  ;;  %3160 = vmatprep.subr.mxu1 %v7494_v8  ;;  %v3239_v18 = vld [vmem:[#allocation11 + $0xce8] sm:$0xff] }
 0x67e   :  { %2958 = vmatprep.mubr.f32.mxu0 %v2679_v27  ;;  %3035 = vmatprep.mubr.f32.mxu1 %v2756_v41  ;;  %v3303_v8 = vld [vmem:[#allocation11 + $0xee8] sm:$0xff]  ;;  %v3214_v41 = vld [vmem:[#allocation11 + $0xc20] sm:$0xff] }
 0x67f   :  { %2959 = vmatmul.mubr.f32.gmra.mxu0 %v2677_v10  ;;  %3036 = vmatmul.mubr.f32.gmra.mxu1 %v2754_v26  ;;  %v3280_v10 = vld [vmem:[#allocation11 + $0xe30] sm:$0xff]  ;;  %v3215_v26 = vld [vmem:[#allocation11 + $0xc28] sm:$0xff] }
 0x680   :  { %3084 = vmatpush1.msra.mxu0 %v7498_v19  ;;  %3161 = vmatpush1.msra.mxu1 %v7500_v20  ;;  %v3238_v19 = vld [vmem:[#allocation11 + $0xce0] sm:$0xff]  ;;  %v3279_v27 = vld [vmem:[#allocation11 + $0xe28] sm:$0xff] }
 0x681   :  { %3085 = vmatprep.subr.mxu0 %v7504_v21  ;;  %3162 = vmatprep.subr.mxu1 %v7506_v22  ;;  %v3302_v20 = vld [vmem:[#allocation11 + $0xee0] sm:$0xff]  ;;  %v3237_v21 = vld [vmem:[#allocation11 + $0xcd8] sm:$0xff] }
 0x682   :  { %3086 = vmatpush1.msra.mxu0 %v7510_v23  ;;  %3163 = vmatpush1.msra.mxu1 %v7512_v24  ;;  %v3301_v22 = vld [vmem:[#allocation11 + $0xed8] sm:$0xff]  ;;  %v3236_v23 = vld [vmem:[#allocation11 + $0xcd0] sm:$0xff] }
 0x683   :  { %3119 = vmatprep.mubr.f32.mxu0 %v6981_v32  ;;  %3196 = vmatprep.mubr.f32.mxu1 %v6981_v32  ;;  %v3300_v24 = vld [vmem:[#allocation11 + $0xed0] sm:$0xff] }
 0x684   :  { %5955 = vmatmul.mubr.msk.f32.vlgmr.msra.gmra.mxu0 %vm621_vm1, %v3047_v1  ;;  %5957 = vmatmul.mubr.msk.f32.vlgmr.msra.gmra.mxu1 %vm621_vm1, %v3047_v1  ;;  %v3278_v1 = vld [vmem:[#allocation11 + $0xe20] sm:$0xff] }
 0x685   :  { %3125 = vmatprep.mubr.f32.mxu0 %v6981_v32  ;;  %3202 = vmatprep.mubr.f32.mxu1 %v6981_v32 }
 0x686   :  { %3338 = vmatprep.subr.mxu0 %v3241_v2  ;;  %3415 = vmatprep.subr.mxu1 %v3305_v7  ;;  %v3213_v2 = vld [vmem:[#allocation11 + $0xc18] sm:$0xff] }
 0x687   :  { %3339 = vmatpush1.msra.mxu0 %v3240_v30  ;;  %3416 = vmatpush1.msra.mxu1 %v3304_v16  ;;  %v3277_v7 = vld [vmem:[#allocation11 + $0xe18] sm:$0xff]  ;;  %v3212_v30 = vld [vmem:[#allocation11 + $0xc10] sm:$0xff] }
 0x688   :  { %5956 = vmatmul.mubr.msk.f32.gmra.mxu0 %vm621_vm1, %v3048_v17  ;;  %5958 = vmatmul.mubr.msk.f32.gmra.mxu1 %vm621_vm1, %v3048_v17  ;;  %v3276_v16 = vld [vmem:[#allocation11 + $0xe10] sm:$0xff]  ;;  %v3211_v17 = vld [vmem:[#allocation11 + $0xc08] sm:$0xff] }
 0x689   :  { %3340 = vmatprep.subr.mxu0 %v3239_v18  ;;  %3417 = vmatprep.subr.mxu1 %v3303_v8  ;;  %v3275_v18 = vld [vmem:[#allocation11 + $0xe08] sm:$0xff]  ;;  %v3210_v8 = vld [vmem:[#allocation11 + $0xc00] sm:$0xff] }
 0x68a   :  { %3341 = vmatpush1.msra.mxu0 %v3238_v19  ;;  %3418 = vmatpush1.msra.mxu1 %v3302_v20  ;;  %v3274_v19 = vld [vmem:[#allocation11 + $0xe00] sm:$0xff]  ;;  %v3273_v20 = vld [vmem:[#allocation11 + $0xdf8] sm:$0xff] }
 0x68b   :  { %3342 = vmatprep.subr.mxu0 %v3237_v21  ;;  %3419 = vmatprep.subr.mxu1 %v3301_v22  ;;  %v3337_v21 = vld [vmem:[#allocation11 + $0xff8] sm:$0xff]  ;;  %v3272_v22 = vld [vmem:[#allocation11 + $0xdf0] sm:$0xff] }
 0x68c   :  { %3343 = vmatpush1.msra.mxu0 %v3236_v23  ;;  %3420 = vmatpush1.msra.mxu1 %v3300_v24  ;;  %v3336_v23 = vld [vmem:[#allocation11 + $0xff0] sm:$0xff]  ;;  %v3271_v24 = vld [vmem:[#allocation11 + $0xde8] sm:$0xff] }
 0x68d   :  { %3344 = vmatprep.subr.mxu0 %v3235_v34  ;;  %3421 = vmatprep.subr.mxu1 %v3299_v45  ;;  %v3335_v34 = vld [vmem:[#allocation11 + $0xfe8] sm:$0xff]  ;;  %v3270_v45 = vld [vmem:[#allocation11 + $0xde0] sm:$0xff] }
 0x68e   :  { %3345 = vmatpush1.msra.mxu0 %v3234_v36  ;;  %3422 = vmatpush1.msra.mxu1 %v3298_v49  ;;  %v3334_v36 = vld [vmem:[#allocation11 + $0xfe0] sm:$0xff]  ;;  %v3269_v49 = vld [vmem:[#allocation11 + $0xdd8] sm:$0xff] }
 0x68f   :  { %3346 = vmatprep.subr.mxu0 %v3233_v53  ;;  %3423 = vmatprep.subr.mxu1 %v3297_v39  ;;  %v3333_v53 = vld [vmem:[#allocation11 + $0xfd8] sm:$0xff]  ;;  %v3268_v39 = vld [vmem:[#allocation11 + $0xdd0] sm:$0xff] }
 0x690   :  { %3347 = vmatpush1.msra.mxu0 %v3232_v43  ;;  %3424 = vmatpush1.msra.mxu1 %v3296_v56  ;;  %v3332_v43 = vld [vmem:[#allocation11 + $0xfd0] sm:$0xff]  ;;  %v3267_v56 = vld [vmem:[#allocation11 + $0xdc8] sm:$0xff] }
 0x691   :  { %3348 = vmatprep.subr.mxu0 %v3231_v60  ;;  %3425 = vmatprep.subr.mxu1 %v3295_v3  ;;  %v3331_v60 = vld [vmem:[#allocation11 + $0xfc8] sm:$0xff]  ;;  %v3266_v3 = vld [vmem:[#allocation11 + $0xdc0] sm:$0xff] }
 0x692   :  { %3349 = vmatpush1.msra.mxu0 %v3230_v46  ;;  %3426 = vmatpush1.msra.mxu1 %v3294_v47  ;;  %v3330_v46 = vld [vmem:[#allocation11 + $0xfc0] sm:$0xff]  ;;  %v3265_v47 = vld [vmem:[#allocation11 + $0xdb8] sm:$0xff] }
 0x693   :  { %3350 = vmatprep.subr.mxu0 %v3229_v50  ;;  %3427 = vmatprep.subr.mxu1 %v3293_v51  ;;  %v3329_v50 = vld [vmem:[#allocation11 + $0xfb8] sm:$0xff]  ;;  %v3264_v51 = vld [vmem:[#allocation11 + $0xdb0] sm:$0xff] }
 0x694   :  { %3351 = vmatpush1.msra.mxu0 %v3228_v52  ;;  %3428 = vmatpush1.msra.mxu1 %v3292_v54  ;;  %v3328_v52 = vld [vmem:[#allocation11 + $0xfb0] sm:$0xff]  ;;  %v3263_v54 = vld [vmem:[#allocation11 + $0xda8] sm:$0xff] }
 0x695   :  { %3352 = vmatprep.subr.mxu0 %v3227_v12  ;;  %3429 = vmatprep.subr.mxu1 %v3291_v25  ;;  %v3327_v12 = vld [vmem:[#allocation11 + $0xfa8] sm:$0xff]  ;;  %v3262_v25 = vld [vmem:[#allocation11 + $0xda0] sm:$0xff] }
 0x696   :  { %3353 = vmatpush1.msra.mxu0 %v3226_v29  ;;  %3430 = vmatpush1.msra.mxu1 %v3290_v31  ;;  %v3326_v29 = vld [vmem:[#allocation11 + $0xfa0] sm:$0xff]  ;;  %v3261_v31 = vld [vmem:[#allocation11 + $0xd98] sm:$0xff] }
 0x697   :  { %3354 = vmatprep.subr.mxu0 %v3225_v37  ;;  %3431 = vmatprep.subr.mxu1 %v3289_v28  ;;  %v3325_v37 = vld [vmem:[#allocation11 + $0xf98] sm:$0xff]  ;;  %v3260_v28 = vld [vmem:[#allocation11 + $0xd90] sm:$0xff] }
 0x698   :  { %3355 = vmatpush1.msra.mxu0 %v3224_v55  ;;  %3432 = vmatpush1.msra.mxu1 %v3288_v40  ;;  %v3324_v55 = vld [vmem:[#allocation11 + $0xf90] sm:$0xff]  ;;  %v3259_v40 = vld [vmem:[#allocation11 + $0xd88] sm:$0xff] }
 0x699   :  { %3356 = vmatprep.subr.mxu0 %v3223_v57  ;;  %3433 = vmatprep.subr.mxu1 %v3287_v58  ;;  %v3323_v57 = vld [vmem:[#allocation11 + $0xf88] sm:$0xff]  ;;  %v3258_v58 = vld [vmem:[#allocation11 + $0xd80] sm:$0xff] }
 0x69a   :  { %3357 = vmatpush1.msra.mxu0 %v3222_v44  ;;  %3434 = vmatpush1.msra.mxu1 %v3286_v59  ;;  %v3322_v44 = vld [vmem:[#allocation11 + $0xf80] sm:$0xff]  ;;  %v3257_v59 = vld [vmem:[#allocation11 + $0xd78] sm:$0xff] }
 0x69b   :  { %3358 = vmatprep.subr.mxu0 %v3221_v48  ;;  %3435 = vmatprep.subr.mxu1 %v3285_v33  ;;  %v3321_v48 = vld [vmem:[#allocation11 + $0xf78] sm:$0xff]  ;;  %v3256_v33 = vld [vmem:[#allocation11 + $0xd70] sm:$0xff] }
 0x69c   :  { %3359 = vmatpush1.msra.mxu0 %v3220_v62  ;;  %3436 = vmatpush1.msra.mxu1 %v3284_v42  ;;  %v3320_v62 = vld [vmem:[#allocation11 + $0xf70] sm:$0xff]  ;;  %v3255_v42 = vld [vmem:[#allocation11 + $0xd68] sm:$0xff] }
 0x69d   :  { %3360 = vmatprep.subr.mxu0 %v3219_v63  ;;  %3437 = vmatprep.subr.mxu1 %v3283_v9  ;;  %v3319_v63 = vld [vmem:[#allocation11 + $0xf68] sm:$0xff]  ;;  %v3254_v9 = vld [vmem:[#allocation11 + $0xd60] sm:$0xff] }
 0x69e   :  { %3361 = vmatpush1.msra.mxu0 %v3218_v13  ;;  %3438 = vmatpush1.msra.mxu1 %v3282_v0  ;;  %v3318_v13 = vld [vmem:[#allocation11 + $0xf60] sm:$0xff]  ;;  %v3253_v0 = vld [vmem:[#allocation11 + $0xd58] sm:$0xff] }
 0x69f   :  { %3362 = vmatprep.subr.mxu0 %v3217_v35  ;;  %3439 = vmatprep.subr.mxu1 %v3281_v4  ;;  %v3317_v35 = vld [vmem:[#allocation11 + $0xf58] sm:$0xff]  ;;  %v3252_v4 = vld [vmem:[#allocation11 + $0xd50] sm:$0xff] }
 0x6a0   :  { %3363 = vmatpush1.msra.mxu0 %v3216_v5  ;;  %3440 = vmatpush1.msra.mxu1 %v3280_v10  ;;  %v3316_v5 = vld [vmem:[#allocation11 + $0xf50] sm:$0xff]  ;;  %v3251_v10 = vld [vmem:[#allocation11 + $0xd48] sm:$0xff] }
 0x6a1   :  { %3364 = vmatprep.subr.mxu0 %v3215_v26  ;;  %3441 = vmatprep.subr.mxu1 %v3279_v27  ;;  %v3315_v26 = vld [vmem:[#allocation11 + $0xf48] sm:$0xff]  ;;  %v3250_v27 = vld [vmem:[#allocation11 + $0xd40] sm:$0xff] }
 0x6a2   :  { %3365 = vmatpush1.msra.mxu0 %v3214_v41  ;;  %3442 = vmatpush1.msra.mxu1 %v3278_v1  ;;  %v3314_v41 = vld [vmem:[#allocation11 + $0xf40] sm:$0xff]  ;;  %v3249_v1 = vld [vmem:[#allocation11 + $0xd38] sm:$0xff] }
 0x6a3   :  { %3366 = vmatprep.subr.mxu0 %v3213_v2  ;;  %3443 = vmatprep.subr.mxu1 %v3277_v7  ;;  %v3313_v2 = vld [vmem:[#allocation11 + $0xf38] sm:$0xff]  ;;  %v3248_v7 = vld [vmem:[#allocation11 + $0xd30] sm:$0xff] }
 0x6a4   :  { %3367 = vmatpush1.msra.mxu0 %v3212_v30  ;;  %3444 = vmatpush1.msra.mxu1 %v3276_v16  ;;  %v3312_v30 = vld [vmem:[#allocation11 + $0xf30] sm:$0xff]  ;;  %v3247_v16 = vld [vmem:[#allocation11 + $0xd28] sm:$0xff] }
 0x6a5   :  { %3368 = vmatprep.subr.mxu0 %v3211_v17  ;;  %3445 = vmatprep.subr.mxu1 %v3275_v18  ;;  %v3311_v17 = vld [vmem:[#allocation11 + $0xf28] sm:$0xff]  ;;  %v3246_v18 = vld [vmem:[#allocation11 + $0xd20] sm:$0xff] }
 0x6a6   :  { %3369 = vmatpush1.msra.mxu0 %v3210_v8  ;;  %3446 = vmatpush1.msra.mxu1 %v3274_v19  ;;  %v3310_v8 = vld [vmem:[#allocation11 + $0xf20] sm:$0xff]  ;;  %v3245_v19 = vld [vmem:[#allocation11 + $0xd18] sm:$0xff] }
 0x6a7   :  { %3370 = vmatprep.subr.mxu0 %v3273_v20  ;;  %3447 = vmatprep.subr.mxu1 %v3337_v21  ;;  %v3309_v20 = vld [vmem:[#allocation11 + $0xf18] sm:$0xff]  ;;  %v3244_v21 = vld [vmem:[#allocation11 + $0xd10] sm:$0xff] }
 0x6a8   :  { %3371 = vmatpush2.msra.mxu0 %v3272_v22  ;;  %3448 = vmatpush2.msra.mxu1 %v3336_v23  ;;  %v3308_v22 = vld [vmem:[#allocation11 + $0xf10] sm:$0xff]  ;;  %v3243_v23 = vld [vmem:[#allocation11 + $0xd08] sm:$0xff] }
 0x6a9   :  { %3372 = vmatprep.subr.mxu0 %v3271_v24  ;;  %3449 = vmatprep.subr.mxu1 %v3335_v34  ;;  %v3307_v24 = vld [vmem:[#allocation11 + $0xf08] sm:$0xff]  ;;  %v3242_v34 = vld [vmem:[#allocation11 + $0xd00] sm:$0xff] }
 0x6aa   :  { %3373 = vmatpush2.msra.mxu0 %v3270_v45  ;;  %3450 = vmatpush2.msra.mxu1 %v3334_v36  ;;  %v3306_v45 = vld [vmem:[#allocation11 + $0xf00] sm:$0xff] }
 0x6ab   :  { %3374 = vmatprep.subr.mxu0 %v3269_v49  ;;  %3451 = vmatprep.subr.mxu1 %v3333_v53 }
 0x6ac   :  { %3375 = vmatpush2.msra.mxu0 %v3268_v39  ;;  %3452 = vmatpush2.msra.mxu1 %v3332_v43 }
 0x6ad   :  { %3376 = vmatprep.subr.mxu0 %v3267_v56  ;;  %3453 = vmatprep.subr.mxu1 %v3331_v60 }
 0x6ae   :  { %3377 = vmatpush2.msra.mxu0 %v3266_v3  ;;  %3454 = vmatpush2.msra.mxu1 %v3330_v46 }
 0x6af   :  { %3378 = vmatprep.subr.mxu0 %v3265_v47  ;;  %3455 = vmatprep.subr.mxu1 %v3329_v50 }
 0x6b0   :  { %3379 = vmatpush2.msra.mxu0 %v3264_v51  ;;  %3456 = vmatpush2.msra.mxu1 %v3328_v52 }
 0x6b1   :  { %3380 = vmatprep.subr.mxu0 %v3263_v54  ;;  %3457 = vmatprep.subr.mxu1 %v3327_v12 }
 0x6b2   :  { %3381 = vmatpush2.msra.mxu0 %v3262_v25  ;;  %3458 = vmatpush2.msra.mxu1 %v3326_v29 }
 0x6b3   :  { %3382 = vmatprep.subr.mxu0 %v3261_v31  ;;  %3459 = vmatprep.subr.mxu1 %v3325_v37 }
 0x6b4   :  { %3383 = vmatpush2.msra.mxu0 %v3260_v28  ;;  %3460 = vmatpush2.msra.mxu1 %v3324_v55 }
 0x6b5   :  { %3384 = vmatprep.subr.mxu0 %v3259_v40  ;;  %3461 = vmatprep.subr.mxu1 %v3323_v57  ;;  %v3621_v57 = vld [vmem:[#allocation16 + $0xe8] sm:$0xff] }
 0x6b6   :  { %3385 = vmatpush2.msra.mxu0 %v3258_v58  ;;  %3462 = vmatpush2.msra.mxu1 %v3322_v44  ;;  %v3620_v58 = vld [vmem:[#allocation16 + $0xe0] sm:$0xff]  ;;  %v3619_v44 = vld [vmem:[#allocation16 + $0xd8] sm:$0xff] }
 0x6b7   :  { %3386 = vmatprep.subr.mxu0 %v3257_v59  ;;  %3463 = vmatprep.subr.mxu1 %v3321_v48  ;;  %v3618_v59 = vld [vmem:[#allocation16 + $0xd0] sm:$0xff]  ;;  %v3617_v48 = vld [vmem:[#allocation16 + $0xc8] sm:$0xff] }
 0x6b8   :  { %3387 = vmatpush2.msra.mxu0 %v3256_v33  ;;  %3464 = vmatpush2.msra.mxu1 %v3320_v62  ;;  %v3616_v33 = vld [vmem:[#allocation16 + $0xc0] sm:$0xff]  ;;  %v3615_v62 = vld [vmem:[#allocation16 + $0xb8] sm:$0xff] }
 0x6b9   :  { %3388 = vmatprep.subr.mxu0 %v3255_v42  ;;  %3465 = vmatprep.subr.mxu1 %v3319_v63  ;;  %v3614_v42 = vld [vmem:[#allocation16 + $0xb0] sm:$0xff]  ;;  %v3613_v63 = vld [vmem:[#allocation16 + $0xa8] sm:$0xff] }
 0x6ba   :  { %3389 = vmatpush2.msra.mxu0 %v3254_v9  ;;  %3466 = vmatpush2.msra.mxu1 %v3318_v13  ;;  %v3612_v9 = vld [vmem:[#allocation16 + $0xa0] sm:$0xff]  ;;  %v3611_v13 = vld [vmem:[#allocation16 + $0x98] sm:$0xff] }
 0x6bb   :  { %3390 = vmatprep.subr.mxu0 %v3253_v0  ;;  %3467 = vmatprep.subr.mxu1 %v3317_v35  ;;  %v3610_v0 = vld [vmem:[#allocation16 + $0x90] sm:$0xff]  ;;  %v3609_v35 = vld [vmem:[#allocation16 + $0x88] sm:$0xff] }
 0x6bc   :  { %3391 = vmatpush2.msra.mxu0 %v3252_v4  ;;  %3468 = vmatpush2.msra.mxu1 %v3316_v5  ;;  %v3608_v4 = vld [vmem:[#allocation16 + $0x80] sm:$0xff]  ;;  %v3607_v5 = vld [vmem:[#allocation16 + $0x78] sm:$0xff] }
 0x6bd   :  { %3392 = vmatprep.subr.mxu0 %v3251_v10  ;;  %3469 = vmatprep.subr.mxu1 %v3315_v26  ;;  %v3606_v10 = vld [vmem:[#allocation16 + $0x70] sm:$0xff]  ;;  %v3605_v26 = vld [vmem:[#allocation16 + $0x68] sm:$0xff] }
 0x6be   :  { %3393 = vmatpush2.msra.mxu0 %v3250_v27  ;;  %3470 = vmatpush2.msra.mxu1 %v3314_v41  ;;  %v3604_v27 = vld [vmem:[#allocation16 + $0x60] sm:$0xff]  ;;  %v3603_v41 = vld [vmem:[#allocation16 + $0x58] sm:$0xff] }
 0x6bf   :  { %3394 = vmatprep.subr.mxu0 %v3249_v1  ;;  %3471 = vmatprep.subr.mxu1 %v3313_v2  ;;  %v3602_v1 = vld [vmem:[#allocation16 + $0x50] sm:$0xff]  ;;  %v3601_v2 = vld [vmem:[#allocation16 + $0x48] sm:$0xff] }
 0x6c0   :  { %3395 = vmatpush2.msra.mxu0 %v3248_v7  ;;  %3472 = vmatpush2.msra.mxu1 %v3312_v30  ;;  %v3600_v7 = vld [vmem:[#allocation16 + $0x40] sm:$0xff]  ;;  %v3599_v30 = vld [vmem:[#allocation16 + $0x38] sm:$0xff] }
 0x6c1   :  { %3396 = vmatprep.subr.mxu0 %v3247_v16  ;;  %3473 = vmatprep.subr.mxu1 %v3311_v17  ;;  %v3598_v16 = vld [vmem:[#allocation16 + $0x30] sm:$0xff]  ;;  %v3597_v17 = vld [vmem:[#allocation16 + $0x28] sm:$0xff] }
 0x6c2   :  { %3397 = vmatpush2.msra.mxu0 %v3246_v18  ;;  %3474 = vmatpush2.msra.mxu1 %v3310_v8  ;;  %v3596_v18 = vld [vmem:[#allocation16 + $0x20] sm:$0xff]  ;;  %v3595_v8 = vld [vmem:[#allocation16 + $0x18] sm:$0xff] }
 0x6c3   :  { %3398 = vmatprep.subr.mxu0 %v3245_v19  ;;  %3475 = vmatprep.subr.mxu1 %v3309_v20  ;;  %v3594_v19 = vld [vmem:[#allocation16 + $0x10] sm:$0xff]  ;;  %v3593_v20 = vld [vmem:[#allocation16 + $0x8] sm:$0xff] }
 0x6c4   :  { %3399 = vmatpush2.msra.mxu0 %v3244_v21  ;;  %3476 = vmatpush2.msra.mxu1 %v3308_v22  ;;  %v3592_v21 = vld [vmem:[#allocation16] sm:$0xff]  ;;  %v3655_v22 = vld [vmem:[#allocation16 + $0x1f8] sm:$0xff] }
 0x6c5   :  { %3400 = vmatprep.subr.mxu0 %v3243_v23  ;;  %3477 = vmatprep.subr.mxu1 %v3307_v24  ;;  %v3654_v23 = vld [vmem:[#allocation16 + $0x1f0] sm:$0xff]  ;;  %v3653_v24 = vld [vmem:[#allocation16 + $0x1e8] sm:$0xff] }
 0x6c6   :  { %3401 = vmatpush2.msra.mxu0 %v3242_v34  ;;  %3478 = vmatpush2.msra.mxu1 %v3306_v45  ;;  %v3652_v34 = vld [vmem:[#allocation16 + $0x1e0] sm:$0xff]  ;;  %v3651_v45 = vld [vmem:[#allocation16 + $0x1d8] sm:$0xff] }
 0x739   :  { %v2954_v36 = vpop.f32.mrf.mxu0  ;;  %v3031_v49 = vpop.f32.mrf.mxu1 }
 0x73a   :  { %v3032_v53 = vadd.f32 %v3031_v49, %v2954_v36  ;;  %v3650_v36 = vld [vmem:[#allocation16 + $0x1d0] sm:$0xff]  ;;  %v3649_v49 = vld [vmem:[#allocation16 + $0x1c8] sm:$0xff] }
 0x73b   :  { %v2956_v39 = vpop.f32.mrf.mxu0  ;;  %v3033_v43 = vpop.f32.mrf.mxu1 }
 0x73c   :  { %v7625_v56 = vadd.f32 %v3032_v53, %v7594_v14  ;;  %v3034_v60 = vadd.f32 %v3033_v43, %v2956_v39  ;;  %v3648_v53 = vld [vmem:[#allocation16 + $0x1c0] sm:$0xff]  ;;  %v3647_v39 = vld [vmem:[#allocation16 + $0x1b8] sm:$0xff]  ;;  %v3646_v43 = vld [vmem:[#allocation16 + $0x1b0] sm:$0xff] }
 0x73e   :  { %v7628_v3 = vadd.f32 %v3034_v60, %v7596_v61  ;;  %v3645_v60 = vld [vmem:[#allocation16 + $0x1a8] sm:$0xff] }
 0x73f   :  { %v2960_v46 = vpop.f32.mrf.mxu0  ;;  %v3037_v47 = vpop.f32.mrf.mxu1 }
 0x740   :  { %v3038_v50 = vadd.f32 %v3037_v47, %v2960_v46 }
 0x741   :  { %v2962_v51 = vpop.f32.mrf.mxu0  ;;  %v3039_v52 = vpop.f32.mrf.mxu1 }
 0x742   :  { %v7631_v54 = vadd.f32 %v3038_v50, %v7598_v11  ;;  %v3040_v12 = vadd.f32 %v3039_v52, %v2962_v51  ;;  %v3623_v11 = vld [vmem:[#allocation16 + $0xf8] sm:$0xff]  ;;  %v3644_v50 = vld [vmem:[#allocation16 + $0x1a0] sm:$0xff] }
 0x743   :  { %3868 = vmatprep.subr.mxu1 %v3623_v11  ;;  %v3643_v51 = vld [vmem:[#allocation16 + $0x198] sm:$0xff] }
 0x744   :  { %v7634_v25 = vadd.f32 %v3040_v12, %v7600_v38  ;;  %v3121_v29 = vpop.f32.mrf.mxu0  ;;  %v3198_v31 = vpop.f32.mrf.mxu1  ;;  %v3622_v38 = vld [vmem:[#allocation16 + $0xf0] sm:$0xff] }
 0x746   :  { %v3123_v14 = vpop.f32.mrf.mxu0  ;;  %v3200_v37 = vpop.f32.mrf.mxu1 }
 0x747   :  { %3402 = vmatprep.mubr.f32.mxu0 %v3123_v14  ;;  %3479 = vmatprep.mubr.f32.mxu1 %v3200_v37  ;;  %v3641_v14 = vld [vmem:[#allocation16 + $0x188] sm:$0xff] }
 0x748   :  { %v3127_v61 = vpop.f32.mrf.mxu0  ;;  %v3204_v28 = vpop.f32.mrf.mxu1  ;;  %3403 = vmatmul.mubr.f32.vlgmr.msra.gmra.mxu0 %v3121_v29  ;;  %3480 = vmatmul.mubr.f32.vlgmr.msra.gmra.mxu1 %v3198_v31  ;;  %v3642_v29 = vld [vmem:[#allocation16 + $0x190] sm:$0xff] }
 0x749   :  { %3869 = vmatpush1.msra.mxu1 %v3622_v38  ;;  %v3639_v38 = vld [vmem:[#allocation16 + $0x178] sm:$0xff] }
 0x74a   :  { %v3129_v55 = vpop.f32.mrf.mxu0  ;;  %v3206_v40 = vpop.f32.mrf.mxu1  ;;  %3870 = vmatprep.subr.mxu1 %v3621_v57 }
 0x74b   :  { %3408 = vmatprep.mubr.f32.mxu0 %v3129_v55  ;;  %3485 = vmatprep.mubr.f32.mxu1 %v3206_v40  ;;  %v3640_v55 = vld [vmem:[#allocation16 + $0x180] sm:$0xff]  ;;  %v3496_v40 = vld [vmem:[#allocation13] sm:$0x3] }
 0x74c   :  { %3409 = vmatmul.mubr.f32.gmra.mxu0 %v3127_v61  ;;  %3486 = vmatmul.mubr.f32.gmra.mxu1 %v3204_v28 }
 0x74d   :  { %3585 = vmatprep.mubr.f32.mxu0 %v6981_v32  ;;  %3871 = vmatpush1.msra.mxu1 %v3620_v58 }
 0x74e   :  { %3872 = vmatprep.subr.mxu1 %v3619_v44  ;;  %v3638_v44 = vld [vmem:[#allocation16 + $0x170] sm:$0xff] }
 0x74f   :  { %3873 = vmatpush1.msra.mxu1 %v3618_v59 }
 0x750   :  { %3874 = vmatprep.subr.mxu1 %v3617_v48  ;;  %v3505_v48 = vrot.slane %v3496_v40, %v7452_v15 }
 0x751   :  { %3875 = vmatpush1.msra.mxu1 %v3616_v33 }
 0x752   :  { %3876 = vmatprep.subr.mxu1 %v3615_v62 }
 0x753   :  { %3877 = vmatpush1.msra.mxu1 %v3614_v42  ;;  %v3637_v42 = vld [vmem:[#allocation16 + $0x168] sm:$0xff] }
 0x754   :  { %3878 = vmatprep.subr.mxu1 %v3613_v63 }
 0x755   :  { %3879 = vmatpush1.msra.mxu1 %v3612_v9  ;;  %v3501_v9 = vrot.slane %v3496_v40, %v7450_v6  ;;  %v3735_v40 = vld [vmem:[#allocation16 + $0x210] sm:$0xff] }
 0x756   :  { %3880 = vmatprep.subr.mxu1 %v3611_v13  ;;  %v3636_v13 = vld [vmem:[#allocation16 + $0x160] sm:$0xff] }
 0x757   :  { %3881 = vmatpush1.msra.mxu1 %v3610_v0 }
 0x758   :  { %3882 = vmatprep.subr.mxu1 %v3609_v35  ;;  %v3635_v35 = vld [vmem:[#allocation16 + $0x158] sm:$0xff] }
 0x759   :  { %3883 = vmatpush1.msra.mxu1 %v3608_v4 }
 0x75a   :  { %3884 = vmatprep.subr.mxu1 %v3607_v5 }
 0x75b   :  { %3885 = vmatpush1.msra.mxu1 %v3606_v10 }
 0x75c   :  { %3886 = vmatprep.subr.mxu1 %v3605_v26 }
 0x75d   :  { %3887 = vmatpush1.msra.mxu1 %v3604_v27  ;;  %v3632_v27 = vld [vmem:[#allocation16 + $0x140] sm:$0xff] }
 0x75e   :  { %3888 = vmatprep.subr.mxu1 %v3603_v41 }
 0x75f   :  { %3889 = vmatpush1.msra.mxu1 %v3602_v1 }
 0x760   :  { %3890 = vmatprep.subr.mxu1 %v3601_v2 }
 0x761   :  { %3891 = vmatpush1.msra.mxu1 %v3600_v7  ;;  %v3629_v7 = vld [vmem:[#allocation16 + $0x128] sm:$0xff] }
 0x762   :  { %3892 = vmatprep.subr.mxu1 %v3599_v30 }
 0x763   :  { %3893 = vmatpush1.msra.mxu1 %v3598_v16  ;;  %v3516_v16 = vld [vmem:[#allocation14] sm:$0xff] }
 0x764   :  { %3894 = vmatprep.subr.mxu1 %v3597_v17  ;;  %v3657_v17 = vld [vmem:[#allocation14 + $0x8] sm:$0xff] }
 0x765   :  { %3895 = vmatpush1.msra.mxu1 %v3596_v18  ;;  %v3764_v18 = vld [vmem:[#allocation16 + $0x2f8] sm:$0xff] }
 0x766   :  { %3896 = vmatprep.subr.mxu1 %v3595_v8  ;;  %v3763_v8 = vld [vmem:[#allocation16 + $0x2f0] sm:$0xff] }
 0x767   :  { %3897 = vmatpush1.msra.mxu1 %v3594_v19  ;;  %v3762_v19 = vld [vmem:[#allocation16 + $0x2e8] sm:$0xff] }
 0x768   :  { %3898 = vmatprep.subr.mxu1 %v3593_v20  ;;  %v3761_v20 = vld [vmem:[#allocation16 + $0x2e0] sm:$0xff] }
 0x769   :  { %3899 = vmatpush1.msra.mxu1 %v3592_v21  ;;  %v3760_v21 = vld [vmem:[#allocation16 + $0x2d8] sm:$0xff] }
 0x76a   :  { %3900 = vmatprep.subr.mxu1 %v3655_v22  ;;  %v3759_v22 = vld [vmem:[#allocation16 + $0x2d0] sm:$0xff] }
 0x76b   :  { %3901 = vmatpush2.msra.mxu1 %v3654_v23  ;;  %v3758_v23 = vld [vmem:[#allocation16 + $0x2c8] sm:$0xff] }
 0x76c   :  { %3902 = vmatprep.subr.mxu1 %v3653_v24  ;;  %v3757_v24 = vld [vmem:[#allocation16 + $0x2c0] sm:$0xff] }
 0x76d   :  { %3903 = vmatpush2.msra.mxu1 %v3652_v34  ;;  %v3756_v34 = vld [vmem:[#allocation16 + $0x2b8] sm:$0xff] }
 0x76e   :  { %3904 = vmatprep.subr.mxu1 %v3651_v45  ;;  %v3755_v45 = vld [vmem:[#allocation16 + $0x2b0] sm:$0xff] }
 0x76f   :  { %3905 = vmatpush2.msra.mxu1 %v3650_v36  ;;  %v3754_v36 = vld [vmem:[#allocation16 + $0x2a8] sm:$0xff] }
 0x770   :  { %3906 = vmatprep.subr.mxu1 %v3649_v49  ;;  %v3753_v49 = vld [vmem:[#allocation16 + $0x2a0] sm:$0xff] }
 0x771   :  { %3907 = vmatpush2.msra.mxu1 %v3648_v53  ;;  %v3752_v53 = vld [vmem:[#allocation16 + $0x298] sm:$0xff] }
 0x772   :  { %3908 = vmatprep.subr.mxu1 %v3647_v39  ;;  %v3751_v39 = vld [vmem:[#allocation16 + $0x290] sm:$0xff] }
 0x773   :  { %3909 = vmatpush2.msra.mxu1 %v3646_v43  ;;  %v3750_v43 = vld [vmem:[#allocation16 + $0x288] sm:$0xff] }
 0x774   :  { %3910 = vmatprep.subr.mxu1 %v3645_v60  ;;  %v3749_v60 = vld [vmem:[#allocation16 + $0x280] sm:$0xff] }
 0x775   :  { %3911 = vmatpush2.msra.mxu1 %v3644_v50  ;;  %v3746_v50 = vld [vmem:[#allocation16 + $0x268] sm:$0xff] }
 0x776   :  { %3912 = vmatprep.subr.mxu1 %v3643_v51  ;;  %v3745_v51 = vld [vmem:[#allocation16 + $0x260] sm:$0xff] }
 0x777   :  { %3913 = vmatpush2.msra.mxu1 %v3642_v29  ;;  %v3742_v29 = vld [vmem:[#allocation16 + $0x248] sm:$0xff] }
 0x778   :  { %3914 = vmatprep.subr.mxu1 %v3641_v14  ;;  %v3740_v14 = vld [vmem:[#allocation16 + $0x238] sm:$0xff] }
 0x779   :  { %3915 = vmatpush2.msra.mxu1 %v3640_v55  ;;  %v3736_v55 = vld [vmem:[#allocation16 + $0x218] sm:$0xff] }
 0x77a   :  { %3916 = vmatprep.subr.mxu1 %v3639_v38  ;;  %v3733_v38 = vld [vmem:[#allocation16 + $0x200] sm:$0xff] }
 0x77b   :  { %3917 = vmatpush2.msra.mxu1 %v3638_v44  ;;  %v3794_v44 = vld [vmem:[#allocation16 + $0x3e8] sm:$0xff] }
 0x77c   :  { %3918 = vmatprep.subr.mxu1 %v3637_v42  ;;  %v3789_v42 = vld [vmem:[#allocation16 + $0x3c0] sm:$0xff] }
 0x77d   :  { %3919 = vmatpush2.msra.mxu1 %v3636_v13  ;;  %v3786_v13 = vld [vmem:[#allocation16 + $0x3a8] sm:$0xff] }
 0x77e   :  { %3920 = vmatprep.subr.mxu1 %v3635_v35  ;;  %v3784_v35 = vld [vmem:[#allocation16 + $0x398] sm:$0xff] }
 0x808   :  { %v3404_v46 = vpop.f32.mrf.mxu0  ;;  %v3481_v47 = vpop.f32.mrf.mxu1 }
 0x809   :  { %v3482_v37 = vadd.f32 %v3481_v47, %v3404_v46  ;;  %v3748_v46 = vld [vmem:[#allocation16 + $0x278] sm:$0xff]  ;;  %v3747_v47 = vld [vmem:[#allocation16 + $0x270] sm:$0xff] }
 0x80a   :  { %v3406_v52 = vpop.f32.mrf.mxu0  ;;  %v3483_v12 = vpop.f32.mrf.mxu1 }
 0x80b   :  { %v3484_v31 = vadd.f32 %v3483_v12, %v3406_v52  ;;  %v3492_v63 = vadd.f32 %v3482_v37, %v7625_v56  ;;  %v3631_v56 = vld [vmem:[#allocation16 + $0x138] sm:$0xff]  ;;  %v3743_v12 = vld [vmem:[#allocation16 + $0x250] sm:$0xff] }
 0x80c   :  { %v3410_v61 = vpop.f32.mrf.mxu0  ;;  %v3487_v28 = vpop.f32.mrf.mxu1  ;;  %v3744_v52 = vld [vmem:[#allocation16 + $0x258] sm:$0xff]  ;;  %v3739_v37 = vld [vmem:[#allocation16 + $0x230] sm:$0xff] }
 0x80d   :  { %v3488_v11 = vadd.f32 %v3487_v28, %v3410_v61  ;;  %v3493_v59 = vadd.f32 %v3484_v31, %v7628_v3  ;;  %v3634_v3 = vld [vmem:[#allocation16 + $0x150] sm:$0xff]  ;;  %v3508_v26 = vadd.f32 %v3501_v9, %v3492_v63  ;;  %v3741_v31 = vld [vmem:[#allocation16 + $0x240] sm:$0xff]  ;;  %v3738_v61 = vld [vmem:[#allocation16 + $0x228] sm:$0xff] }
 0x80e   :  { %v3412_v57 = vpop.f32.mrf.mxu0  ;;  %v3489_v58 = vpop.f32.mrf.mxu1  ;;  %3921 = vmatpush2.msra.mxu1 %v3634_v3  ;;  %v3737_v28 = vld [vmem:[#allocation16 + $0x220] sm:$0xff]  ;;  %v3788_v63 = vld [vmem:[#allocation16 + $0x3b8] sm:$0xff]  ;;  %v3782_v3 = vld [vmem:[#allocation16 + $0x388] sm:$0xff] }
 0x80f   :  { %v3494_v33 = vadd.f32 %v3488_v11, %v7631_v54  ;;  %v3490_v62 = vadd.f32 %v3489_v58, %v3412_v57  ;;  %v3509_v5 = vadd.f32 %v3505_v48, %v3493_v59  ;;  %v3633_v54 = vld [vmem:[#allocation16 + $0x148] sm:$0xff]  ;;  %v7650_v30 = vmax.f32 %v3508_v26, 0.0  ;;  %v3796_v57 = vld [vmem:[#allocation16 + $0x3f8] sm:$0xff]  ;;  %v3795_v58 = vld [vmem:[#allocation16 + $0x3f0] sm:$0xff] }
 0x810   :  { %3922 = vmatprep.subr.mxu1 %v3633_v54  ;;  %v3734_v11 = vld [vmem:[#allocation16 + $0x208] sm:$0xff]  ;;  %v3793_v59 = vld [vmem:[#allocation16 + $0x3e0] sm:$0xff]  ;;  %v3779_v54 = vld [vmem:[#allocation16 + $0x370] sm:$0xff] }
 0x811   :  { %v3495_v0 = vadd.f32 %v3490_v62, %v7634_v25  ;;  %v3510_v4 = vadd.f32 %v3501_v9, %v3494_v33  ;;  %v3630_v25 = vld [vmem:[#allocation16 + $0x130] sm:$0xff]  ;;  %v7647_v2 = vmax.f32 %v3509_v5, 0.0  ;;  %3923 = vmatpush2.msra.mxu1 %v3632_v27  ;;  %v3790_v62 = vld [vmem:[#allocation16 + $0x3c8] sm:$0xff]  ;;  %v3781_v5 = vld [vmem:[#allocation16 + $0x380] sm:$0xff] }
 0x812   :  { %3924 = vmatprep.subr.mxu1 %v3631_v56  ;;  %v3791_v33 = vld [vmem:[#allocation16 + $0x3d0] sm:$0xff]  ;;  %v3778_v26 = vld [vmem:[#allocation16 + $0x368] sm:$0xff]  ;;  %v3777_v27 = vld [vmem:[#allocation16 + $0x360] sm:$0xff] }
 0x813   :  { %v3511_v10 = vadd.f32 %v3505_v48, %v3495_v0  ;;  %v7645_v1 = vmax.f32 %v3510_v4, 0.0  ;;  %3925 = vmatpush2.msra.mxu1 %v3630_v25  ;;  %v3792_v48 = vld [vmem:[#allocation16 + $0x3d8] sm:$0xff]  ;;  %v3787_v9 = vld [vmem:[#allocation16 + $0x3b0] sm:$0xff]  ;;  %v3785_v0 = vld [vmem:[#allocation16 + $0x3a0] sm:$0xff] }
 0x814   :  { %3926 = vmatprep.subr.mxu1 %v3629_v7  ;;  %v3783_v4 = vld [vmem:[#allocation16 + $0x390] sm:$0xff]  ;;  %v3776_v56 = vld [vmem:[#allocation16 + $0x358] sm:$0xff]  ;;  %v3774_v7 = vld [vmem:[#allocation16 + $0x348] sm:$0xff] }
 0x815   :  { %v7643_v41 = vmax.f32 %v3511_v10, 0.0  ;;  %v3780_v10 = vld [vmem:[#allocation16 + $0x378] sm:$0xff]  ;;  %v3775_v25 = vld [vmem:[#allocation16 + $0x350] sm:$0xff] }
 0x817   :  { %3549 = vmatprep.subr.mxu0 %v7643_v41 }
 0x818   :  { %3550 = vmatpush1.msra.mxu0 %v7645_v1 }
 0x819   :  { %3551 = vmatprep.subr.mxu0 %v7647_v2 }
 0x81a   :  { %3552 = vmatpush1.msra.mxu0 %v7650_v30 }
 0x81b   :  { %5959 = vmatmul.mubr.msk.f32.vlgmr.msra.gmra.mxu0 %vm3517_vm2, %v3516_v16  ;;  %3689 = vmatprep.subr.mxu0 %v7643_v41  ;;  %v3773_v16 = vld [vmem:[#allocation16 + $0x340] sm:$0xff] }
 0x81c   :  { %3690 = vmatpush1.msra.mxu0 %v7645_v1  ;;  %3725 = vmatprep.mubr.f32.mxu0 %v6981_v32 }
 0x81d   :  { %3691 = vmatprep.subr.mxu0 %v7647_v2 }
 0x81e   :  { %3692 = vmatpush1.msra.mxu0 %v7650_v30 }
 0x81f   :  { %5960 = vmatmul.mubr.msk.f32.vlgmr.msra.gmra.mxu0 %vm3517_vm2, %v3657_v17  ;;  %3797 = vmatprep.subr.mxu0 %v3764_v18  ;;  %v3772_v17 = vld [vmem:[#allocation16 + $0x338] sm:$0xff]  ;;  %v3771_v18 = vld [vmem:[#allocation16 + $0x330] sm:$0xff] }
 0x820   :  { %3798 = vmatpush1.msra.mxu0 %v3763_v8  ;;  %v3770_v8 = vld [vmem:[#allocation16 + $0x328] sm:$0xff] }
 0x821   :  { %3799 = vmatprep.subr.mxu0 %v3762_v19  ;;  %v3769_v19 = vld [vmem:[#allocation16 + $0x320] sm:$0xff] }
 0x822   :  { %3800 = vmatpush1.msra.mxu0 %v3761_v20  ;;  %v3768_v20 = vld [vmem:[#allocation16 + $0x318] sm:$0xff] }
 0x823   :  { %3801 = vmatprep.subr.mxu0 %v3760_v21  ;;  %v3767_v21 = vld [vmem:[#allocation16 + $0x310] sm:$0xff] }
 0x824   :  { %3802 = vmatpush1.msra.mxu0 %v3759_v22  ;;  %v3628_v22 = vld [vmem:[#allocation16 + $0x120] sm:$0xff] }
 0x825   :  { %3803 = vmatprep.subr.mxu0 %v3758_v23  ;;  %v3766_v23 = vld [vmem:[#allocation16 + $0x308] sm:$0xff]  ;;  %3927 = vmatpush2.msra.mxu1 %v3628_v22  ;;  %v4241_v22 = vld [vmem:[#allocation16 + $0x658] sm:$0xff] }
 0x826   :  { %3804 = vmatpush1.msra.mxu0 %v3757_v24  ;;  %v3627_v24 = vld [vmem:[#allocation16 + $0x118] sm:$0xff] }
 0x827   :  { %3805 = vmatprep.subr.mxu0 %v3756_v34  ;;  %v3765_v34 = vld [vmem:[#allocation16 + $0x300] sm:$0xff]  ;;  %3928 = vmatprep.subr.mxu1 %v3627_v24  ;;  %v4240_v24 = vld [vmem:[#allocation16 + $0x650] sm:$0xff] }
 0x828   :  { %3806 = vmatpush1.msra.mxu0 %v3755_v45  ;;  %v3626_v45 = vld [vmem:[#allocation16 + $0x110] sm:$0xff] }
 0x829   :  { %3807 = vmatprep.subr.mxu0 %v3754_v36  ;;  %3929 = vmatpush2.msra.mxu1 %v3626_v45  ;;  %v3625_v36 = vld [vmem:[#allocation16 + $0x108] sm:$0xff] }
 0x82a   :  { %3808 = vmatpush1.msra.mxu0 %v3753_v49  ;;  %3930 = vmatprep.subr.mxu1 %v3625_v36  ;;  %v3624_v49 = vld [vmem:[#allocation16 + $0x100] sm:$0xff]  ;;  %v4239_v45 = vld [vmem:[#allocation16 + $0x648] sm:$0xff] }
 0x82b   :  { %3809 = vmatprep.subr.mxu0 %v3752_v53  ;;  %3931 = vmatpush2.msra.mxu1 %v3624_v49  ;;  %v4047_v53 = vld [vmem:[#allocation16 + $0x4f8] sm:$0xff]  ;;  %v4017_v36 = vld [vmem:[#allocation16 + $0x408] sm:$0xff]  ;;  %v4238_v49 = vld [vmem:[#allocation16 + $0x640] sm:$0xff] }
 0x82c   :  { %3810 = vmatpush1.msra.mxu0 %v3751_v39  ;;  %4080 = vmatprep.subr.mxu1 %v4047_v53  ;;  %v4016_v53 = vld [vmem:[#allocation16 + $0x400] sm:$0xff] }
 0x82d   :  { %3811 = vmatprep.subr.mxu0 %v3750_v43 }
 0x82e   :  { %3812 = vmatpush1.msra.mxu0 %v3749_v60  ;;  %v4046_v60 = vld [vmem:[#allocation16 + $0x4f0] sm:$0xff] }
 0x82f   :  { %3813 = vmatprep.subr.mxu0 %v3748_v46  ;;  %v4045_v46 = vld [vmem:[#allocation16 + $0x4e8] sm:$0xff] }
 0x830   :  { %3814 = vmatpush1.msra.mxu0 %v3747_v47 }
 0x831   :  { %3815 = vmatprep.subr.mxu0 %v3746_v50  ;;  %v4044_v50 = vld [vmem:[#allocation16 + $0x4e0] sm:$0xff] }
 0x832   :  { %3816 = vmatpush1.msra.mxu0 %v3745_v51  ;;  %v4043_v51 = vld [vmem:[#allocation16 + $0x4d8] sm:$0xff] }
 0x833   :  { %3817 = vmatprep.subr.mxu0 %v3744_v52 }
 0x834   :  { %3818 = vmatpush1.msra.mxu0 %v3743_v12  ;;  %v4042_v12 = vld [vmem:[#allocation16 + $0x4d0] sm:$0xff] }
 0x835   :  { %3819 = vmatprep.subr.mxu0 %v3742_v29  ;;  %v4041_v29 = vld [vmem:[#allocation16 + $0x4c8] sm:$0xff] }
 0x836   :  { %3820 = vmatpush1.msra.mxu0 %v3741_v31  ;;  %v3940_v31 = vld [vmem:[#allocation14 + $0x10] sm:$0xff] }
 0x837   :  { %3821 = vmatprep.subr.mxu0 %v3740_v14  ;;  %v4040_v14 = vld [vmem:[#allocation16 + $0x4c0] sm:$0xff] }
 0x838   :  { %3822 = vmatpush1.msra.mxu0 %v3739_v37  ;;  %v4039_v37 = vld [vmem:[#allocation16 + $0x4b8] sm:$0xff] }
 0x839   :  { %3823 = vmatprep.subr.mxu0 %v3738_v61  ;;  %v4154_v61 = vld [vmem:[#allocation14 + $0x18] sm:$0xff] }
 0x83a   :  { %3824 = vmatpush1.msra.mxu0 %v3737_v28  ;;  %v4261_v28 = vld [vmem:[#allocation16 + $0x6f8] sm:$0xff] }
 0x83b   :  { %3825 = vmatprep.subr.mxu0 %v3736_v55  ;;  %v4260_v55 = vld [vmem:[#allocation16 + $0x6f0] sm:$0xff] }
 0x83c   :  { %3826 = vmatpush1.msra.mxu0 %v3735_v40  ;;  %v4038_v40 = vld [vmem:[#allocation16 + $0x4b0] sm:$0xff] }
 0x83d   :  { %3827 = vmatprep.subr.mxu0 %v3734_v11  ;;  %v4259_v11 = vld [vmem:[#allocation16 + $0x6e8] sm:$0xff] }
 0x83e   :  { %3828 = vmatpush1.msra.mxu0 %v3733_v38  ;;  %v4037_v38 = vld [vmem:[#allocation16 + $0x4a8] sm:$0xff] }
 0x83f   :  { %3829 = vmatprep.subr.mxu0 %v3796_v57  ;;  %v4036_v57 = vld [vmem:[#allocation16 + $0x4a0] sm:$0xff] }
 0x840   :  { %3830 = vmatpush2.msra.mxu0 %v3795_v58  ;;  %v4035_v58 = vld [vmem:[#allocation16 + $0x498] sm:$0xff] }
 0x841   :  { %3831 = vmatprep.subr.mxu0 %v3794_v44  ;;  %v4256_v44 = vld [vmem:[#allocation16 + $0x6d0] sm:$0xff] }
 0x842   :  { %3832 = vmatpush2.msra.mxu0 %v3793_v59  ;;  %v4255_v59 = vld [vmem:[#allocation16 + $0x6c8] sm:$0xff] }
 0x843   :  { %3833 = vmatprep.subr.mxu0 %v3792_v48  ;;  %v4254_v48 = vld [vmem:[#allocation16 + $0x6c0] sm:$0xff] }
 0x844   :  { %3834 = vmatpush2.msra.mxu0 %v3791_v33  ;;  %v4032_v33 = vld [vmem:[#allocation16 + $0x480] sm:$0xff] }
 0x845   :  { %3835 = vmatprep.subr.mxu0 %v3790_v62  ;;  %v4253_v62 = vld [vmem:[#allocation16 + $0x6b8] sm:$0xff] }
 0x846   :  { %3836 = vmatpush2.msra.mxu0 %v3789_v42  ;;  %v4031_v42 = vld [vmem:[#allocation16 + $0x478] sm:$0xff] }
 0x847   :  { %3837 = vmatprep.subr.mxu0 %v3788_v63  ;;  %v4252_v63 = vld [vmem:[#allocation16 + $0x6b0] sm:$0xff] }
 0x848   :  { %3838 = vmatpush2.msra.mxu0 %v3787_v9  ;;  %v4030_v9 = vld [vmem:[#allocation16 + $0x470] sm:$0xff] }
 0x849   :  { %3839 = vmatprep.subr.mxu0 %v3786_v13  ;;  %v4251_v13 = vld [vmem:[#allocation16 + $0x6a8] sm:$0xff] }
 0x84a   :  { %3840 = vmatpush2.msra.mxu0 %v3785_v0  ;;  %v4029_v0 = vld [vmem:[#allocation16 + $0x468] sm:$0xff] }
 0x84b   :  { %3841 = vmatprep.subr.mxu0 %v3784_v35  ;;  %v4250_v35 = vld [vmem:[#allocation16 + $0x6a0] sm:$0xff] }
 0x84c   :  { %3842 = vmatpush2.msra.mxu0 %v3783_v4  ;;  %v4028_v4 = vld [vmem:[#allocation16 + $0x460] sm:$0xff] }
 0x84d   :  { %3843 = vmatprep.subr.mxu0 %v3782_v3  ;;  %v4249_v3 = vld [vmem:[#allocation16 + $0x698] sm:$0xff] }
 0x84e   :  { %3844 = vmatpush2.msra.mxu0 %v3781_v5  ;;  %v4027_v5 = vld [vmem:[#allocation16 + $0x458] sm:$0xff] }
 0x84f   :  { %3845 = vmatprep.subr.mxu0 %v3780_v10  ;;  %v4248_v10 = vld [vmem:[#allocation16 + $0x690] sm:$0xff] }
 0x850   :  { %3846 = vmatpush2.msra.mxu0 %v3779_v54  ;;  %v4026_v54 = vld [vmem:[#allocation16 + $0x450] sm:$0xff] }
 0x851   :  { %3847 = vmatprep.subr.mxu0 %v3778_v26  ;;  %v4247_v26 = vld [vmem:[#allocation16 + $0x688] sm:$0xff] }
 0x852   :  { %3848 = vmatpush2.msra.mxu0 %v3777_v27  ;;  %v4025_v27 = vld [vmem:[#allocation16 + $0x448] sm:$0xff] }
 0x853   :  { %3849 = vmatprep.subr.mxu0 %v3776_v56  ;;  %v4246_v56 = vld [vmem:[#allocation16 + $0x680] sm:$0xff] }
 0x854   :  { %3850 = vmatpush2.msra.mxu0 %v3775_v25  ;;  %v4024_v25 = vld [vmem:[#allocation16 + $0x440] sm:$0xff] }
 0x855   :  { %3851 = vmatprep.subr.mxu0 %v3774_v7  ;;  %v4245_v7 = vld [vmem:[#allocation16 + $0x678] sm:$0xff] }
 0x856   :  { %3852 = vmatpush2.msra.mxu0 %v3773_v16  ;;  %v4023_v16 = vld [vmem:[#allocation16 + $0x438] sm:$0xff] }
 0x857   :  { %3853 = vmatprep.subr.mxu0 %v3772_v17  ;;  %v4244_v17 = vld [vmem:[#allocation16 + $0x670] sm:$0xff] }
 0x858   :  { %3854 = vmatpush2.msra.mxu0 %v3771_v18  ;;  %v4022_v18 = vld [vmem:[#allocation16 + $0x430] sm:$0xff] }
 0x859   :  { %3855 = vmatprep.subr.mxu0 %v3770_v8  ;;  %v4243_v8 = vld [vmem:[#allocation16 + $0x668] sm:$0xff] }
 0x85a   :  { %3856 = vmatpush2.msra.mxu0 %v3769_v19  ;;  %v4021_v19 = vld [vmem:[#allocation16 + $0x428] sm:$0xff] }
 0x85b   :  { %3857 = vmatprep.subr.mxu0 %v3768_v20  ;;  %v4242_v20 = vld [vmem:[#allocation16 + $0x660] sm:$0xff] }
 0x85c   :  { %3858 = vmatpush2.msra.mxu0 %v3767_v21  ;;  %v4020_v21 = vld [vmem:[#allocation16 + $0x420] sm:$0xff] }
 0x85d   :  { %3859 = vmatprep.subr.mxu0 %v3766_v23  ;;  %v4019_v23 = vld [vmem:[#allocation16 + $0x418] sm:$0xff] }
 0x85e   :  { %3860 = vmatpush2.msra.mxu0 %v3765_v34  ;;  %v4018_v34 = vld [vmem:[#allocation16 + $0x410] sm:$0xff] }
 0x85f   :  { %3972 = vmatprep.subr.mxu0 %v7643_v41 }
 0x8db   :  { %v3587_v39 = vpop.f32.mrf.mxu0 }
 0x8dd   :  { %v3589_v43 = vpop.f32.mrf.mxu0 }
 0x8de   :  { %3932 = vmatprep.mubr.f32.mxu1 %v3589_v43  ;;  %v4079_v43 = vld [vmem:[#allocation16 + $0x5f8] sm:$0xff] }
 0x8df   :  { %v3727_v47 = vpop.f32.mrf.mxu0  ;;  %3933 = vmatmul.mubr.f32.vlgmr.msra.gmra.mxu1 %v3587_v39  ;;  %v4237_v39 = vld [vmem:[#allocation16 + $0x638] sm:$0xff] }
 0x8e0   :  { %4081 = vmatpush1.msra.mxu1 %v4046_v60  ;;  %v4236_v60 = vld [vmem:[#allocation16 + $0x630] sm:$0xff] }
 0x8e1   :  { %v3729_v52 = vpop.f32.mrf.mxu0  ;;  %4082 = vmatprep.subr.mxu1 %v4045_v46  ;;  %v4078_v46 = vld [vmem:[#allocation16 + $0x5f0] sm:$0xff] }
 0x8e2   :  { %3861 = vmatprep.mubr.f32.mxu0 %v3729_v52  ;;  %4083 = vmatpush1.msra.mxu1 %v4044_v50  ;;  %v4077_v50 = vld [vmem:[#allocation16 + $0x5e8] sm:$0xff]  ;;  %v4076_v52 = vld [vmem:[#allocation16 + $0x5e0] sm:$0xff] }
 0x8e3   :  { %3862 = vmatmul.mubr.f32.vlgmr.msra.gmra.mxu0 %v3727_v47  ;;  %4084 = vmatprep.subr.mxu1 %v4043_v51  ;;  %v4235_v47 = vld [vmem:[#allocation16 + $0x628] sm:$0xff]  ;;  %v4234_v51 = vld [vmem:[#allocation16 + $0x620] sm:$0xff] }
 0x8e4   :  { %3973 = vmatpush1.msra.mxu0 %v7645_v1  ;;  %4008 = vmatprep.mubr.f32.mxu0 %v6981_v32 }
 0x8e5   :  { %3974 = vmatprep.subr.mxu0 %v7647_v2  ;;  %4085 = vmatpush1.msra.mxu1 %v4042_v12  ;;  %v4233_v12 = vld [vmem:[#allocation16 + $0x618] sm:$0xff] }
 0x8e6   :  { %3975 = vmatpush1.msra.mxu0 %v7650_v30  ;;  %4086 = vmatprep.subr.mxu1 %v4041_v29  ;;  %v4075_v29 = vld [vmem:[#allocation16 + $0x5d8] sm:$0xff] }
 0x8e7   :  { %4186 = vmatprep.subr.mxu0 %v7643_v41  ;;  %5961 = vmatmul.mubr.msk.f32.vlgmr.msra.gmra.mxu0 %vm3517_vm2, %v3940_v31  ;;  %v4258_v41 = vld [vmem:[#allocation16 + $0x6e0] sm:$0xff]  ;;  %v4232_v31 = vld [vmem:[#allocation16 + $0x610] sm:$0xff] }
 0x8e8   :  { %4187 = vmatpush1.msra.mxu0 %v7645_v1  ;;  %4222 = vmatprep.mubr.f32.mxu0 %v6981_v32  ;;  %v4257_v1 = vld [vmem:[#allocation16 + $0x6d8] sm:$0xff] }
 0x8e9   :  { %4188 = vmatprep.subr.mxu0 %v7647_v2  ;;  %4087 = vmatpush1.msra.mxu1 %v4040_v14  ;;  %v4034_v2 = vld [vmem:[#allocation16 + $0x490] sm:$0xff] }
 0x8ea   :  { %4189 = vmatpush1.msra.mxu0 %v7650_v30  ;;  %4088 = vmatprep.subr.mxu1 %v4039_v37  ;;  %v4033_v30 = vld [vmem:[#allocation16 + $0x488] sm:$0xff]  ;;  %v4074_v14 = vld [vmem:[#allocation16 + $0x5d0] sm:$0xff] }
 0x8eb   :  { %5962 = vmatmul.mubr.msk.f32.vlgmr.msra.gmra.mxu0 %vm3517_vm2, %v4154_v61  ;;  %4294 = vmatprep.subr.mxu0 %v4261_v28  ;;  %v4231_v37 = vld [vmem:[#allocation16 + $0x608] sm:$0xff]  ;;  %v4230_v28 = vld [vmem:[#allocation16 + $0x600] sm:$0xff] }
 0x8ec   :  { %4295 = vmatpush1.msra.mxu0 %v4260_v55  ;;  %4089 = vmatpush1.msra.mxu1 %v4038_v40  ;;  %v4073_v61 = vld [vmem:[#allocation16 + $0x5c8] sm:$0xff]  ;;  %v4072_v55 = vld [vmem:[#allocation16 + $0x5c0] sm:$0xff]  ;;  %v4293_v40 = vld [vmem:[#allocation16 + $0x7f8] sm:$0xff] }
 0x8ed   :  { %4296 = vmatprep.subr.mxu0 %v4259_v11  ;;  %4090 = vmatprep.subr.mxu1 %v4037_v38  ;;  %v4071_v11 = vld [vmem:[#allocation16 + $0x5b8] sm:$0xff]  ;;  %v4292_v38 = vld [vmem:[#allocation16 + $0x7f0] sm:$0xff] }
 0x8ee   :  { %4297 = vmatpush1.msra.mxu0 %v4258_v41  ;;  %4091 = vmatpush1.msra.mxu1 %v4036_v57  ;;  %v4070_v41 = vld [vmem:[#allocation16 + $0x5b0] sm:$0xff]  ;;  %v4291_v57 = vld [vmem:[#allocation16 + $0x7e8] sm:$0xff] }
 0x8ef   :  { %4298 = vmatprep.subr.mxu0 %v4257_v1  ;;  %4092 = vmatprep.subr.mxu1 %v4035_v58  ;;  %v4069_v1 = vld [vmem:[#allocation16 + $0x5a8] sm:$0xff]  ;;  %v4290_v58 = vld [vmem:[#allocation16 + $0x7e0] sm:$0xff] }
 0x8f0   :  { %4299 = vmatpush1.msra.mxu0 %v4256_v44  ;;  %4093 = vmatpush1.msra.mxu1 %v4034_v2  ;;  %v4068_v44 = vld [vmem:[#allocation16 + $0x5a0] sm:$0xff]  ;;  %v4289_v2 = vld [vmem:[#allocation16 + $0x7d8] sm:$0xff] }
 0x8f1   :  { %4300 = vmatprep.subr.mxu0 %v4255_v59  ;;  %4094 = vmatprep.subr.mxu1 %v4033_v30  ;;  %v4067_v59 = vld [vmem:[#allocation16 + $0x598] sm:$0xff]  ;;  %v4288_v30 = vld [vmem:[#allocation16 + $0x7d0] sm:$0xff] }
 0x8f2   :  { %4301 = vmatpush1.msra.mxu0 %v4254_v48  ;;  %4095 = vmatpush1.msra.mxu1 %v4032_v33  ;;  %v4066_v48 = vld [vmem:[#allocation16 + $0x590] sm:$0xff]  ;;  %v4287_v33 = vld [vmem:[#allocation16 + $0x7c8] sm:$0xff] }
 0x8f3   :  { %4302 = vmatprep.subr.mxu0 %v4253_v62  ;;  %4096 = vmatprep.subr.mxu1 %v4031_v42  ;;  %v4065_v62 = vld [vmem:[#allocation16 + $0x588] sm:$0xff]  ;;  %v4286_v42 = vld [vmem:[#allocation16 + $0x7c0] sm:$0xff] }
 0x8f4   :  { %4303 = vmatpush1.msra.mxu0 %v4252_v63  ;;  %4097 = vmatpush1.msra.mxu1 %v4030_v9  ;;  %v4064_v63 = vld [vmem:[#allocation16 + $0x580] sm:$0xff]  ;;  %v4285_v9 = vld [vmem:[#allocation16 + $0x7b8] sm:$0xff] }
 0x8f5   :  { %4304 = vmatprep.subr.mxu0 %v4251_v13  ;;  %4098 = vmatprep.subr.mxu1 %v4029_v0  ;;  %v4063_v13 = vld [vmem:[#allocation16 + $0x578] sm:$0xff]  ;;  %v4284_v0 = vld [vmem:[#allocation16 + $0x7b0] sm:$0xff] }
 0x8f6   :  { %4305 = vmatpush1.msra.mxu0 %v4250_v35  ;;  %4099 = vmatpush1.msra.mxu1 %v4028_v4  ;;  %v4062_v35 = vld [vmem:[#allocation16 + $0x570] sm:$0xff]  ;;  %v4283_v4 = vld [vmem:[#allocation16 + $0x7a8] sm:$0xff] }
 0x8f7   :  { %4306 = vmatprep.subr.mxu0 %v4249_v3  ;;  %4100 = vmatprep.subr.mxu1 %v4027_v5  ;;  %v4061_v3 = vld [vmem:[#allocation16 + $0x568] sm:$0xff]  ;;  %v4282_v5 = vld [vmem:[#allocation16 + $0x7a0] sm:$0xff] }
 0x8f8   :  { %4307 = vmatpush1.msra.mxu0 %v4248_v10  ;;  %4101 = vmatpush1.msra.mxu1 %v4026_v54  ;;  %v4060_v10 = vld [vmem:[#allocation16 + $0x560] sm:$0xff]  ;;  %v4281_v54 = vld [vmem:[#allocation16 + $0x798] sm:$0xff] }
 0x8f9   :  { %4308 = vmatprep.subr.mxu0 %v4247_v26  ;;  %4102 = vmatprep.subr.mxu1 %v4025_v27  ;;  %v4059_v26 = vld [vmem:[#allocation16 + $0x558] sm:$0xff]  ;;  %v4280_v27 = vld [vmem:[#allocation16 + $0x790] sm:$0xff] }
 0x8fa   :  { %4309 = vmatpush1.msra.mxu0 %v4246_v56  ;;  %4103 = vmatpush1.msra.mxu1 %v4024_v25  ;;  %v4279_v56 = vld [vmem:[#allocation16 + $0x788] sm:$0xff]  ;;  %v4278_v25 = vld [vmem:[#allocation16 + $0x780] sm:$0xff] }
 0x8fb   :  { %4310 = vmatprep.subr.mxu0 %v4245_v7  ;;  %4104 = vmatprep.subr.mxu1 %v4023_v16  ;;  %v4277_v7 = vld [vmem:[#allocation16 + $0x778] sm:$0xff]  ;;  %v4058_v16 = vld [vmem:[#allocation16 + $0x550] sm:$0xff] }
 0x8fc   :  { %4311 = vmatpush1.msra.mxu0 %v4244_v17  ;;  %4105 = vmatpush1.msra.mxu1 %v4022_v18  ;;  %v4276_v17 = vld [vmem:[#allocation16 + $0x770] sm:$0xff]  ;;  %v4057_v18 = vld [vmem:[#allocation16 + $0x548] sm:$0xff] }
 0x8fd   :  { %4312 = vmatprep.subr.mxu0 %v4243_v8  ;;  %4106 = vmatprep.subr.mxu1 %v4021_v19  ;;  %v4275_v8 = vld [vmem:[#allocation16 + $0x768] sm:$0xff]  ;;  %v4056_v19 = vld [vmem:[#allocation16 + $0x540] sm:$0xff] }
 0x8fe   :  { %4313 = vmatpush1.msra.mxu0 %v4242_v20  ;;  %4107 = vmatpush1.msra.mxu1 %v4020_v21  ;;  %v4274_v20 = vld [vmem:[#allocation16 + $0x760] sm:$0xff]  ;;  %v4055_v21 = vld [vmem:[#allocation16 + $0x538] sm:$0xff] }
 0x8ff   :  { %4314 = vmatprep.subr.mxu0 %v4241_v22  ;;  %4108 = vmatprep.subr.mxu1 %v4019_v23  ;;  %v4273_v22 = vld [vmem:[#allocation16 + $0x758] sm:$0xff]  ;;  %v4054_v23 = vld [vmem:[#allocation16 + $0x530] sm:$0xff] }
 0x900   :  { %4315 = vmatpush1.msra.mxu0 %v4240_v24  ;;  %4109 = vmatpush1.msra.mxu1 %v4018_v34  ;;  %v4272_v24 = vld [vmem:[#allocation16 + $0x750] sm:$0xff]  ;;  %v4053_v34 = vld [vmem:[#allocation16 + $0x528] sm:$0xff] }
 0x901   :  { %4316 = vmatprep.subr.mxu0 %v4239_v45  ;;  %4110 = vmatprep.subr.mxu1 %v4017_v36  ;;  %v4271_v45 = vld [vmem:[#allocation16 + $0x748] sm:$0xff]  ;;  %v4052_v36 = vld [vmem:[#allocation16 + $0x520] sm:$0xff] }
 0x902   :  { %4317 = vmatpush1.msra.mxu0 %v4238_v49  ;;  %4111 = vmatpush1.msra.mxu1 %v4016_v53  ;;  %v4270_v49 = vld [vmem:[#allocation16 + $0x740] sm:$0xff]  ;;  %v4051_v53 = vld [vmem:[#allocation16 + $0x518] sm:$0xff] }
 0x903   :  { %4318 = vmatprep.subr.mxu0 %v4237_v39  ;;  %4112 = vmatprep.subr.mxu1 %v4079_v43  ;;  %v4269_v39 = vld [vmem:[#allocation16 + $0x738] sm:$0xff]  ;;  %v4050_v43 = vld [vmem:[#allocation16 + $0x510] sm:$0xff] }
 0x904   :  { %4319 = vmatpush1.msra.mxu0 %v4236_v60  ;;  %4113 = vmatpush2.msra.mxu1 %v4078_v46  ;;  %v4268_v60 = vld [vmem:[#allocation16 + $0x730] sm:$0xff]  ;;  %v4049_v46 = vld [vmem:[#allocation16 + $0x508] sm:$0xff] }
 0x905   :  { %4320 = vmatprep.subr.mxu0 %v4235_v47  ;;  %4114 = vmatprep.subr.mxu1 %v4077_v50  ;;  %v4267_v47 = vld [vmem:[#allocation16 + $0x728] sm:$0xff]  ;;  %v4048_v50 = vld [vmem:[#allocation16 + $0x500] sm:$0xff] }
 0x906   :  { %4321 = vmatpush1.msra.mxu0 %v4234_v51  ;;  %4115 = vmatpush2.msra.mxu1 %v4076_v52  ;;  %v4266_v51 = vld [vmem:[#allocation16 + $0x720] sm:$0xff]  ;;  %v4265_v52 = vld [vmem:[#allocation16 + $0x718] sm:$0xff] }
 0x907   :  { %4322 = vmatprep.subr.mxu0 %v4233_v12  ;;  %4116 = vmatprep.subr.mxu1 %v4075_v29  ;;  %v4264_v12 = vld [vmem:[#allocation16 + $0x710] sm:$0xff]  ;;  %v4263_v29 = vld [vmem:[#allocation16 + $0x708] sm:$0xff] }
 0x908   :  { %4323 = vmatpush1.msra.mxu0 %v4232_v31  ;;  %4117 = vmatpush2.msra.mxu1 %v4074_v14  ;;  %v4262_v31 = vld [vmem:[#allocation16 + $0x700] sm:$0xff]  ;;  %v4599_v14 = vld [vmem:[#allocation20 + $0x1f8] sm:$0xff] }
 0x909   :  { %4324 = vmatprep.subr.mxu0 %v4231_v37  ;;  %4118 = vmatprep.subr.mxu1 %v4073_v61 }
 0x90a   :  { %4325 = vmatpush1.msra.mxu0 %v4230_v28  ;;  %4119 = vmatpush2.msra.mxu1 %v4072_v55 }
 0x90b   :  { %4326 = vmatprep.subr.mxu0 %v4293_v40  ;;  %4120 = vmatprep.subr.mxu1 %v4071_v11 }
 0x90c   :  { %4327 = vmatpush2.msra.mxu0 %v4292_v38  ;;  %4121 = vmatpush2.msra.mxu1 %v4070_v41  ;;  %v4583_v38 = vld [vmem:[#allocation20 + $0x178] sm:$0xff]  ;;  %v4598_v41 = vld [vmem:[#allocation20 + $0x1f0] sm:$0xff] }
 0x90d   :  { %4328 = vmatprep.subr.mxu0 %v4291_v57  ;;  %4122 = vmatprep.subr.mxu1 %v4069_v1  ;;  %v4582_v57 = vld [vmem:[#allocation20 + $0x170] sm:$0xff]  ;;  %v4597_v1 = vld [vmem:[#allocation20 + $0x1e8] sm:$0xff] }
 0x90e   :  { %4329 = vmatpush2.msra.mxu0 %v4290_v58  ;;  %4123 = vmatpush2.msra.mxu1 %v4068_v44  ;;  %v4581_v58 = vld [vmem:[#allocation20 + $0x168] sm:$0xff]  ;;  %v4596_v44 = vld [vmem:[#allocation20 + $0x1e0] sm:$0xff] }
 0x90f   :  { %4330 = vmatprep.subr.mxu0 %v4289_v2  ;;  %4124 = vmatprep.subr.mxu1 %v4067_v59  ;;  %v4580_v2 = vld [vmem:[#allocation20 + $0x160] sm:$0xff]  ;;  %v4595_v59 = vld [vmem:[#allocation20 + $0x1d8] sm:$0xff] }
 0x910   :  { %4331 = vmatpush2.msra.mxu0 %v4288_v30  ;;  %4125 = vmatpush2.msra.mxu1 %v4066_v48  ;;  %v4579_v30 = vld [vmem:[#allocation20 + $0x158] sm:$0xff]  ;;  %v4594_v48 = vld [vmem:[#allocation20 + $0x1d0] sm:$0xff] }
 0x911   :  { %4332 = vmatprep.subr.mxu0 %v4287_v33  ;;  %4126 = vmatprep.subr.mxu1 %v4065_v62  ;;  %v4578_v33 = vld [vmem:[#allocation20 + $0x150] sm:$0xff]  ;;  %v4593_v62 = vld [vmem:[#allocation20 + $0x1c8] sm:$0xff] }
 0x912   :  { %4333 = vmatpush2.msra.mxu0 %v4286_v42  ;;  %4127 = vmatpush2.msra.mxu1 %v4064_v63  ;;  %v4577_v42 = vld [vmem:[#allocation20 + $0x148] sm:$0xff]  ;;  %v4592_v63 = vld [vmem:[#allocation20 + $0x1c0] sm:$0xff] }
 0x913   :  { %4334 = vmatprep.subr.mxu0 %v4285_v9  ;;  %4128 = vmatprep.subr.mxu1 %v4063_v13  ;;  %v4576_v9 = vld [vmem:[#allocation20 + $0x140] sm:$0xff]  ;;  %v4591_v13 = vld [vmem:[#allocation20 + $0x1b8] sm:$0xff] }
 0x914   :  { %4335 = vmatpush2.msra.mxu0 %v4284_v0  ;;  %4129 = vmatpush2.msra.mxu1 %v4062_v35  ;;  %v4575_v0 = vld [vmem:[#allocation20 + $0x138] sm:$0xff]  ;;  %v4590_v35 = vld [vmem:[#allocation20 + $0x1b0] sm:$0xff] }
 0x915   :  { %4336 = vmatprep.subr.mxu0 %v4283_v4  ;;  %4130 = vmatprep.subr.mxu1 %v4061_v3  ;;  %v4574_v4 = vld [vmem:[#allocation20 + $0x130] sm:$0xff]  ;;  %v4589_v3 = vld [vmem:[#allocation20 + $0x1a8] sm:$0xff] }
 0x916   :  { %4337 = vmatpush2.msra.mxu0 %v4282_v5  ;;  %4131 = vmatpush2.msra.mxu1 %v4060_v10  ;;  %v4573_v5 = vld [vmem:[#allocation20 + $0x128] sm:$0xff]  ;;  %v4588_v10 = vld [vmem:[#allocation20 + $0x1a0] sm:$0xff] }
 0x917   :  { %4338 = vmatprep.subr.mxu0 %v4281_v54  ;;  %4132 = vmatprep.subr.mxu1 %v4059_v26  ;;  %v4572_v54 = vld [vmem:[#allocation20 + $0x120] sm:$0xff]  ;;  %v4587_v26 = vld [vmem:[#allocation20 + $0x198] sm:$0xff] }
 0x918   :  { %4339 = vmatpush2.msra.mxu0 %v4280_v27  ;;  %4133 = vmatpush2.msra.mxu1 %v4058_v16  ;;  %v4571_v27 = vld [vmem:[#allocation20 + $0x118] sm:$0xff]  ;;  %v4569_v16 = vld [vmem:[#allocation20 + $0x108] sm:$0xff] }
 0x919   :  { %4340 = vmatprep.subr.mxu0 %v4279_v56  ;;  %4134 = vmatprep.subr.mxu1 %v4057_v18  ;;  %v4586_v56 = vld [vmem:[#allocation20 + $0x190] sm:$0xff]  ;;  %v4568_v18 = vld [vmem:[#allocation20 + $0x100] sm:$0xff] }
 0x91a   :  { %4341 = vmatpush2.msra.mxu0 %v4278_v25  ;;  %4135 = vmatpush2.msra.mxu1 %v4056_v19  ;;  %v4570_v25 = vld [vmem:[#allocation20 + $0x110] sm:$0xff] }
 0x91b   :  { %4342 = vmatprep.subr.mxu0 %v4277_v7  ;;  %4136 = vmatprep.subr.mxu1 %v4055_v21  ;;  %v4585_v7 = vld [vmem:[#allocation20 + $0x188] sm:$0xff] }
 0x91c   :  { %4343 = vmatpush2.msra.mxu0 %v4276_v17  ;;  %4137 = vmatpush2.msra.mxu1 %v4054_v23  ;;  %v4584_v17 = vld [vmem:[#allocation20 + $0x180] sm:$0xff] }
 0x91d   :  { %4344 = vmatprep.subr.mxu0 %v4275_v8  ;;  %4138 = vmatprep.subr.mxu1 %v4053_v34 }
 0x91e   :  { %4345 = vmatpush2.msra.mxu0 %v4274_v20  ;;  %4139 = vmatpush2.msra.mxu1 %v4052_v36 }
 0x91f   :  { %4346 = vmatprep.subr.mxu0 %v4273_v22  ;;  %4140 = vmatprep.subr.mxu1 %v4051_v53  ;;  %v4367_v22 = vld [vmem:[#allocation17] sm:$0x3] }
 0x920   :  { %4347 = vmatpush2.msra.mxu0 %v4272_v24  ;;  %4141 = vmatpush2.msra.mxu1 %v4050_v43  ;;  %v4372_v36 = vrot.slane %v4367_v22, %v7450_v6 }
 0x921   :  { %4348 = vmatprep.subr.mxu0 %v4271_v45  ;;  %4142 = vmatprep.subr.mxu1 %v4049_v46 }
 0x922   :  { %4349 = vmatpush2.msra.mxu0 %v4270_v49  ;;  %4143 = vmatpush2.msra.mxu1 %v4048_v50 }
 0x923   :  { %4350 = vmatprep.subr.mxu0 %v4269_v39  ;;  %v4376_v39 = vrot.slane %v4367_v22, %v7452_v15  ;;  %v4829_v22 = vld [vmem:[#allocation20 + $0x260] sm:$0xff] }
 0x924   :  { %4351 = vmatpush2.msra.mxu0 %v4268_v60 }
 0x925   :  { %4352 = vmatprep.subr.mxu0 %v4267_v47 }
 0x926   :  { %4353 = vmatpush2.msra.mxu0 %v4266_v51 }
 0x927   :  { %4354 = vmatprep.subr.mxu0 %v4265_v52  ;;  %v4383_v52 = vld [vmem:[#allocation19] sm:$0xf] }
 0x928   :  { %4355 = vmatpush2.msra.mxu0 %v4264_v12  ;;  %v4490_v12 = vld [vmem:[#allocation20 + $0xf8] sm:$0xff] }
 0x929   :  { %4356 = vmatprep.subr.mxu0 %v4263_v29  ;;  %v4492_v29 = vld [vmem:[#allocation19 + $0x4] sm:$0xf] }
 0x92a   :  { %4357 = vmatpush2.msra.mxu0 %v4262_v31  ;;  %v4474_v31 = vld [vmem:[#allocation20 + $0x78] sm:$0xff] }
 0x92b   :  { %6024 = vmatprep.subr.mxu0 %v4599_v14  ;;  %v4489_v14 = vld [vmem:[#allocation20 + $0xf0] sm:$0xff] }
 0x99f   :  { %v3934_v8 = vpop.f32.mrf.mxu1 }
 0x9a1   :  { %v3936_v19 = vpop.f32.mrf.mxu1 }
 0x9a3   :  { %v7674_v37 = vpop.f32.mrf.mxu0 }
 0x9a4   :  { %v3935_v21 = vadd.f32 %v3934_v8, %v7674_v37  ;;  %v4473_v37 = vld [vmem:[#allocation20 + $0x70] sm:$0xff] }
 0x9a5   :  { %v7676_v61 = vpop.f32.mrf.mxu0 }
 0x9a6   :  { %v3937_v24 = vadd.f32 %v3936_v19, %v7676_v61  ;;  %v4488_v61 = vld [vmem:[#allocation20 + $0xe8] sm:$0xff] }
 0x9a7   :  { %v4010_v28 = vpop.f32.mrf.mxu0  ;;  %v4830_v19 = vld [vmem:[#allocation20 + $0x268] sm:$0xff] }
 0x9a9   :  { %v4012_v55 = vpop.f32.mrf.mxu0 }
 0x9aa   :  { %4144 = vmatprep.mubr.f32.mxu1 %v4012_v55  ;;  %v4487_v55 = vld [vmem:[#allocation20 + $0xe0] sm:$0xff] }
 0x9ab   :  { %4145 = vmatmul.mubr.f32.vlgmr.msra.gmra.mxu1 %v4010_v28  ;;  %v4224_v40 = vpop.f32.mrf.mxu0  ;;  %v4472_v28 = vld [vmem:[#allocation20 + $0x68] sm:$0xff] }
 0x9ac   :  { %4452 = vmatprep.mubr.f32.mxu1 %v6981_v32 }
 0x9ad   :  { %v4226_v11 = vpop.f32.mrf.mxu0 }
 0x9ae   :  { %4358 = vmatprep.mubr.f32.mxu0 %v4226_v11  ;;  %v4486_v11 = vld [vmem:[#allocation20 + $0xd8] sm:$0xff] }
 0x9af   :  { %4359 = vmatmul.mubr.f32.vlgmr.msra.gmra.mxu0 %v4224_v40  ;;  %v4471_v40 = vld [vmem:[#allocation20 + $0x60] sm:$0xff] }
 0x9b0   :  { %6025 = vmatpush3.msra.mxu0 %v4583_v38  ;;  %v4470_v38 = vld [vmem:[#allocation20 + $0x58] sm:$0xff] }
 0x9b1   :  { %6026 = vmatprep.subr.mxu0 %v4598_v41  ;;  %v4485_v41 = vld [vmem:[#allocation20 + $0xd0] sm:$0xff] }
 0x9b2   :  { %6027 = vmatpush3.msra.mxu0 %v4582_v57  ;;  %v4469_v57 = vld [vmem:[#allocation20 + $0x50] sm:$0xff] }
 0x9b3   :  { %6028 = vmatprep.subr.mxu0 %v4597_v1  ;;  %v4484_v1 = vld [vmem:[#allocation20 + $0xc8] sm:$0xff] }
 0x9b4   :  { %6029 = vmatpush3.msra.mxu0 %v4581_v58  ;;  %v4468_v58 = vld [vmem:[#allocation20 + $0x48] sm:$0xff] }
 0x9b5   :  { %6030 = vmatprep.subr.mxu0 %v4596_v44  ;;  %v4483_v44 = vld [vmem:[#allocation20 + $0xc0] sm:$0xff] }
 0x9b6   :  { %6031 = vmatpush3.msra.mxu0 %v4580_v2  ;;  %v4467_v2 = vld [vmem:[#allocation20 + $0x40] sm:$0xff] }
 0x9b7   :  { %6032 = vmatprep.subr.mxu0 %v4595_v59  ;;  %v4482_v59 = vld [vmem:[#allocation20 + $0xb8] sm:$0xff] }
 0x9b8   :  { %6033 = vmatpush3.msra.mxu0 %v4579_v30  ;;  %v4466_v30 = vld [vmem:[#allocation20 + $0x38] sm:$0xff] }
 0x9b9   :  { %6034 = vmatprep.subr.mxu0 %v4594_v48  ;;  %v4481_v48 = vld [vmem:[#allocation20 + $0xb0] sm:$0xff] }
 0x9ba   :  { %6035 = vmatpush3.msra.mxu0 %v4578_v33  ;;  %v4465_v33 = vld [vmem:[#allocation20 + $0x30] sm:$0xff] }
 0x9bb   :  { %6036 = vmatprep.subr.mxu0 %v4593_v62  ;;  %v4480_v62 = vld [vmem:[#allocation20 + $0xa8] sm:$0xff] }
 0x9bc   :  { %6037 = vmatpush3.msra.mxu0 %v4577_v42  ;;  %v4464_v42 = vld [vmem:[#allocation20 + $0x28] sm:$0xff] }
 0x9bd   :  { %6038 = vmatprep.subr.mxu0 %v4592_v63  ;;  %v4479_v63 = vld [vmem:[#allocation20 + $0xa0] sm:$0xff] }
 0x9be   :  { %6039 = vmatpush3.msra.mxu0 %v4576_v9  ;;  %v4463_v9 = vld [vmem:[#allocation20 + $0x20] sm:$0xff] }
 0x9bf   :  { %6040 = vmatprep.subr.mxu0 %v4591_v13  ;;  %v4478_v13 = vld [vmem:[#allocation20 + $0x98] sm:$0xff] }
 0x9c0   :  { %6041 = vmatpush3.msra.mxu0 %v4575_v0  ;;  %v4462_v0 = vld [vmem:[#allocation20 + $0x18] sm:$0xff] }
 0x9c1   :  { %6042 = vmatprep.subr.mxu0 %v4590_v35  ;;  %v4477_v35 = vld [vmem:[#allocation20 + $0x90] sm:$0xff] }
 0x9c2   :  { %6043 = vmatpush3.msra.mxu0 %v4574_v4  ;;  %v4461_v4 = vld [vmem:[#allocation20 + $0x10] sm:$0xff] }
 0x9c3   :  { %6044 = vmatprep.subr.mxu0 %v4589_v3  ;;  %v4476_v3 = vld [vmem:[#allocation20 + $0x88] sm:$0xff] }
 0x9c4   :  { %6045 = vmatpush3.msra.mxu0 %v4573_v5  ;;  %v4460_v5 = vld [vmem:[#allocation20 + $0x8] sm:$0xff] }
 0x9c5   :  { %6046 = vmatprep.subr.mxu0 %v4588_v10  ;;  %v4475_v10 = vld [vmem:[#allocation20 + $0x80] sm:$0xff] }
 0x9c6   :  { %6047 = vmatpush3.msra.mxu0 %v4572_v54  ;;  %v4459_v54 = vld [vmem:[#allocation20] sm:$0xff] }
 0x9c7   :  { %6048 = vmatprep.subr.mxu0 %v4587_v26  ;;  %v4848_v26 = vld [vmem:[#allocation20 + $0x2f8] sm:$0xff] }
 0x9c8   :  { %6049 = vmatpush3.msra.mxu0 %v4571_v27 }
 0x9c9   :  { %6050 = vmatprep.subr.mxu0 %v4586_v56 }
 0x9ca   :  { %6051 = vmatpush3.msra.mxu0 %v4570_v25  ;;  %v4832_v25 = vld [vmem:[#allocation20 + $0x278] sm:$0xff] }
 0x9cb   :  { %6052 = vmatprep.subr.mxu0 %v4585_v7  ;;  %v4847_v7 = vld [vmem:[#allocation20 + $0x2f0] sm:$0xff] }
 0x9cc   :  { %6053 = vmatpush3.msra.mxu0 %v4569_v16 }
 0x9cd   :  { %6054 = vmatprep.subr.mxu0 %v4584_v17  ;;  %v4831_v17 = vld [vmem:[#allocation20 + $0x270] sm:$0xff] }
 0x9ce   :  { %6055 = vmatpush3.msra.mxu0 %v4568_v18  ;;  %v4846_v18 = vld [vmem:[#allocation20 + $0x2e8] sm:$0xff] }
 0xa6b   :  { %v4146_v20 = vpop.f32.mrf.mxu1 }
 0xa6c   :  { %v4151_v34 = vadd.f32 %v4146_v20, %v3935_v21  ;;  %v4845_v20 = vld [vmem:[#allocation20 + $0x2e0] sm:$0xff]  ;;  %v4741_v21 = vld [vmem:[#allocation19 + $0x8] sm:$0xf] }
 0xa6d   :  { %v4148_v23 = vpop.f32.mrf.mxu1 }
 0xa6e   :  { %v4152_v49 = vadd.f32 %v4148_v23, %v3937_v24  ;;  %v5028_v23 = vld [vmem:[#allocation20 + $0x3f8] sm:$0xff] }
 0xa6f   :  { %v4360_v45 = vpop.f32.mrf.mxu0  ;;  %v4844_v24 = vld [vmem:[#allocation20 + $0x2d8] sm:$0xff] }
 0xa70   :  { %v4365_v53 = vadd.f32 %v4360_v45, %v4151_v34  ;;  %v4828_v34 = vld [vmem:[#allocation20 + $0x258] sm:$0xff] }
 0xa71   :  { %v4362_v43 = vpop.f32.mrf.mxu0  ;;  %v4921_v45 = vld [vmem:[#allocation19 + $0xc] sm:$0xf] }
 0xa72   :  { %v4366_v60 = vadd.f32 %v4362_v43, %v4152_v49  ;;  %v4379_v46 = vadd.f32 %v4372_v36, %v4365_v53  ;;  %v4843_v36 = vld [vmem:[#allocation20 + $0x2d0] sm:$0xff]  ;;  %v5012_v49 = vld [vmem:[#allocation20 + $0x378] sm:$0xff]  ;;  %v4842_v43 = vld [vmem:[#allocation20 + $0x2c8] sm:$0xff] }
 0xa73   :  { %v4827_v53 = vld [vmem:[#allocation20 + $0x250] sm:$0xff] }
 0xa74   :  { %v4380_v47 = vadd.f32 %v4376_v39, %v4366_v60  ;;  %v7685_v51 = vmax.f32 %v4379_v46, 0.0  ;;  %v5027_v39 = vld [vmem:[#allocation20 + $0x3f0] sm:$0xff]  ;;  %v4826_v46 = vld [vmem:[#allocation20 + $0x248] sm:$0xff] }
 0xa75   :  { %v5011_v60 = vld [vmem:[#allocation20 + $0x370] sm:$0xff] }
 0xa76   :  { %v7683_v50 = vmax.f32 %v4380_v47, 0.0  ;;  %v5026_v47 = vld [vmem:[#allocation20 + $0x3e8] sm:$0xff] }
 0xa78   :  { %4418 = vmatprep.subr.mxu1 %v7683_v50  ;;  %4775 = vmatprep.subr.mxu0 %v7683_v50 }
 0xa79   :  { %4419 = vmatpush1.msra.mxu1 %v7685_v51 }
 0xa7a   :  { %5963 = vmatmul.mubr.msk.f32.vlgmr.msra.gmra.mxu1 %vm4384_vm3, %v4383_v52  ;;  %4526 = vmatprep.subr.mxu1 %v7683_v50  ;;  %v4825_v52 = vld [vmem:[#allocation20 + $0x240] sm:$0xff] }
 0xa7b   :  { %4527 = vmatpush1.msra.mxu1 %v7685_v51  ;;  %4560 = vmatprep.mubr.f32.mxu1 %v6981_v32 }
 0xa7c   :  { %6059 = vmatprep.subr.mxu1 %v4490_v12  ;;  %v5025_v12 = vld [vmem:[#allocation20 + $0x3e0] sm:$0xff] }
 0xa7e   :  { %5964 = vmatmul.mubr.msk.f32.vlgmr.msra.gmra.mxu1 %vm4384_vm3, %v4492_v29  ;;  %v4840_v29 = vld [vmem:[#allocation20 + $0x2b8] sm:$0xff] }
 0xa7f   :  { %6060 = vmatpush3.msra.mxu1 %v4474_v31  ;;  %v5009_v31 = vld [vmem:[#allocation20 + $0x360] sm:$0xff] }
 0xa80   :  { %6061 = vmatprep.subr.mxu1 %v4489_v14  ;;  %v4824_v14 = vld [vmem:[#allocation20 + $0x238] sm:$0xff] }
 0xa81   :  { %6062 = vmatpush3.msra.mxu1 %v4473_v37  ;;  %v5024_v37 = vld [vmem:[#allocation20 + $0x3d8] sm:$0xff] }
 0xa82   :  { %6063 = vmatprep.subr.mxu1 %v4488_v61  ;;  %v4839_v61 = vld [vmem:[#allocation20 + $0x2b0] sm:$0xff] }
 0xa83   :  { %6064 = vmatpush3.msra.mxu1 %v4472_v28  ;;  %v5008_v28 = vld [vmem:[#allocation20 + $0x358] sm:$0xff] }
 0xa84   :  { %6065 = vmatprep.subr.mxu1 %v4487_v55  ;;  %v4823_v55 = vld [vmem:[#allocation20 + $0x230] sm:$0xff] }
 0xa85   :  { %6066 = vmatpush3.msra.mxu1 %v4471_v40  ;;  %v5023_v40 = vld [vmem:[#allocation20 + $0x3d0] sm:$0xff] }
 0xa86   :  { %6067 = vmatprep.subr.mxu1 %v4486_v11  ;;  %v4838_v11 = vld [vmem:[#allocation20 + $0x2a8] sm:$0xff] }
 0xa87   :  { %6068 = vmatpush3.msra.mxu1 %v4470_v38  ;;  %v5007_v38 = vld [vmem:[#allocation20 + $0x350] sm:$0xff] }
 0xa88   :  { %6069 = vmatprep.subr.mxu1 %v4485_v41  ;;  %v5022_v41 = vld [vmem:[#allocation20 + $0x3c8] sm:$0xff] }
 0xa89   :  { %6070 = vmatpush3.msra.mxu1 %v4469_v57  ;;  %v5006_v57 = vld [vmem:[#allocation20 + $0x348] sm:$0xff] }
 0xa8a   :  { %6071 = vmatprep.subr.mxu1 %v4484_v1  ;;  %v5021_v1 = vld [vmem:[#allocation20 + $0x3c0] sm:$0xff] }
 0xa8b   :  { %6072 = vmatpush3.msra.mxu1 %v4468_v58  ;;  %v5005_v58 = vld [vmem:[#allocation20 + $0x340] sm:$0xff] }
 0xa8c   :  { %6073 = vmatprep.subr.mxu1 %v4483_v44  ;;  %v5020_v44 = vld [vmem:[#allocation20 + $0x3b8] sm:$0xff] }
 0xa8d   :  { %6074 = vmatpush3.msra.mxu1 %v4467_v2  ;;  %v4822_v2 = vld [vmem:[#allocation20 + $0x228] sm:$0xff] }
 0xa8e   :  { %6075 = vmatprep.subr.mxu1 %v4482_v59  ;;  %v5004_v59 = vld [vmem:[#allocation20 + $0x338] sm:$0xff] }
 0xa8f   :  { %6076 = vmatpush3.msra.mxu1 %v4466_v30  ;;  %v4837_v30 = vld [vmem:[#allocation20 + $0x2a0] sm:$0xff] }
 0xa90   :  { %6077 = vmatprep.subr.mxu1 %v4481_v48  ;;  %v5019_v48 = vld [vmem:[#allocation20 + $0x3b0] sm:$0xff] }
 0xa91   :  { %6078 = vmatpush3.msra.mxu1 %v4465_v33  ;;  %v4821_v33 = vld [vmem:[#allocation20 + $0x220] sm:$0xff] }
 0xa92   :  { %6079 = vmatprep.subr.mxu1 %v4480_v62  ;;  %v5003_v62 = vld [vmem:[#allocation20 + $0x330] sm:$0xff] }
 0xa93   :  { %6080 = vmatpush3.msra.mxu1 %v4464_v42  ;;  %v4836_v42 = vld [vmem:[#allocation20 + $0x298] sm:$0xff] }
 0xa94   :  { %6081 = vmatprep.subr.mxu1 %v4479_v63  ;;  %v5018_v63 = vld [vmem:[#allocation20 + $0x3a8] sm:$0xff] }
 0xa95   :  { %6082 = vmatpush3.msra.mxu1 %v4463_v9  ;;  %v4820_v9 = vld [vmem:[#allocation20 + $0x218] sm:$0xff] }
 0xa96   :  { %6083 = vmatprep.subr.mxu1 %v4478_v13  ;;  %v5002_v13 = vld [vmem:[#allocation20 + $0x328] sm:$0xff] }
 0xa97   :  { %6084 = vmatpush3.msra.mxu1 %v4462_v0  ;;  %v4835_v0 = vld [vmem:[#allocation20 + $0x290] sm:$0xff] }
 0xa98   :  { %6085 = vmatprep.subr.mxu1 %v4477_v35  ;;  %v5017_v35 = vld [vmem:[#allocation20 + $0x3a0] sm:$0xff] }
 0xa99   :  { %6086 = vmatpush3.msra.mxu1 %v4461_v4  ;;  %v4819_v4 = vld [vmem:[#allocation20 + $0x210] sm:$0xff] }
 0xa9a   :  { %6087 = vmatprep.subr.mxu1 %v4476_v3  ;;  %v5001_v3 = vld [vmem:[#allocation20 + $0x320] sm:$0xff] }
 0xa9b   :  { %6088 = vmatpush3.msra.mxu1 %v4460_v5  ;;  %v4834_v5 = vld [vmem:[#allocation20 + $0x288] sm:$0xff] }
 0xa9c   :  { %6089 = vmatprep.subr.mxu1 %v4475_v10  ;;  %v5016_v10 = vld [vmem:[#allocation20 + $0x398] sm:$0xff] }
 0xa9d   :  { %6090 = vmatpush3.msra.mxu1 %v4459_v54  ;;  %v4818_v54 = vld [vmem:[#allocation20 + $0x208] sm:$0xff] }
 0xa9e   :  { %6094 = vmatprep.subr.mxu1 %v4848_v26  ;;  %v5000_v26 = vld [vmem:[#allocation20 + $0x318] sm:$0xff] }
 0xb3a   :  { %v4454_v27 = vpop.f32.mrf.mxu1 }
 0xb3c   :  { %v4456_v56 = vpop.f32.mrf.mxu1 }
 0xb3d   :  { %4734 = vmatprep.mubr.f32.mxu1 %v4456_v56  ;;  %v5015_v56 = vld [vmem:[#allocation20 + $0x390] sm:$0xff] }
 0xb3e   :  { %v4562_v16 = vpop.f32.mrf.mxu1  ;;  %4735 = vmatmul.mubr.f32.vlgmr.msra.gmra.mxu1 %v4454_v27  ;;  %v4833_v27 = vld [vmem:[#allocation20 + $0x280] sm:$0xff] }
 0xb3f   :  { %6095 = vmatpush3.msra.mxu1 %v4832_v25  ;;  %v4817_v25 = vld [vmem:[#allocation20 + $0x200] sm:$0xff] }
 0xb40   :  { %v4564_v8 = vpop.f32.mrf.mxu1  ;;  %6096 = vmatprep.subr.mxu1 %v4847_v7  ;;  %v4999_v7 = vld [vmem:[#allocation20 + $0x310] sm:$0xff] }
 0xb41   :  { %4664 = vmatprep.mubr.f32.mxu0 %v4564_v8  ;;  %6097 = vmatpush3.msra.mxu1 %v4831_v17  ;;  %v4998_v17 = vld [vmem:[#allocation20 + $0x308] sm:$0xff]  ;;  %v4997_v8 = vld [vmem:[#allocation20 + $0x300] sm:$0xff] }
 0xb42   :  { %4665 = vmatmul.mubr.f32.vlgmr.msra.gmra.mxu0 %v4562_v16  ;;  %6098 = vmatprep.subr.mxu1 %v4846_v18  ;;  %v5014_v16 = vld [vmem:[#allocation20 + $0x388] sm:$0xff]  ;;  %v5013_v18 = vld [vmem:[#allocation20 + $0x380] sm:$0xff] }
 0xb43   :  { %4776 = vmatpush1.msra.mxu0 %v7685_v51  ;;  %4809 = vmatprep.mubr.f32.mxu0 %v6981_v32 }
 0xb44   :  { %4955 = vmatprep.subr.mxu0 %v7683_v50  ;;  %6099 = vmatpush3.msra.mxu1 %v4830_v19  ;;  %v4841_v50 = vld [vmem:[#allocation20 + $0x2c0] sm:$0xff] }
 0xb45   :  { %6100 = vmatprep.subr.mxu1 %v4845_v20 }
 0xb46   :  { %5965 = vmatmul.mubr.msk.f32.vlgmr.msra.gmra.mxu0 %vm4384_vm3, %v4741_v21  ;;  %6101 = vmatpush3.msra.mxu1 %v4829_v22 }
 0xb47   :  { %4956 = vmatpush1.msra.mxu0 %v7685_v51  ;;  %4989 = vmatprep.mubr.f32.mxu0 %v6981_v32  ;;  %v5010_v51 = vld [vmem:[#allocation20 + $0x368] sm:$0xff] }
 0xb48   :  { %6129 = vmatprep.subr.mxu0 %v5028_v23  ;;  %6102 = vmatprep.subr.mxu1 %v4844_v24 }
 0xb49   :  { %6103 = vmatpush3.msra.mxu1 %v4828_v34 }
 0xb4a   :  { %5966 = vmatmul.mubr.msk.f32.vlgmr.msra.gmra.mxu0 %vm4384_vm3, %v4921_v45  ;;  %6104 = vmatprep.subr.mxu1 %v4843_v36  ;;  %v5325_v45 = vld [vmem:[#allocation28 + $0xf8] sm:$0xff]  ;;  %v5324_v36 = vld [vmem:[#allocation28 + $0xf0] sm:$0xff] }
 0xb4b   :  { %6130 = vmatpush3.msra.mxu0 %v5012_v49  ;;  %6105 = vmatpush3.msra.mxu1 %v4827_v53  ;;  %v5323_v49 = vld [vmem:[#allocation28 + $0xe8] sm:$0xff]  ;;  %v5322_v53 = vld [vmem:[#allocation28 + $0xe0] sm:$0xff] }
 0xb4c   :  { %6131 = vmatprep.subr.mxu0 %v5027_v39  ;;  %6106 = vmatprep.subr.mxu1 %v4842_v43  ;;  %v5321_v39 = vld [vmem:[#allocation28 + $0xd8] sm:$0xff]  ;;  %v5320_v43 = vld [vmem:[#allocation28 + $0xd0] sm:$0xff] }
 0xb4d   :  { %6132 = vmatpush3.msra.mxu0 %v5011_v60  ;;  %6107 = vmatpush3.msra.mxu1 %v4826_v46  ;;  %v5319_v60 = vld [vmem:[#allocation28 + $0xc8] sm:$0xff]  ;;  %v5318_v46 = vld [vmem:[#allocation28 + $0xc0] sm:$0xff] }
 0xb4e   :  { %6133 = vmatprep.subr.mxu0 %v5026_v47  ;;  %6108 = vmatprep.subr.mxu1 %v4841_v50  ;;  %v5317_v47 = vld [vmem:[#allocation28 + $0xb8] sm:$0xff]  ;;  %v5316_v50 = vld [vmem:[#allocation28 + $0xb0] sm:$0xff] }
 0xb4f   :  { %6134 = vmatpush3.msra.mxu0 %v5010_v51  ;;  %6109 = vmatpush3.msra.mxu1 %v4825_v52  ;;  %v5315_v51 = vld [vmem:[#allocation28 + $0xa8] sm:$0xff]  ;;  %v5314_v52 = vld [vmem:[#allocation28 + $0xa0] sm:$0xff] }
 0xb50   :  { %6135 = vmatprep.subr.mxu0 %v5025_v12  ;;  %6110 = vmatprep.subr.mxu1 %v4840_v29  ;;  %v5313_v12 = vld [vmem:[#allocation28 + $0x98] sm:$0xff]  ;;  %v5312_v29 = vld [vmem:[#allocation28 + $0x90] sm:$0xff] }
 0xb51   :  { %6136 = vmatpush3.msra.mxu0 %v5009_v31  ;;  %6111 = vmatpush3.msra.mxu1 %v4824_v14  ;;  %v5311_v31 = vld [vmem:[#allocation28 + $0x88] sm:$0xff]  ;;  %v5310_v14 = vld [vmem:[#allocation28 + $0x80] sm:$0xff] }
 0xb52   :  { %6137 = vmatprep.subr.mxu0 %v5024_v37  ;;  %6112 = vmatprep.subr.mxu1 %v4839_v61  ;;  %v5309_v37 = vld [vmem:[#allocation28 + $0x78] sm:$0xff]  ;;  %v5308_v61 = vld [vmem:[#allocation28 + $0x70] sm:$0xff] }
 0xb53   :  { %6138 = vmatpush3.msra.mxu0 %v5008_v28  ;;  %6113 = vmatpush3.msra.mxu1 %v4823_v55  ;;  %v5307_v28 = vld [vmem:[#allocation28 + $0x68] sm:$0xff]  ;;  %v5306_v55 = vld [vmem:[#allocation28 + $0x60] sm:$0xff] }
 0xb54   :  { %6139 = vmatprep.subr.mxu0 %v5023_v40  ;;  %6114 = vmatprep.subr.mxu1 %v4838_v11  ;;  %v5305_v40 = vld [vmem:[#allocation28 + $0x58] sm:$0xff]  ;;  %v5304_v11 = vld [vmem:[#allocation28 + $0x50] sm:$0xff] }
 0xb55   :  { %6140 = vmatpush3.msra.mxu0 %v5007_v38  ;;  %6115 = vmatpush3.msra.mxu1 %v4822_v2  ;;  %v5303_v38 = vld [vmem:[#allocation28 + $0x48] sm:$0xff] }
 0xb56   :  { %6141 = vmatprep.subr.mxu0 %v5022_v41  ;;  %6116 = vmatprep.subr.mxu1 %v4837_v30  ;;  %v5302_v41 = vld [vmem:[#allocation28 + $0x40] sm:$0xff] }
 0xb57   :  { %6142 = vmatpush3.msra.mxu0 %v5006_v57  ;;  %6117 = vmatpush3.msra.mxu1 %v4821_v33  ;;  %v5301_v57 = vld [vmem:[#allocation28 + $0x38] sm:$0xff] }
 0xb58   :  { %6143 = vmatprep.subr.mxu0 %v5021_v1  ;;  %6118 = vmatprep.subr.mxu1 %v4836_v42  ;;  %v5300_v1 = vld [vmem:[#allocation28 + $0x30] sm:$0xff] }
 0xb59   :  { %6144 = vmatpush3.msra.mxu0 %v5005_v58  ;;  %6119 = vmatpush3.msra.mxu1 %v4820_v9  ;;  %v5299_v58 = vld [vmem:[#allocation28 + $0x28] sm:$0xff] }
 0xb5a   :  { %6145 = vmatprep.subr.mxu0 %v5020_v44  ;;  %6120 = vmatprep.subr.mxu1 %v4835_v0  ;;  %v5967_v0 = vld [vmem:[#allocation22] ss:$0 sm:$0xff] }
 0xb5b   :  { %6146 = vmatpush3.msra.mxu0 %v5004_v59  ;;  %6121 = vmatpush3.msra.mxu1 %v4819_v4 }
 0xb5c   :  { %6147 = vmatprep.subr.mxu0 %v5019_v48  ;;  %6122 = vmatprep.subr.mxu1 %v4834_v5  ;;  %v5109_v5 = vld [vmem:[#allocation23] sm:$0x3] }
 0xb5d   :  { %6148 = vmatpush3.msra.mxu0 %v5003_v62  ;;  %6123 = vmatpush3.msra.mxu1 %v4818_v54  ;;  %v5188_v54 = vld [vmem:[#allocation25] sm:$0x3] }
 0xb5e   :  { %6149 = vmatprep.subr.mxu0 %v5018_v63  ;;  %6124 = vmatprep.subr.mxu1 %v4833_v27  ;;  %v5291_v27 = vld [vmem:[#allocation26 + $0xe8] sm:$0xff] }
 0xb5f   :  { %6150 = vmatpush3.msra.mxu0 %v5002_v13  ;;  %6125 = vmatpush3.msra.mxu1 %v4817_v25  ;;  %v5289_v25 = vld [vmem:[#allocation26 + $0xd8] sm:$0xff] }
 0xb60   :  { %6151 = vmatprep.subr.mxu0 %v5017_v35  ;;  %6326 = vmatprep.subr.mxu1 %v6981_v32 }
 0xb61   :  { %6152 = vmatpush3.msra.mxu0 %v5001_v3 }
 0xb62   :  { %6153 = vmatprep.subr.mxu0 %v5016_v10  ;;  %v5293_v10 = vld [vmem:[#allocation26 + $0xf8] sm:$0xff] }
 0xb63   :  { %6154 = vmatpush3.msra.mxu0 %v5000_v26  ;;  %v5292_v26 = vld [vmem:[#allocation26 + $0xf0] sm:$0xff] }
 0xb64   :  { %6155 = vmatprep.subr.mxu0 %v5015_v56  ;;  %v5290_v56 = vld [vmem:[#allocation26 + $0xe0] sm:$0xff] }
 0xb65   :  { %6156 = vmatpush3.msra.mxu0 %v4999_v7  ;;  %v5288_v7 = vld [vmem:[#allocation26 + $0xd0] sm:$0xff] }
 0xb66   :  { %6157 = vmatprep.subr.mxu0 %v5014_v16  ;;  %v5287_v16 = vld [vmem:[#allocation26 + $0xc8] sm:$0xff] }
 0xb67   :  { %6158 = vmatpush3.msra.mxu0 %v4998_v17  ;;  %v5286_v17 = vld [vmem:[#allocation26 + $0xc0] sm:$0xff] }
 0xb68   :  { %6159 = vmatprep.subr.mxu0 %v5013_v18  ;;  %v5285_v18 = vld [vmem:[#allocation26 + $0xb8] sm:$0xff] }
 0xb69   :  { %6160 = vmatpush3.msra.mxu0 %v4997_v8  ;;  %v5284_v8 = vld [vmem:[#allocation26 + $0xb0] sm:$0xff] }
 0xb6a   :  { %5326 = vmatprep.subr.mxu0 %v5325_v45  ;;  %v5276_v45 = vld [vmem:[#allocation26 + $0x70] sm:$0xff] }
 0xbfe   :  { %v6091_v44 = vpop.f32.mrf.mxu1 }
 0xc00   :  { %v6092_v2 = vpop.f32.mrf.mxu1 }
 0xc01   :  { %v6093_v48 = vadd.f32 %v6092_v2, %v6091_v44  ;;  %v5497_v2 = vld [vmem:[%s7945_s18 + $0x68] sm:$0xff] }
 0xc02   :  { %v6056_v19 = vpop.f32.mrf.mxu0 }
 0xc04   :  { %v6057_v20 = vpop.f32.mrf.mxu0 }
 0xc05   :  { %v7703_v21 = vadd.f32 %v6057_v20, %v6056_v19  ;;  %v5283_v19 = vld [vmem:[#allocation26 + $0xa8] sm:$0xff]  ;;  %v5282_v20 = vld [vmem:[#allocation26 + $0xa0] sm:$0xff] }
 0xc06   :  { %v4811_v22 = vpop.f32.mrf.mxu0 }
 0xc07   :  { %v4737_v42 = vadd.f32 %v6093_v48, %v7703_v21  ;;  %v5281_v21 = vld [vmem:[#allocation26 + $0x98] sm:$0xff] }
 0xc08   :  { %v4813_v23 = vpop.f32.mrf.mxu0  ;;  %v5511_v48 = vld [vmem:[%s7945_s18 + $0xd8] sm:$0xff] }
 0xc09   :  { %4913 = vmatprep.mubr.f32.mxu1 %v4813_v23  ;;  %v5279_v23 = vld [vmem:[#allocation26 + $0x88] sm:$0xff] }
 0xc0a   :  { %4914 = vmatmul.mubr.f32.vlgmr.msra.gmra.mxu1 %v4811_v22  ;;  %v4991_v24 = vpop.f32.mrf.mxu0  ;;  %v5280_v22 = vld [vmem:[#allocation26 + $0x90] sm:$0xff] }
 0xc0b   :  { %6328 = vmatprep.mubr.msk.f32.mxu1 %vm6982_vm4, %v6981_v32 }
 0xc0c   :  { %v4993_v34 = vpop.f32.mrf.mxu0 }
 0xc0d   :  { %5093 = vmatprep.mubr.f32.mxu0 %v4993_v34  ;;  %v5277_v34 = vld [vmem:[#allocation26 + $0x78] sm:$0xff] }
 0xc0e   :  { %5094 = vmatmul.mubr.f32.vlgmr.msra.gmra.mxu0 %v4991_v24  ;;  %v5278_v24 = vld [vmem:[#allocation26 + $0x80] sm:$0xff] }
 0xc0f   :  { %5390 = vmatprep.mubr.f32.mxu0 %v6981_v32  ;;  %5327 = vmatpush1.msra.mxu0 %v5324_v36  ;;  %v5275_v36 = vld [vmem:[#allocation26 + $0x68] sm:$0xff] }
 0xc10   :  { %5328 = vmatprep.subr.mxu0 %v5323_v49  ;;  %v5274_v49 = vld [vmem:[#allocation26 + $0x60] sm:$0xff] }
 0xc11   :  { %5329 = vmatpush1.msra.mxu0 %v5322_v53  ;;  %v5273_v53 = vld [vmem:[#allocation26 + $0x58] sm:$0xff] }
 0xc12   :  { %5330 = vmatprep.subr.mxu0 %v5321_v39  ;;  %v5272_v39 = vld [vmem:[#allocation26 + $0x50] sm:$0xff] }
 0xc13   :  { %5331 = vmatpush1.msra.mxu0 %v5320_v43  ;;  %v5271_v43 = vld [vmem:[#allocation26 + $0x48] sm:$0xff] }
 0xc14   :  { %5332 = vmatprep.subr.mxu0 %v5319_v60  ;;  %v5270_v60 = vld [vmem:[#allocation26 + $0x40] sm:$0xff] }
 0xc15   :  { %5333 = vmatpush1.msra.mxu0 %v5318_v46  ;;  %v5269_v46 = vld [vmem:[#allocation26 + $0x38] sm:$0xff] }
 0xc16   :  { %5334 = vmatprep.subr.mxu0 %v5317_v47  ;;  %v5268_v47 = vld [vmem:[#allocation26 + $0x30] sm:$0xff] }
 0xc17   :  { %5335 = vmatpush1.msra.mxu0 %v5316_v50  ;;  %v5267_v50 = vld [vmem:[#allocation26 + $0x28] sm:$0xff] }
 0xc18   :  { %5336 = vmatprep.subr.mxu0 %v5315_v51  ;;  %v5266_v51 = vld [vmem:[#allocation26 + $0x20] sm:$0xff] }
 0xc19   :  { %5337 = vmatpush1.msra.mxu0 %v5314_v52  ;;  %v5265_v52 = vld [vmem:[#allocation26 + $0x18] sm:$0xff] }
 0xc1a   :  { %5338 = vmatprep.subr.mxu0 %v5313_v12  ;;  %v5264_v12 = vld [vmem:[#allocation26 + $0x10] sm:$0xff] }
 0xc1b   :  { %5339 = vmatpush1.msra.mxu0 %v5312_v29  ;;  %v5263_v29 = vld [vmem:[#allocation26 + $0x8] sm:$0xff] }
 0xc1c   :  { %5340 = vmatprep.subr.mxu0 %v5311_v31  ;;  %v5298_v31 = vld [vmem:[#allocation28 + $0x20] sm:$0xff] }
 0xc1d   :  { %5341 = vmatpush1.msra.mxu0 %v5310_v14  ;;  %v5297_v14 = vld [vmem:[#allocation28 + $0x18] sm:$0xff] }
 0xc1e   :  { %5342 = vmatprep.subr.mxu0 %v5309_v37  ;;  %v5262_v37 = vld [vmem:[#allocation26] sm:$0xff] }
 0xc1f   :  { %5343 = vmatpush1.msra.mxu0 %v5308_v61  ;;  %v5296_v61 = vld [vmem:[#allocation28 + $0x10] sm:$0xff] }
 0xc20   :  { %5344 = vmatprep.subr.mxu0 %v5307_v28  ;;  %v5295_v28 = vld [vmem:[#allocation28 + $0x8] sm:$0xff] }
 0xc21   :  { %5345 = vmatpush1.msra.mxu0 %v5306_v55  ;;  %v5294_v55 = vld [vmem:[#allocation28] sm:$0xff] }
 0xc22   :  { %5346 = vmatprep.subr.mxu0 %v5305_v40  ;;  %v5515_v40 = vld [vmem:[%s7945_s18 + $0xf8] sm:$0xff] }
 0xc23   :  { %5347 = vmatpush1.msra.mxu0 %v5304_v11 }
 0xc24   :  { %5348 = vmatprep.subr.mxu0 %v5303_v38 }
 0xc25   :  { %5349 = vmatpush1.msra.mxu0 %v5302_v41  ;;  %v5499_v41 = vld [vmem:[%s7945_s18 + $0x78] sm:$0xff] }
 0xc26   :  { %5350 = vmatprep.subr.mxu0 %v5301_v57 }
 0xc27   :  { %5351 = vmatpush1.msra.mxu0 %v5300_v1  ;;  %v5514_v1 = vld [vmem:[%s7945_s18 + $0xf0] sm:$0xff] }
 0xc28   :  { %5352 = vmatprep.subr.mxu0 %v5299_v58  ;;  %v5498_v58 = vld [vmem:[%s7945_s18 + $0x70] sm:$0xff] }
 0xc29   :  { %5353 = vmatpush1.msra.mxu0 %v5298_v31  ;;  %v5599_v31 = vld [vmem:[#allocation32] sm:$0xff] }
 0xc2a   :  { %5354 = vmatprep.subr.mxu0 %v5297_v14  ;;  %v5726_v14 = vld [vmem:[%s7949_s22 + $0xf8] sm:$0xff] }
 0xc2b   :  { %5355 = vmatpush1.msra.mxu0 %v5296_v61  ;;  %v5972_v61 = vld [vmem:[#allocation31] ss:$0 sm:$0xff] }
 0xc2c   :  { %5356 = vmatprep.subr.mxu0 %v5295_v28 }
 0xc2d   :  { %5357 = vmatpush1.msra.mxu0 %v5294_v55 }
 0xc2e   :  { %6168 = vmatprep.subr.mxu0 %v5515_v40 }
 0xcca   :  { %v6126_v59 = vpop.f32.mrf.mxu1 }
 0xccc   :  { %v6127_v30 = vpop.f32.mrf.mxu1 }
 0xccd   :  { %v6128_v33 = vadd.f32 %v6127_v30, %v6126_v59  ;;  %v5512_v59 = vld [vmem:[%s7945_s18 + $0xe0] sm:$0xff] }
 0xcce   :  { %v6161_v62 = vpop.f32.mrf.mxu0  ;;  %v5496_v30 = vld [vmem:[%s7945_s18 + $0x60] sm:$0xff] }
 0xccf   :  { %v4919_v9 = vadd.f32 %v6128_v33, %v4737_v42  ;;  %v5495_v33 = vld [vmem:[%s7945_s18 + $0x58] sm:$0xff]  ;;  %v5494_v42 = vld [vmem:[%s7945_s18 + $0x50] sm:$0xff] }
 0xcd0   :  { %v6162_v63 = vpop.f32.mrf.mxu0 }
 0xcd1   :  { %v6163_v13 = vadd.f32 %v6162_v63, %v6161_v62  ;;  %v5510_v62 = vld [vmem:[%s7945_s18 + $0xd0] sm:$0xff]  ;;  %v5509_v63 = vld [vmem:[%s7945_s18 + $0xc8] sm:$0xff] }
 0xcd3   :  { %v5099_v35 = vadd.f32 %v6163_v13, %v4919_v9  ;;  %v5493_v9 = vld [vmem:[%s7945_s18 + $0x48] sm:$0xff]  ;;  %v5508_v13 = vld [vmem:[%s7945_s18 + $0xc0] sm:$0xff] }
 0xcd5   :  { %v5107_v4 = vadd.f32 %v5967_v0, %v5099_v35  ;;  %v5492_v0 = vld [vmem:[%s7945_s18 + $0x40] sm:$0xff]  ;;  %v5507_v35 = vld [vmem:[%s7945_s18 + $0xb8] sm:$0xff] }
 0xcd7   :  { %v5108_v3 = vmax.f32 %v5107_v4, 0.0  ;;  %v5491_v4 = vld [vmem:[%s7945_s18 + $0x38] sm:$0xff] }
 0xcd9   :  { %6327 = vmatpush3.msk.msra.mxu1 %vm5114_vm5, %v5108_v3 }
 0xcda   :  { %6329 = vmatmul.mubr.msk.f32.vlgmr.msra.gmra.mxu1 %vm5110_vm6, %v5109_v5  ;;  %6331 = vmatprep.subr.mxu1 %v6981_v32  ;;  %v5490_v5 = vld [vmem:[%s7945_s18 + $0x30] sm:$0xff] }
 0xcdb   :  { %6332 = vmatpush3.msk.msra.mxu1 %vm5114_vm5, %v5108_v3  ;;  %6333 = vmatprep.mubr.msk.f32.mxu1 %vm6982_vm4, %v6981_v32  ;;  %v5506_v3 = vld [vmem:[%s7945_s18 + $0xb0] sm:$0xff] }
 0xcdc   :  { %5397 = vmatprep.subr.mxu1 %v5293_v10  ;;  %v5505_v10 = vld [vmem:[%s7945_s18 + $0xa8] sm:$0xff] }
 0xcde   :  { %6334 = vmatmul.mubr.msk.f32.vlgmr.msra.gmra.mxu1 %vm5110_vm6, %v5188_v54  ;;  %v5489_v54 = vld [vmem:[%s7945_s18 + $0x28] sm:$0xff] }
 0xcdf   :  { %5398 = vmatpush1.msra.mxu1 %v5292_v26  ;;  %5461 = vmatprep.mubr.f32.mxu1 %v6981_v32  ;;  %v5504_v26 = vld [vmem:[%s7945_s18 + $0xa0] sm:$0xff] }
 0xce0   :  { %5399 = vmatprep.subr.mxu1 %v5291_v27  ;;  %v5488_v27 = vld [vmem:[%s7945_s18 + $0x20] sm:$0xff] }
 0xce1   :  { %5400 = vmatpush1.msra.mxu1 %v5290_v56  ;;  %v5503_v56 = vld [vmem:[%s7945_s18 + $0x98] sm:$0xff] }
 0xce2   :  { %5401 = vmatprep.subr.mxu1 %v5289_v25  ;;  %v5487_v25 = vld [vmem:[%s7945_s18 + $0x18] sm:$0xff] }
 0xce3   :  { %5402 = vmatpush1.msra.mxu1 %v5288_v7  ;;  %v5502_v7 = vld [vmem:[%s7945_s18 + $0x90] sm:$0xff] }
 0xce4   :  { %5403 = vmatprep.subr.mxu1 %v5287_v16  ;;  %v5486_v16 = vld [vmem:[%s7945_s18 + $0x10] sm:$0xff] }
 0xce5   :  { %5404 = vmatpush1.msra.mxu1 %v5286_v17  ;;  %v5501_v17 = vld [vmem:[%s7945_s18 + $0x88] sm:$0xff] }
 0xce6   :  { %5405 = vmatprep.subr.mxu1 %v5285_v18  ;;  %v5485_v18 = vld [vmem:[%s7945_s18 + $0x8] sm:$0xff] }
 0xce7   :  { %5406 = vmatpush1.msra.mxu1 %v5284_v8  ;;  %v5500_v8 = vld [vmem:[%s7945_s18 + $0x80] sm:$0xff] }
 0xce8   :  { %5407 = vmatprep.subr.mxu1 %v5283_v19  ;;  %v5484_v19 = vld [vmem:[%s7945_s18] sm:$0xff] }
 0xce9   :  { %5408 = vmatpush1.msra.mxu1 %v5282_v20  ;;  %v5468_v20 = vld [vmem:[#allocation29] sm:$0x3] }
 0xcea   :  { %5409 = vmatprep.subr.mxu1 %v5281_v21 }
 0xceb   :  { %5410 = vmatpush1.msra.mxu1 %v5280_v22 }
 0xcec   :  { %5411 = vmatprep.subr.mxu1 %v5279_v23  ;;  %v5473_v23 = vrot.slane %v5468_v20, %v7450_v6 }
 0xced   :  { %5412 = vmatpush1.msra.mxu1 %v5278_v24 }
 0xcee   :  { %5413 = vmatprep.subr.mxu1 %v5277_v34  ;;  %v5477_v34 = vrot.slane %v5468_v20, %v7452_v15  ;;  %v5807_v20 = vld [vmem:[#allocation37] sm:$0x3] }
 0xcef   :  { %5414 = vmatpush1.msra.mxu1 %v5276_v45  ;;  %5809 = vrot.lane.b32.xlu0 %v5807_v20, %s6953_s10  ;;  %s6984_s10 = smov [#allocation39]  }
 0xcf0   :  { %5415 = vmatprep.subr.mxu1 %v5275_v36  ;;  %s5844_s21 = sshll.u32 %s6984_s10, 4  ;;  %s5845_s21 = int_to_ptr.vmem [resolvable:$true] %s5844_s21 }
 0xcf1   :  { %5416 = vmatpush1.msra.mxu1 %v5274_v49  ;;  %s6840_s24 = scalar_lea.vmem %s5845_s21, 32  ;;  %p6845_p4 = scmp.lt.s32.totalorder %s5845_s21, %s5845_s21 }
 0xcf2   :  { %5417 = vmatprep.subr.mxu1 %v5273_v53  ;;  %p6841_p3 = scmp.ne.s32.totalorder %s5845_s21, %s6840_s24  ;;  %p6846_p5 = scmp.lt.s32.totalorder %s6840_s24, %s6840_s24 }
 0xcf3   :  { %5418 = vmatpush1.msra.mxu1 %v5272_v39 }
 0xcf4   :  { %5419 = vmatprep.subr.mxu1 %v5271_v43  ;;  %p6847_p6 = por %p6846_p5, %p6845_p4 }
 0xcf5   :  { %5420 = vmatpush1.msra.mxu1 %v5270_v60 }
 0xcf6   :  { %5421 = vmatprep.subr.mxu1 %v5269_v46  ;;  %v5606_v46 = vld [vmem:[#allocation32 + $0x38] sm:$0xff]  ;;  %p6848_p7 = pnand %p6847_p6, %p6841_p3 }
 0xcf7   :  { %5422 = vmatpush1.msra.mxu1 %v5268_v47  ;;  %v5605_v47 = vld [vmem:[#allocation32 + $0x30] sm:$0xff] }
 0xcf8   :  { %5423 = vmatprep.subr.mxu1 %v5267_v50  ;;  %v5604_v50 = vld [vmem:[#allocation32 + $0x28] sm:$0xff] }
 0xcf9   :  { %5424 = vmatpush1.msra.mxu1 %v5266_v51  ;;  %v5603_v51 = vld [vmem:[#allocation32 + $0x20] sm:$0xff] }
 0xcfa   :  { %5425 = vmatprep.subr.mxu1 %v5265_v52  ;;  %v5602_v52 = vld [vmem:[#allocation32 + $0x18] sm:$0xff] }
 0xcfb   :  { %5426 = vmatpush1.msra.mxu1 %v5264_v12  ;;  %v5601_v12 = vld [vmem:[#allocation32 + $0x10] sm:$0xff] }
 0xcfc   :  { %5427 = vmatprep.subr.mxu1 %v5263_v29  ;;  %v5600_v29 = vld [vmem:[#allocation32 + $0x8] sm:$0xff] }
 0xcfd   :  { %5428 = vmatpush1.msra.mxu1 %v5262_v37 }
 0xcfe   :  { %5646 = vmatprep.subr.mxu1 %v5606_v46 }
 0xd9a   :  { %v5184_v11 = vpop.f32.mrf.mxu1 }
 0xd9b   :  { %5462 = vmatmul.mubr.f32.vlgmr.msra.gmra.mxu1 %v5184_v11 }
 0xd9c   :  { %v6330_v38 = vpop.f32.mrf.mxu1  ;;  %5686 = vmatprep.mubr.f32.mxu1 %v6981_v32  ;;  %v5513_v32 = vld [vmem:[%s7945_s18 + $0xe8] sm:$0xff]  ;;  %5647 = vmatpush1.msra.mxu1 %v5605_v47 }
 0xd9d   :  { %5648 = vmatprep.subr.mxu1 %v5604_v50 }
 0xd9e   :  { %v5258_v57 = vpop.f32.mrf.mxu1  ;;  %5649 = vmatpush1.msra.mxu1 %v5603_v51 }
 0xd9f   :  { %5391 = vmatmul.mubr.f32.vlgmr.msra.gmra.mxu0 %v5258_v57  ;;  %5650 = vmatprep.subr.mxu1 %v5602_v52  ;;  %v5710_v57 = vld [vmem:[%s7949_s22 + $0x78] sm:$0xff] }
 0xda0   :  { %v6335_v44 = vpop.f32.mrf.mxu1  ;;  %6169 = vmatpush3.msra.mxu0 %v5499_v41  ;;  %5651 = vmatpush1.msra.mxu1 %v5601_v12 }
 0xda1   :  { %6170 = vmatprep.subr.mxu0 %v5514_v1  ;;  %5652 = vmatprep.subr.mxu1 %v5600_v29  ;;  %v5709_v44 = vld [vmem:[%s7949_s22 + $0x70] sm:$0xff] }
 0xda2   :  { %6171 = vmatpush3.msra.mxu0 %v5498_v58  ;;  %5653 = vmatpush1.msra.mxu1 %v5599_v31  ;;  %v5725_v58 = vld [vmem:[%s7949_s22 + $0xf0] sm:$0xff] }
 0xda3   :  { %6172 = vmatprep.subr.mxu0 %v5513_v32  ;;  %6203 = vmatprep.subr.mxu1 %v5726_v14  ;;  %v5724_v32 = vld [vmem:[%s7949_s22 + $0xe8] sm:$0xff] }
 0xda4   :  { %6173 = vmatpush3.msra.mxu0 %v5497_v2  ;;  %v5708_v2 = vld [vmem:[%s7949_s22 + $0x68] sm:$0xff] }
 0xda5   :  { %6174 = vmatprep.subr.mxu0 %v5512_v59  ;;  %v5723_v59 = vld [vmem:[%s7949_s22 + $0xe0] sm:$0xff] }
 0xda6   :  { %6175 = vmatpush3.msra.mxu0 %v5496_v30  ;;  %v5707_v30 = vld [vmem:[%s7949_s22 + $0x60] sm:$0xff] }
 0xda7   :  { %6176 = vmatprep.subr.mxu0 %v5511_v48  ;;  %v5722_v48 = vld [vmem:[%s7949_s22 + $0xd8] sm:$0xff] }
 0xda8   :  { %6177 = vmatpush3.msra.mxu0 %v5495_v33  ;;  %v5706_v33 = vld [vmem:[%s7949_s22 + $0x58] sm:$0xff] }
 0xda9   :  { %6178 = vmatprep.subr.mxu0 %v5510_v62  ;;  %v5721_v62 = vld [vmem:[%s7949_s22 + $0xd0] sm:$0xff] }
 0xdaa   :  { %6179 = vmatpush3.msra.mxu0 %v5494_v42  ;;  %v5705_v42 = vld [vmem:[%s7949_s22 + $0x50] sm:$0xff] }
 0xdab   :  { %6180 = vmatprep.subr.mxu0 %v5509_v63  ;;  %v5720_v63 = vld [vmem:[%s7949_s22 + $0xc8] sm:$0xff] }
 0xdac   :  { %6181 = vmatpush3.msra.mxu0 %v5493_v9  ;;  %v5704_v9 = vld [vmem:[%s7949_s22 + $0x48] sm:$0xff] }
 0xdad   :  { %6182 = vmatprep.subr.mxu0 %v5508_v13  ;;  %v5719_v13 = vld [vmem:[%s7949_s22 + $0xc0] sm:$0xff] }
 0xdae   :  { %6183 = vmatpush3.msra.mxu0 %v5492_v0  ;;  %v5703_v0 = vld [vmem:[%s7949_s22 + $0x40] sm:$0xff] }
 0xdaf   :  { %6184 = vmatprep.subr.mxu0 %v5507_v35  ;;  %v5718_v35 = vld [vmem:[%s7949_s22 + $0xb8] sm:$0xff] }
 0xdb0   :  { %6185 = vmatpush3.msra.mxu0 %v5491_v4  ;;  %v5702_v4 = vld [vmem:[%s7949_s22 + $0x38] sm:$0xff] }
 0xdb1   :  { %6186 = vmatprep.subr.mxu0 %v5506_v3  ;;  %v5717_v3 = vld [vmem:[%s7949_s22 + $0xb0] sm:$0xff] }
 0xdb2   :  { %6187 = vmatpush3.msra.mxu0 %v5490_v5  ;;  %v5701_v5 = vld [vmem:[%s7949_s22 + $0x30] sm:$0xff] }
 0xdb3   :  { %6188 = vmatprep.subr.mxu0 %v5505_v10  ;;  %v5716_v10 = vld [vmem:[%s7949_s22 + $0xa8] sm:$0xff] }
 0xdb4   :  { %6189 = vmatpush3.msra.mxu0 %v5489_v54  ;;  %v5700_v54 = vld [vmem:[%s7949_s22 + $0x28] sm:$0xff] }
 0xdb5   :  { %6190 = vmatprep.subr.mxu0 %v5504_v26  ;;  %v5715_v26 = vld [vmem:[%s7949_s22 + $0xa0] sm:$0xff] }
 0xdb6   :  { %6191 = vmatpush3.msra.mxu0 %v5488_v27  ;;  %v5699_v27 = vld [vmem:[%s7949_s22 + $0x20] sm:$0xff] }
 0xdb7   :  { %6192 = vmatprep.subr.mxu0 %v5503_v56  ;;  %v5714_v56 = vld [vmem:[%s7949_s22 + $0x98] sm:$0xff] }
 0xdb8   :  { %6193 = vmatpush3.msra.mxu0 %v5487_v25  ;;  %v5698_v25 = vld [vmem:[%s7949_s22 + $0x18] sm:$0xff] }
 0xdb9   :  { %6194 = vmatprep.subr.mxu0 %v5502_v7  ;;  %v5713_v7 = vld [vmem:[%s7949_s22 + $0x90] sm:$0xff] }
 0xdba   :  { %6195 = vmatpush3.msra.mxu0 %v5486_v16  ;;  %v5697_v16 = vld [vmem:[%s7949_s22 + $0x10] sm:$0xff] }
 0xdbb   :  { %6196 = vmatprep.subr.mxu0 %v5501_v17  ;;  %v5712_v17 = vld [vmem:[%s7949_s22 + $0x88] sm:$0xff] }
 0xdbc   :  { %6197 = vmatpush3.msra.mxu0 %v5485_v18  ;;  %v5696_v18 = vld [vmem:[%s7949_s22 + $0x8] sm:$0xff] }
 0xdbd   :  { %6198 = vmatprep.subr.mxu0 %v5500_v8  ;;  %v5711_v8 = vld [vmem:[%s7949_s22 + $0x80] sm:$0xff] }
 0xdbe   :  { %6199 = vmatpush3.msra.mxu0 %v5484_v19  ;;  %v5695_v19 = vld [vmem:[%s7949_s22] sm:$0xff]  ;;  %s6983_s22 = smov 120  }
 0xe5b   :  { %v5463_v21 = vpop.f32.mrf.mxu1 }
 0xe5d   :  { %v5465_v36 = vpop.f32.mrf.mxu1 }
 0xe5f   :  { %v5392_v22 = vpop.f32.mrf.mxu0 }
 0xe60   :  { %v5464_v24 = vadd.f32 %v5463_v21, %v5392_v22  ;;  %v5607_v21 = vld [vmem:[#allocation34] sm:$0x3] }
 0xe61   :  { %v5394_v45 = vpop.f32.mrf.mxu0  ;;  %v5612_v22 = vrot.slane %v5607_v21, %v7450_v6 }
 0xe62   :  { %v5466_v49 = vadd.f32 %v5465_v36, %v5394_v45  ;;  %v5480_v53 = vadd.f32 %v5473_v23, %v5464_v24  ;;  %v5616_v23 = vrot.slane %v5607_v21, %v7452_v15 }
 0xe64   :  { %v5481_v39 = vadd.f32 %v5477_v34, %v5466_v49  ;;  %v5482_v60 = vmax.f32 %v5480_v53, 0.0 }
 0xe66   :  { %v5483_v43 = vmax.f32 %v5481_v39, 0.0 }
 0xe68   :  { %5587 = vmatprep.mubr.f32.mxu0 %v5483_v43  ;;  %v5975_v43 = vld [vmem:[#allocation35] ss:$0 sm:$0xff] }
 0xe69   :  { %5588 = vmatmul.mubr.f32.vlgmr.msra.gmra.mxu0 %v5482_v60 }
 0xf29   :  { %v6200_v37 = vpop.f32.mrf.mxu0 }
 0xf2b   :  { %v6201_v28 = vpop.f32.mrf.mxu0 }
 0xf2c   :  { %v6202_v55 = vadd.f32 %v6201_v28, %v6200_v37 }
 0xf2e   :  { %v5590_v40 = vadd.f32 %v6202_v55, %v5972_v61 }
 0xf30   :  { %v5973_v11 = vmul.f32 -1.442695, %v5590_v40 }
 0xf32   :  { %6374 = vpow2.f32 %v5973_v11 }
 0xf3f   :  { %v6375_v38 = vpop.eup %6374 }
 0xf40   :  { %v5596_v41 = vadd.f32 1.0, %v6375_v38 }
 0xf42   :  { %6376 = vrcp.f32 %v5596_v41 }
 0xf4f   :  { %v6377_v1 = vpop.eup %6376 }
 0xf50   :  { %5974 = vmatmul.mubr.msk.f32.vlgmr.msra.gmra.mxu1 %vm621_vm1, %v6377_v1  ;;  %5827 = vst.msk [vmem:[#allocation42] sm:$0x3] %vm5826_vm7, %v6377_v1 }
 0xf51   :  { %6204 = vmatpush3.msra.mxu1 %v5710_v57 }
 0xf52   :  { %6205 = vmatprep.subr.mxu1 %v5725_v58 }
 0xf53   :  { %6206 = vmatpush3.msra.mxu1 %v5709_v44 }
 0xf54   :  { %6207 = vmatprep.subr.mxu1 %v5724_v32 }
 0xf55   :  { %6208 = vmatpush3.msra.mxu1 %v5708_v2 }
 0xf56   :  { %6209 = vmatprep.subr.mxu1 %v5723_v59 }
 0xf57   :  { %6210 = vmatpush3.msra.mxu1 %v5707_v30 }
 0xf58   :  { %6211 = vmatprep.subr.mxu1 %v5722_v48 }
 0xf59   :  { %6212 = vmatpush3.msra.mxu1 %v5706_v33 }
 0xf5a   :  { %6213 = vmatprep.subr.mxu1 %v5721_v62 }
 0xf5b   :  { %6214 = vmatpush3.msra.mxu1 %v5705_v42 }
 0xf5c   :  { %6215 = vmatprep.subr.mxu1 %v5720_v63 }
 0xf5d   :  { %6216 = vmatpush3.msra.mxu1 %v5704_v9 }
 0xf5e   :  { %6217 = vmatprep.subr.mxu1 %v5719_v13 }
 0xf5f   :  { %6218 = vmatpush3.msra.mxu1 %v5703_v0 }
 0xf60   :  { %6219 = vmatprep.subr.mxu1 %v5718_v35 }
 0xf61   :  { %6220 = vmatpush3.msra.mxu1 %v5702_v4 }
 0xf62   :  { %6221 = vmatprep.subr.mxu1 %v5717_v3 }
 0xf63   :  { %6222 = vmatpush3.msra.mxu1 %v5701_v5 }
 0xf64   :  { %6223 = vmatprep.subr.mxu1 %v5716_v10 }
 0xf65   :  { %6224 = vmatpush3.msra.mxu1 %v5700_v54 }
 0xf66   :  { %6225 = vmatprep.subr.mxu1 %v5715_v26 }
 0xf67   :  { %6226 = vmatpush3.msra.mxu1 %v5699_v27 }
 0xf68   :  { %6227 = vmatprep.subr.mxu1 %v5714_v56 }
 0xf69   :  { %6228 = vmatpush3.msra.mxu1 %v5698_v25 }
 0xf6a   :  { %6229 = vmatprep.subr.mxu1 %v5713_v7 }
 0xf6b   :  { %6230 = vmatpush3.msra.mxu1 %v5697_v16 }
 0xf6c   :  { %6231 = vmatprep.subr.mxu1 %v5712_v17 }
 0xf6d   :  { %6232 = vmatpush3.msra.mxu1 %v5696_v18 }
 0xf6e   :  { %6233 = vmatprep.subr.mxu1 %v5711_v8 }
 0xf6f   :  { %6234 = vmatpush3.msra.mxu1 %v5695_v19 }
0x1010   :  { %v5688_v24 = vpop.f32.mrf.mxu1 }
0x1011   :  { %v5689_v34 = vadd.f32 %v5688_v24, %v5612_v22 }
0x1012   :  { %v5690_v45 = vpop.f32.mrf.mxu1 }
0x1013   :  { %v5691_v36 = vadd.f32 %v5690_v45, %v5616_v23  ;;  %v5693_v53 = vmax.f32 %v5689_v34, 0.0 }
0x1015   :  { %v5694_v49 = vmax.f32 %v5691_v36, 0.0 }
0x1017   :  { %5798 = vmatprep.mubr.f32.mxu1 %v5694_v49 }
0x1018   :  { %5799 = vmatmul.mubr.f32.vlgmr.msra.gmra.mxu1 %v5693_v53 }
0x10d8   :  { %v6235_v39 = vpop.f32.mrf.mxu1 }
0x10da   :  { %v6236_v60 = vpop.f32.mrf.mxu1 }
0x10db   :  { %v6237_v46 = vadd.f32 %v6236_v60, %v6235_v39 }
0x10dd   :  { %v5801_v47 = vadd.f32 %v6237_v46, %v5975_v43 }
0x10df   :  { %v5804_v50 = vmul.f32 0.5, %v5801_v47  ;;  %5822 = vrot.lane.b32.xlu1 %v5801_v47, %s6983_s22  ;;  %5820 = vst.msk [vmem:[#allocation39] sm:$0x3] %vm5818_vm8, %v5801_v47 }
0x10e1   :  { %v5805_v6 = vmul.f32 1.442695, %v5804_v50 }
0x10e3   :  { %6378 = vpow2.f32 %v5805_v6 }
0x10e4   :  { %6851 = shalt.err (!%p6848_p7)
}
0x10e5   :  { %5847 = dma.vmem_to_hbm [thread:$0]  %s5845_s21, 32, %s7953_s26, [#allocation40]   ;;  %v5810_v15 = vpop.permute.xlu0 %5809 }
0x10e6   :  { %s6985_s25 = smov [#allocation42]  }
0x10e7   :  { %s5864_s2 = sshll.u32 %s6985_s25, 4  ;;  %s5865_s2 = int_to_ptr.vmem [resolvable:$true] %s5864_s2 }
0x10e8   :  { %s6860_s13 = scalar_lea.vmem %s5865_s2, 32  ;;  %p6865_p9 = scmp.lt.s32.totalorder %s5865_s2, %s5865_s2 }
0x10e9   :  { %p6861_p8 = scmp.ne.s32.totalorder %s5865_s2, %s6860_s13  ;;  %p6866_p10 = scmp.lt.s32.totalorder %s6860_s13, %s6860_s13 }
0x10eb   :  { %p6867_p11 = por %p6866_p10, %p6865_p9 }
0x10ed   :  { %p6868_p12 = pnand %p6867_p11, %p6861_p8 }
0x10ef   :  { %6871 = shalt.err (!%p6868_p12)
}
0x10f0   :  { %5867 = dma.vmem_to_hbm [thread:$0]  %s5865_s2, 32, %s7955_s28, [#allocation43]   ;;  %v6379_v51 = vpop.eup %6378 }
0x10f1   :  { %v5812_v52 = vmul.f32 %v6379_v51, %v5810_v15  ;;  %s6986_s20 = smov [#allocation41]  }
0x10f2   :  { %s5854_s26 = sshll.u32 %s6986_s20, 4  ;;  %s5855_s26 = int_to_ptr.vmem [resolvable:$true] %s5854_s26 }
0x10f3   :  { %5814 = vrot.lane.b32.xlu0 %v5812_v52, %s6983_s22  ;;  %s6880_s4 = scalar_lea.vmem %s5855_s26, 32  ;;  %p6885_p0 = scmp.lt.s32.totalorder %s5855_s26, %s5855_s26 }
0x10f4   :  { %p6881_p13 = scmp.ne.s32.totalorder %s5855_s26, %s6880_s4  ;;  %p6886_p1 = scmp.lt.s32.totalorder %s6880_s4, %s6880_s4 }
0x10f6   :  { %p6887_p2 = por %p6886_p1, %p6885_p0 }
0x10f8   :  { %p6888_p3 = pnand %p6887_p2, %p6881_p13 }
0x1151   :  { %v5823_v12 = vpop.permute.xlu1 %5822 }
0x1152   :  { %5825 = vst.msk [vmem:[#allocation41] sm:$0x3] %vm5818_vm8, %v5823_v12 }
0x1153   :  { %6891 = shalt.err (!%p6888_p3)
}
0x1154   :  { %5857 = dma.vmem_to_hbm [thread:$0]  %s5855_s26, 32, %s7954_s27, [#allocation40]  }
0x1155   :  { %s6987_s28 = smov [#allocation38]  }
0x1156   :  { %s5834_s3 = sshll.u32 %s6987_s28, 4  ;;  %s5835_s3 = int_to_ptr.vmem [resolvable:$true] %s5834_s3 }
0x1157   :  { %s6900_s18 = scalar_lea.vmem %s5835_s3, 32  ;;  %p6905_p5 = scmp.lt.s32.totalorder %s5835_s3, %s5835_s3 }
0x1158   :  { %p6901_p4 = scmp.ne.s32.totalorder %s5835_s3, %s6900_s18  ;;  %p6906_p6 = scmp.lt.s32.totalorder %s6900_s18, %s6900_s18 }
0x115a   :  { %p6907_p7 = por %p6906_p6, %p6905_p5 }
0x115c   :  { %p6908_p8 = pnand %p6907_p7, %p6901_p4 }
0x1165   :  { %v5815_v29 = vpop.permute.xlu0 %5814 }
0x1166   :  { %v5817_v31 = vadd.f32 %v5815_v29, %v5801_v47 }
0x1168   :  { %5819 = vst.msk [vmem:[#allocation38] sm:$0x3] %vm5818_vm8, %v5817_v31 }
0x1169   :  { %6911 = shalt.err (!%p6908_p8)
}
0x116a   :  { %s7989_s11 = sld [smem:[#allocation72_spill]] }
0x1170   :  { %5837 = dma.vmem_to_hbm [thread:$0]  %s5835_s3, 32, %s7989_s11, [#allocation4]  }
0x1171   :  { %6944 = dma.done.wait [#allocation4], 32  }
0x1172   :  { %6945 = vsyncadd [#allocation4], 4294967264 }
0x1173   :  { %6946 = dma.done.wait [#allocation40], 64  }
0x1174   :  { %6947 = vsyncadd [#allocation40], 4294967232 }
0x1175   :  { %6948 = dma.done.wait [#allocation43], 32  }
0x1176   :  { %6949 = vsyncadd [#allocation43], 4294967264 }
0x1177   :  { %5880 = vsyncpa [#allocation3], 1 }
0x1178   :  { %5881 = vsyncpa [#allocation6], 1 }
0x1179   :  { %5882 = vsyncpa [#allocation9], 1 }
0x117a   :  { %5883 = vsyncpa [#allocation12], 1 }
0x117b   :  { %5884 = vsyncpa [#allocation15], 1 }
0x117c   :  { %5885 = vsyncpa [#allocation18], 1 }
0x117d   :  { %5886 = vsyncpa [#allocation21], 1 }
0x117e   :  { %5887 = vsyncpa [#allocation24], 1 }
0x117f   :  { %5888 = vsyncpa [#allocation27], 1 }
0x1180   :  { %5889 = vsyncpa [#allocation30], 1 }
0x1181   :  { %5890 = vsyncpa [#allocation33], 1 }
0x1182   :  { %5891 = vsyncpa [#allocation36], 1 }
0x1183   :  { %5892 = vsyncpa [#allocation4], 1 }
0x1184   :  { %5893 = vsyncpa [#allocation40], 1 }
0x1185   :  { %5894 = vsyncpa [#allocation43], 1 }

</bundles_post_ra>
